<compile_context>
chip_gen: v5e
topology: v5e:2x2
jax: 0.10.0
libtpu: 0.0.40
codegen_flags: <defaults>
</compile_context>

<pallas_src>
import functools

import jax
import jax.numpy as jnp
import numpy as np
from jax import lax
from jax.experimental import pallas as pl
from jax.experimental.pallas import tpu as pltpu

BN_EPS = 1e-5


def _round_up(x, m):
    return (x + m - 1) // m * m


# ----------------------------------------------------------------------------
# Pallas kernels
# ----------------------------------------------------------------------------
def _mm_stats_kernel(x_ref, w_ref, y_ref, s_ref, sq_ref):
    """Pass 1: Y[m-tile] += X[m-tile,k-tile] @ W[k-tile]; on the last K step
    accumulate per-channel sum(Y) and sum(Y*Y) across the whole M grid."""
    k = pl.program_id(1)
    n_k = pl.num_programs(1)

    @pl.when(k == 0)
    def _zero_acc():
        y_ref[...] = jnp.zeros_like(y_ref)

    # bf16 operands on the MXU, f32 accumulation.
    y_ref[...] += jnp.dot(x_ref[...], w_ref[...],
                          preferred_element_type=jnp.float32)

    last_k = k == n_k - 1

    @pl.when(jnp.logical_and(last_k, pl.program_id(0) == 0))
    def _zero_stats():
        s_ref[...] = jnp.zeros_like(s_ref)
        sq_ref[...] = jnp.zeros_like(sq_ref)

    @pl.when(last_k)
    def _acc_stats():
        y = y_ref[...]
        s_ref[...] += jnp.sum(y, axis=0, keepdims=True)
        sq_ref[...] += jnp.sum(y * y, axis=0, keepdims=True)


def _bn_apply_kernel(y_ref, s_ref, sq_ref, g_ref, b_ref, o_ref, *,
                     inv_m, eps, relu):
    """Pass 2: normalize with batch stats (var = E[y^2] - mean^2), affine,
    optional ReLU."""
    y = y_ref[...]
    mean = s_ref[...] * inv_m
    var = jnp.maximum(sq_ref[...] * inv_m - mean * mean, 0.0)
    out = (y - mean) * lax.rsqrt(var + eps) * g_ref[...] + b_ref[...]
    if relu:
        out = jnp.maximum(out, 0.0)
    o_ref[...] = out.astype(o_ref.dtype)


def _bn_add_relu_kernel(y_ref, r_ref, s_ref, sq_ref, g_ref, b_ref, o_ref, *,
                        inv_m, eps):
    """Pass 2 for the last conv: BN + residual add + final ReLU fused."""
    y = y_ref[...]
    mean = s_ref[...] * inv_m
    var = jnp.maximum(sq_ref[...] * inv_m - mean * mean, 0.0)
    out = (y - mean) * lax.rsqrt(var + eps) * g_ref[...] + b_ref[...]
    out = out + r_ref[...].astype(jnp.float32)
    o_ref[...] = jnp.maximum(out, 0.0).astype(o_ref.dtype)


# ----------------------------------------------------------------------------
# Fused linear (matmul) + BatchNorm(train) [+ residual add + ReLU]
# ----------------------------------------------------------------------------
def linear_bn(xm, wm, gamma, beta, *, relu, residual=None,
              out_dtype=jnp.bfloat16, tile_m=512, tile_k=None):
    """xm: [M, K], wm: [K, C], gamma/beta: [C].  Returns [M, C] out_dtype.

    BN uses batch statistics over all M rows (training mode, biased var),
    accumulated across the M-tile grid in pass 1 and applied in pass 2.
    """
    M, K = xm.shape
    C = wm.shape[1]

    # bf16 MXU operands: half the DMA bytes, native MXU dtype on v5e/v6e/v7x.
    x = xm.astype(jnp.bfloat16)
    w = wm.astype(jnp.bfloat16)

    tm = min(int(tile_m), _round_up(M, 8))
    tm = max(8, tm - tm % 8)
    Mp = _round_up(M, tm)
    if Mp != M:
        # Zero rows contribute 0 to sum/sumsq; stats are divided by true M.
        x = jnp.pad(x, ((0, Mp - M), (0, 0)))

    if tile_k is None:
        tk = K if K <= 1024 else 512   # 512 = multiple of 256 (v6e MXU width)
    else:
        tk = int(tile_k)
    Kp = _round_up(K, tk)
    if Kp != K:
        x = jnp.pad(x, ((0, 0), (0, Kp - K)))
        w = jnp.pad(w, ((0, Kp - K), (0, 0)))
    n_m, n_k = Mp // tm, Kp // tk

    # ---- pass 1: matmul + per-channel sum / sumsq -------------------------
    y, s, sq = pl.pallas_call(
        _mm_stats_kernel,
        out_shape=(jax.ShapeDtypeStruct((Mp, C), jnp.float32),
                   jax.ShapeDtypeStruct((1, C), jnp.float32),
                   jax.ShapeDtypeStruct((1, C), jnp.float32)),
        grid=(n_m, n_k),
        in_specs=[
            pl.BlockSpec((tm, tk), lambda m, k: (m, k)),
            # weight block index is constant in m -> stays resident in VMEM
            pl.BlockSpec((tk, C), lambda m, k: (k, 0)),
        ],
        out_specs=(
            pl.BlockSpec((tm, C), lambda m, k: (m, 0)),
            pl.BlockSpec((1, C), lambda m, k: (0, 0)),   # accumulators, live
            pl.BlockSpec((1, C), lambda m, k: (0, 0)),   # across whole grid
        ),
        # Both axes carry state (K accum, cross-M stats) -> "arbitrary".
        compiler_params=pltpu.CompilerParams(
            dimension_semantics=("arbitrary", "arbitrary")),
    )(x, w)

    # ---- pass 2: BN apply (+ fused residual add + ReLU) -------------------
    g2 = gamma.reshape(1, C).astype(jnp.float32)
    b2 = beta.reshape(1, C).astype(jnp.float32)
    inv_m = 1.0 / float(M)

    if residual is None:
        kern = functools.partial(_bn_apply_kernel, inv_m=inv_m, eps=BN_EPS,
                                 relu=relu)
        in_specs = [
            pl.BlockSpec((tm, C), lambda m: (m, 0)),
            pl.BlockSpec((1, C), lambda m: (0, 0)),
            pl.BlockSpec((1, C), lambda m: (0, 0)),
            pl.BlockSpec((1, C), lambda m: (0, 0)),
            pl.BlockSpec((1, C), lambda m: (0, 0)),
        ]
        args = (y, s, sq, g2, b2)
    else:
        r = residual.astype(jnp.bfloat16)
        if Mp != M:
            r = jnp.pad(r, ((0, Mp - M), (0, 0)))
        kern = functools.partial(_bn_add_relu_kernel, inv_m=inv_m, eps=BN_EPS)
        in_specs = [
            pl.BlockSpec((tm, C), lambda m: (m, 0)),
            pl.BlockSpec((tm, C), lambda m: (m, 0)),
            pl.BlockSpec((1, C), lambda m: (0, 0)),
            pl.BlockSpec((1, C), lambda m: (0, 0)),
            pl.BlockSpec((1, C), lambda m: (0, 0)),
            pl.BlockSpec((1, C), lambda m: (0, 0)),
        ]
        args = (y, r, s, sq, g2, b2)

    out = pl.pallas_call(
        kern,
        out_shape=jax.ShapeDtypeStruct((Mp, C), out_dtype),
        grid=(n_m,),
        in_specs=in_specs,
        out_specs=pl.BlockSpec((tm, C), lambda m: (m, 0)),
        # Independent per M tile -> parallel (shards across v7x's 2 TCs).
        compiler_params=pltpu.CompilerParams(
            dimension_semantics=("parallel",)),
    )(*args)

    return out[:M] if Mp != M else out


# ----------------------------------------------------------------------------
# Conv wrappers (layout / im2col glue in JAX, hot path in Pallas)
# ----------------------------------------------------------------------------
def conv1x1_bn(x_nhwc, w_oihw, gamma, beta, *, stride=1, relu=False,
               residual=None, out_dtype=jnp.bfloat16, tile_m=512):
    if stride > 1:
        # TODO(synk): fold the spatial stride into the matmul BlockSpec
        # index_map instead of relying on XLA to fuse this strided slice into
        # the layout copy feeding the kernel.
        x_nhwc = x_nhwc[:, ::stride, ::stride, :]
    N, H, W, Cin = x_nhwc.shape
    Cout = w_oihw.shape[0]
    xm = x_nhwc.reshape(N * H * W, Cin)
    wm = jnp.transpose(w_oihw.reshape(Cout, Cin))          # [Cin, Cout]
    res2d = None if residual is None else residual.reshape(N * H * W, Cout)
    y = linear_bn(xm, wm, gamma, beta, relu=relu, residual=res2d,
                  out_dtype=out_dtype, tile_m=tile_m)
    return y.reshape(N, H, W, Cout)


def conv3x3_bn(x_nhwc, w_oihw, gamma, beta, *, stride=1, relu=False,
               residual=None, out_dtype=jnp.bfloat16, tile_m=512):
    N, H, W, Cin = x_nhwc.shape
    Cout = w_oihw.shape[0]
    xp = jnp.pad(x_nhwc, ((0, 0), (1, 1), (1, 1), (0, 0)))
    Ho = (H + 2 - 3) // stride + 1
    Wo = (W + 2 - 3) // stride + 1
    # TODO(synk): replace this im2col HBM expansion with a tap-indexed K grid
    # axis (BlockSpec element offsets into the padded NHWC tensor).  The
    # expanded matrix is at least built in bf16 and streamed in M/K tiles,
    # but it is still ~9x the activation bytes through HBM.
    patches = [
        xp[:, kh:kh + stride * (Ho - 1) + 1:stride,
              kw:kw + stride * (Wo - 1) + 1:stride, :]
        for kh in range(3) for kw in range(3)
    ]
    # K dim ordered (kh, kw, cin) to match the weight reshape below.
    xm = jnp.stack(patches, axis=3).astype(jnp.bfloat16).reshape(
        N * Ho * Wo, 9 * Cin)
    wm = jnp.transpose(w_oihw, (2, 3, 1, 0)).reshape(9 * Cin, Cout)
    res2d = None if residual is None else residual.reshape(N * Ho * Wo, Cout)
    y = linear_bn(xm, wm, gamma, beta, relu=relu, residual=res2d,
                  out_dtype=out_dtype, tile_m=tile_m)
    return y.reshape(N, Ho, Wo, Cout)


# ----------------------------------------------------------------------------
# ResidualBlock forward
# ----------------------------------------------------------------------------
def residual_block_forward(x_nchw, params, *, stride, bottleneck=True,
                           tile_m=512):
    x = jnp.transpose(x_nchw, (0, 2, 3, 1))                 # NCHW -> NHWC

    # Shortcut path first (it feeds the fused epilogue of the last conv).
    if "wp" in params:  # projection shortcut (in_ch != out_ch or stride > 1)
        identity = conv1x1_bn(x, params["wp"], params["gp"], params["bp"],
                              stride=stride, relu=False,
                              out_dtype=jnp.bfloat16, tile_m=tile_m)
    else:
        identity = x.astype(jnp.bfloat16)

    if bottleneck:
        h = conv1x1_bn(x, params["w1"], params["g1"], params["b1"],
                       relu=True, out_dtype=jnp.bfloat16, tile_m=tile_m)
        h = conv3x3_bn(h, params["w2"], params["g2"], params["b2"],
                       stride=stride, relu=True,
                       out_dtype=jnp.bfloat16, tile_m=tile_m)
        # Last conv: BN + residual add + final ReLU fused in the epilogue.
        out = conv1x1_bn(h, params["w3"], params["g3"], params["b3"],
                         relu=True, residual=identity,
                         out_dtype=jnp.float32, tile_m=tile_m)
    else:
        h = conv3x3_bn(x, params["w1"], params["g1"], params["b1"],
                       stride=stride, relu=True,
                       out_dtype=jnp.bfloat16, tile_m=tile_m)
        out = conv3x3_bn(h, params["w2"], params["g2"], params["b2"],
                         stride=1, relu=True, residual=identity,
                         out_dtype=jnp.float32, tile_m=tile_m)

    return jnp.transpose(out, (0, 3, 1, 2))                 # back to NCHW


# ----------------------------------------------------------------------------
# Pure-JAX reference (lax.conv, f32) for correctness check
# ----------------------------------------------------------------------------
def _ref_conv_bn(x, w_oihw, gamma, beta, *, stride, pad, relu):
    w_hwio = jnp.transpose(w_oihw, (2, 3, 1, 0))
    y = lax.conv_general_dilated(
        x, w_hwio, (stride, stride), [(pad, pad), (pad, pad)],
        dimension_numbers=("NHWC", "HWIO", "NHWC"),
        preferred_element_type=jnp.float32)
    mean = jnp.mean(y, axis=(0, 1, 2), keepdims=True)
    var = jnp.mean((y - mean) ** 2, axis=(0, 1, 2), keepdims=True)
    y = (y - mean) * lax.rsqrt(var + BN_EPS) * gamma + beta
    return jnp.maximum(y, 0.0) if relu else y


def _ref_forward(x_nchw, params, *, stride):
    x = jnp.transpose(x_nchw, (0, 2, 3, 1)).astype(jnp.float32)
    out = _ref_conv_bn(x, params["w1"], params["g1"], params["b1"],
                       stride=1, pad=0, relu=True)
    out = _ref_conv_bn(out, params["w2"], params["g2"], params["b2"],
                       stride=stride, pad=1, relu=True)
    out = _ref_conv_bn(out, params["w3"], params["g3"], params["b3"],
                       stride=1, pad=0, relu=False)
    idn = _ref_conv_bn(x, params["wp"], params["gp"], params["bp"],
                       stride=stride, pad=0, relu=False)
    y = jnp.maximum(out + idn, 0.0)
    return jnp.transpose(y, (0, 3, 1, 2))


# ----------------------------------------------------------------------------
if __name__ == "__main__":
    # Config: ResidualBlock(in_ch=4, out_ch=8, stride=2, bottleneck=True)
    in_ch, out_ch, stride, scale = 4, 8, 2, 4
    hid_ch = out_ch // scale
    N, H, W = 2, 16, 16

    key = jax.random.PRNGKey(0)
    k = jax.random.split(key, 6)
    params = {
        # Bottleneck weights (PyTorch conv layout: [Cout, Cin, kh, kw])
        "w1": 0.1 * jax.random.normal(k[0], (hid_ch, in_ch, 1, 1), jnp.float32),
        "g1": jnp.ones((hid_ch,), jnp.float32),
        "b1": jnp.zeros((hid_ch,), jnp.float32),
        "w2": 0.1 * jax.random.normal(k[1], (hid_ch, hid_ch, 3, 3), jnp.float32),
        "g2": jnp.ones((hid_ch,), jnp.float32),
        "b2": jnp.zeros((hid_ch,), jnp.float32),
        "w3": 0.1 * jax.random.normal(k[2], (out_ch, hid_ch, 1, 1), jnp.float32),
        "g3": jnp.ones((out_ch,), jnp.float32),
        "b3": jnp.zeros((out_ch,), jnp.float32),
        # projection shortcut (in_ch != out_ch and stride > 1)
        "wp": 0.1 * jax.random.normal(k[3], (out_ch, in_ch, 1, 1), jnp.float32),
        "gp": jnp.ones((out_ch,), jnp.float32),
        "bp": jnp.zeros((out_ch,), jnp.float32),
    }

    x = jax.random.normal(k[4], (N, in_ch, H, W), jnp.float32)

    # tile_m=128 so the first conv (M = 2*16*16 = 512) runs a 4-step M grid
    # and actually exercises the tiled / pipelined path at this toy size.
    fwd = jax.jit(functools.partial(residual_block_forward,
                                    stride=stride, bottleneck=True,
                                    tile_m=128))
    out = fwd(x, params)
    out = jax.block_until_ready(out)

    assert out.shape == (N, out_ch, H // stride, W // stride), out.shape

    # Cross-check against a pure-f32 lax.conv reference of the same math.
    # Tolerance accounts for bf16 MXU operands / bf16 inter-layer activations.
    ref = jax.jit(functools.partial(_ref_forward, stride=stride))(x, params)
    np.testing.assert_allclose(np.asarray(out), np.asarray(ref),
                               rtol=5e-2, atol=5e-2)

    print("KERNEL_OK")
</pallas_src>

<mosaic_0001>
module attributes {stable_mosaic.version = 11 : i64} {
  func.func @_bn_apply_kernel(%arg0: i32, %arg1: memref<128x2xf32, #tpu.memory_space<vmem>>, %arg2: memref<1x2xf32, #tpu.memory_space<vmem>>, %arg3: memref<1x2xf32, #tpu.memory_space<vmem>>, %arg4: memref<1x2xf32, #tpu.memory_space<vmem>>, %arg5: memref<1x2xf32, #tpu.memory_space<vmem>>, %arg6: memref<128x2xbf16, #tpu.memory_space<vmem>>) attributes {dimension_semantics = [#tpu.dimension_semantics<parallel>], iteration_bounds = array<i64: 4>, scalar_prefetch = 0 : i64, scratch_operands = 0 : i64, tpu.core_type = #tpu.core_type<tc>, window_params = [{transform_indices = @transform_0, window_bounds = array<i64: 128, 2>}, {pipeline_mode = #tpu.pipeline_mode<synchronous>, transform_indices = @transform_1, window_bounds = array<i64: 1, 2>}, {pipeline_mode = #tpu.pipeline_mode<synchronous>, transform_indices = @transform_2, window_bounds = array<i64: 1, 2>}, {pipeline_mode = #tpu.pipeline_mode<synchronous>, transform_indices = @transform_3, window_bounds = array<i64: 1, 2>}, {pipeline_mode = #tpu.pipeline_mode<synchronous>, transform_indices = @transform_4, window_bounds = array<i64: 1, 2>}, {transform_indices = @transform_5, window_bounds = array<i64: 128, 2>}]} {
    %c0 = arith.constant 0 : index
    %c0_0 = arith.constant 0 : index
    %0 = vector.load %arg1[%c0, %c0_0] : memref<128x2xf32, #tpu.memory_space<vmem>>, vector<128x2xf32>
    %c0_1 = arith.constant 0 : index
    %c0_2 = arith.constant 0 : index
    %1 = vector.load %arg2[%c0_1, %c0_2] : memref<1x2xf32, #tpu.memory_space<vmem>>, vector<1x2xf32>
    %cst = arith.constant 0.001953125 : f32
    %2 = vector.broadcast %cst : f32 to vector<1x2xf32>
    %3 = arith.mulf %1, %2 : vector<1x2xf32>
    %c0_3 = arith.constant 0 : index
    %c0_4 = arith.constant 0 : index
    %4 = vector.load %arg3[%c0_3, %c0_4] : memref<1x2xf32, #tpu.memory_space<vmem>>, vector<1x2xf32>
    %cst_5 = arith.constant 0.001953125 : f32
    %5 = vector.broadcast %cst_5 : f32 to vector<1x2xf32>
    %6 = arith.mulf %4, %5 : vector<1x2xf32>
    %7 = arith.mulf %3, %3 : vector<1x2xf32>
    %8 = arith.subf %6, %7 : vector<1x2xf32>
    %cst_6 = arith.constant 0.000000e+00 : f32
    %9 = vector.broadcast %cst_6 : f32 to vector<1x2xf32>
    %10 = arith.maximumf %8, %9 : vector<1x2xf32>
    %11 = vector.broadcast %3 : vector<1x2xf32> to vector<128x2xf32>
    %12 = arith.subf %0, %11 : vector<128x2xf32>
    %cst_7 = arith.constant 9.99999974E-6 : f32
    %13 = vector.broadcast %cst_7 : f32 to vector<1x2xf32>
    %14 = arith.addf %10, %13 : vector<1x2xf32>
    %15 = math.rsqrt %14 : vector<1x2xf32>
    %16 = vector.broadcast %15 : vector<1x2xf32> to vector<128x2xf32>
    %17 = arith.mulf %12, %16 : vector<128x2xf32>
    %c0_8 = arith.constant 0 : index
    %c0_9 = arith.constant 0 : index
    %18 = vector.load %arg4[%c0_8, %c0_9] : memref<1x2xf32, #tpu.memory_space<vmem>>, vector<1x2xf32>
    %19 = vector.broadcast %18 : vector<1x2xf32> to vector<128x2xf32>
    %20 = arith.mulf %17, %19 : vector<128x2xf32>
    %c0_10 = arith.constant 0 : index
    %c0_11 = arith.constant 0 : index
    %21 = vector.load %arg5[%c0_10, %c0_11] : memref<1x2xf32, #tpu.memory_space<vmem>>, vector<1x2xf32>
    %22 = vector.broadcast %21 : vector<1x2xf32> to vector<128x2xf32>
    %23 = arith.addf %20, %22 : vector<128x2xf32>
    %cst_12 = arith.constant 0.000000e+00 : f32
    %24 = vector.broadcast %cst_12 : f32 to vector<128x2xf32>
    %25 = arith.maximumf %23, %24 : vector<128x2xf32>
    %26 = arith.truncf %25 : vector<128x2xf32> to vector<128x2xbf16>
    %c0_13 = arith.constant 0 : index
    %c0_14 = arith.constant 0 : index
    %27 = vector.load %arg6[%c0_13, %c0_14] : memref<128x2xbf16, #tpu.memory_space<vmem>>, vector<128x2xbf16>
    tpu.vector_store %arg6[%c0_13, %c0_14], %26 {strides = array<i32>} : memref<128x2xbf16, #tpu.memory_space<vmem>>, vector<128x2xbf16>,
    return
  }
  func.func @transform_0(%arg0: i32) -> (i32, i32) {
    %c0_i32 = arith.constant 0 : i32
    %c0_i32_0 = arith.constant 0 : i32
    return %arg0, %c0_i32 : i32, i32
  }
  func.func @transform_1(%arg0: i32) -> (i32, i32) {
    %c0_i32 = arith.constant 0 : i32
    %c0_i32_0 = arith.constant 0 : i32
    %c0_i32_1 = arith.constant 0 : i32
    return %c0_i32, %c0_i32_0 : i32, i32
  }
  func.func @transform_2(%arg0: i32) -> (i32, i32) {
    %c0_i32 = arith.constant 0 : i32
    %c0_i32_0 = arith.constant 0 : i32
    %c0_i32_1 = arith.constant 0 : i32
    return %c0_i32, %c0_i32_0 : i32, i32
  }
  func.func @transform_3(%arg0: i32) -> (i32, i32) {
    %c0_i32 = arith.constant 0 : i32
    %c0_i32_0 = arith.constant 0 : i32
    %c0_i32_1 = arith.constant 0 : i32
    return %c0_i32, %c0_i32_0 : i32, i32
  }
  func.func @transform_4(%arg0: i32) -> (i32, i32) {
    %c0_i32 = arith.constant 0 : i32
    %c0_i32_0 = arith.constant 0 : i32
    %c0_i32_1 = arith.constant 0 : i32
    return %c0_i32, %c0_i32_0 : i32, i32
  }
  func.func @transform_5(%arg0: i32) -> (i32, i32) {
    %c0_i32 = arith.constant 0 : i32
    %c0_i32_0 = arith.constant 0 : i32
    return %arg0, %c0_i32 : i32, i32
  }
}

module attributes {stable_mosaic.version = 11 : i64} {
  func.func @_mm_stats_kernel(%arg0: i32, %arg1: i32, %arg2: memref<128x4xbf16, #tpu.memory_space<vmem>>, %arg3: memref<4x2xbf16, #tpu.memory_space<vmem>>, %arg4: memref<128x2xf32, #tpu.memory_space<vmem>>, %arg5: memref<1x2xf32, #tpu.memory_space<vmem>>, %arg6: memref<1x2xf32, #tpu.memory_space<vmem>>) attributes {dimension_semantics = [#tpu.dimension_semantics<arbitrary>, #tpu.dimension_semantics<arbitrary>], iteration_bounds = array<i64: 4, 1>, scalar_prefetch = 0 : i64, scratch_operands = 0 : i64, tpu.core_type = #tpu.core_type<tc>, window_params = [{transform_indices = @transform_0, window_bounds = array<i64: 128, 4>}, {transform_indices = @transform_1, window_bounds = array<i64: 4, 2>}, {transform_indices = @transform_2, window_bounds = array<i64: 128, 2>}, {pipeline_mode = #tpu.pipeline_mode<synchronous>, transform_indices = @transform_3, window_bounds = array<i64: 1, 2>}, {pipeline_mode = #tpu.pipeline_mode<synchronous>, transform_indices = @transform_4, window_bounds = array<i64: 1, 2>}]} {
    %c0_i32 = arith.constant 0 : i32
    %0 = arith.cmpi eq, %arg1, %c0_i32 : i32
    %1 = arith.extui %0 : i1 to i32
    %c0_i32_0 = arith.constant 0 : i32
    %2 = arith.cmpi ne, %1, %c0_i32_0 : i32
    scf.if %2 {
      %cst_12 = arith.constant 0.000000e+00 : f32
      %16 = vector.broadcast %cst_12 : f32 to vector<128x2xf32>
      %c0_13 = arith.constant 0 : index
      %c0_14 = arith.constant 0 : index
      %17 = vector.load %arg4[%c0_13, %c0_14] : memref<128x2xf32, #tpu.memory_space<vmem>>, vector<128x2xf32>
      tpu.vector_store %arg4[%c0_13, %c0_14], %16 {strides = array<i32>} : memref<128x2xf32, #tpu.memory_space<vmem>>, vector<128x2xf32>,
    } else {
    }
    %c0 = arith.constant 0 : index
    %c0_1 = arith.constant 0 : index
    %3 = vector.load %arg4[%c0, %c0_1] : memref<128x2xf32, #tpu.memory_space<vmem>>, vector<128x2xf32>
    %c0_2 = arith.constant 0 : index
    %c0_3 = arith.constant 0 : index
    %4 = vector.load %arg2[%c0_2, %c0_3] : memref<128x4xbf16, #tpu.memory_space<vmem>>, vector<128x4xbf16>
    %c0_4 = arith.constant 0 : index
    %c0_5 = arith.constant 0 : index
    %5 = vector.load %arg3[%c0_4, %c0_5] : memref<4x2xbf16, #tpu.memory_space<vmem>>, vector<4x2xbf16>
    %cst = arith.constant dense<0.000000e+00> : vector<128x2xf32>
    %6 = tpu.matmul %4, %5, %cst {dimension_numbers = #tpu.dot_dimension_numbers<[1], [0], [0], [1], [0, 0, 1, 1], [], []>} : vector<128x4xbf16>, vector<4x2xbf16>, vector<128x2xf32> -> vector<128x2xf32>
    %7 = arith.addf %3, %6 : vector<128x2xf32>
    %c0_6 = arith.constant 0 : index
    %c0_7 = arith.constant 0 : index
    %8 = vector.load %arg4[%c0_6, %c0_7] : memref<128x2xf32, #tpu.memory_space<vmem>>, vector<128x2xf32>
    tpu.vector_store %arg4[%c0_6, %c0_7], %7 {strides = array<i32>} : memref<128x2xf32, #tpu.memory_space<vmem>>, vector<128x2xf32>,
    %c0_i32_8 = arith.constant 0 : i32
    %9 = arith.cmpi eq, %arg1, %c0_i32_8 : i32
    %c0_i32_9 = arith.constant 0 : i32
    %10 = arith.cmpi eq, %arg0, %c0_i32_9 : i32
    %11 = arith.andi %9, %10 : i1
    %12 = arith.extui %11 : i1 to i32
    %c0_i32_10 = arith.constant 0 : i32
    %13 = arith.cmpi ne, %12, %c0_i32_10 : i32
    scf.if %13 {
      %cst_12 = arith.constant 0.000000e+00 : f32
      %16 = vector.broadcast %cst_12 : f32 to vector<1x2xf32>
      %c0_13 = arith.constant 0 : index
      %c0_14 = arith.constant 0 : index
      %17 = vector.load %arg5[%c0_13, %c0_14] : memref<1x2xf32, #tpu.memory_space<vmem>>, vector<1x2xf32>
      tpu.vector_store %arg5[%c0_13, %c0_14], %16 {strides = array<i32>} : memref<1x2xf32, #tpu.memory_space<vmem>>, vector<1x2xf32>,
      %cst_15 = arith.constant 0.000000e+00 : f32
      %18 = vector.broadcast %cst_15 : f32 to vector<1x2xf32>
      %c0_16 = arith.constant 0 : index
      %c0_17 = arith.constant 0 : index
      %19 = vector.load %arg6[%c0_16, %c0_17] : memref<1x2xf32, #tpu.memory_space<vmem>>, vector<1x2xf32>
      tpu.vector_store %arg6[%c0_16, %c0_17], %18 {strides = array<i32>} : memref<1x2xf32, #tpu.memory_space<vmem>>, vector<1x2xf32>,
    } else {
    }
    %14 = arith.extui %9 : i1 to i32
    %c0_i32_11 = arith.constant 0 : i32
    %15 = arith.cmpi ne, %14, %c0_i32_11 : i32
    scf.if %15 {
      %c0_12 = arith.constant 0 : index
      %c0_13 = arith.constant 0 : index
      %16 = vector.load %arg4[%c0_12, %c0_13] : memref<128x2xf32, #tpu.memory_space<vmem>>, vector<128x2xf32>
      %c0_14 = arith.constant 0 : index
      %c0_15 = arith.constant 0 : index
      %17 = vector.load %arg5[%c0_14, %c0_15] : memref<1x2xf32, #tpu.memory_space<vmem>>, vector<1x2xf32>
      %cst_16 = arith.constant dense<0.000000e+00> : vector<2xf32>
      %18 = vector.multi_reduction <add>, %16, %cst_16 [0] : vector<128x2xf32> to vector<2xf32>
      %19 = vector.shape_cast %18 : vector<2xf32> to vector<1x2xf32>
      %20 = arith.addf %17, %19 : vector<1x2xf32>
      %c0_17 = arith.constant 0 : index
      %c0_18 = arith.constant 0 : index
      %21 = vector.load %arg5[%c0_17, %c0_18] : memref<1x2xf32, #tpu.memory_space<vmem>>, vector<1x2xf32>
      tpu.vector_store %arg5[%c0_17, %c0_18], %20 {strides = array<i32>} : memref<1x2xf32, #tpu.memory_space<vmem>>, vector<1x2xf32>,
      %c0_19 = arith.constant 0 : index
      %c0_20 = arith.constant 0 : index
      %22 = vector.load %arg6[%c0_19, %c0_20] : memref<1x2xf32, #tpu.memory_space<vmem>>, vector<1x2xf32>
      %23 = arith.mulf %16, %16 : vector<128x2xf32>
      %cst_21 = arith.constant dense<0.000000e+00> : vector<2xf32>
      %24 = vector.multi_reduction <add>, %23, %cst_21 [0] : vector<128x2xf32> to vector<2xf32>
      %25 = vector.shape_cast %24 : vector<2xf32> to vector<1x2xf32>
      %26 = arith.addf %22, %25 : vector<1x2xf32>
      %c0_22 = arith.constant 0 : index
      %c0_23 = arith.constant 0 : index
      %27 = vector.load %arg6[%c0_22, %c0_23] : memref<1x2xf32, #tpu.memory_space<vmem>>, vector<1x2xf32>
      tpu.vector_store %arg6[%c0_22, %c0_23], %26 {strides = array<i32>} : memref<1x2xf32, #tpu.memory_space<vmem>>, vector<1x2xf32>,
    } else {
    }
    return
  }
  func.func @transform_0(%arg0: i32, %arg1: i32) -> (i32, i32) {
    %c0_i32 = arith.constant 0 : i32
    return %arg0, %arg1 : i32, i32
  }
  func.func @transform_1(%arg0: i32, %arg1: i32) -> (i32, i32) {
    %c0_i32 = arith.constant 0 : i32
    %c0_i32_0 = arith.constant 0 : i32
    return %arg1, %c0_i32 : i32, i32
  }
  func.func @transform_2(%arg0: i32, %arg1: i32) -> (i32, i32) {
    %c0_i32 = arith.constant 0 : i32
    %c0_i32_0 = arith.constant 0 : i32
    return %arg0, %c0_i32 : i32, i32
  }
  func.func @transform_3(%arg0: i32, %arg1: i32) -> (i32, i32) {
    %c0_i32 = arith.constant 0 : i32
    %c0_i32_0 = arith.constant 0 : i32
    %c0_i32_1 = arith.constant 0 : i32
    return %c0_i32, %c0_i32_0 : i32, i32
  }
  func.func @transform_4(%arg0: i32, %arg1: i32) -> (i32, i32) {
    %c0_i32 = arith.constant 0 : i32
    %c0_i32_0 = arith.constant 0 : i32
    %c0_i32_1 = arith.constant 0 : i32
    return %c0_i32, %c0_i32_0 : i32, i32
  }
}

module attributes {stable_mosaic.version = 11 : i64} {
  func.func @_mm_stats_kernel(%arg0: i32, %arg1: i32, %arg2: memref<128x18xbf16, #tpu.memory_space<vmem>>, %arg3: memref<18x2xbf16, #tpu.memory_space<vmem>>, %arg4: memref<128x2xf32, #tpu.memory_space<vmem>>, %arg5: memref<1x2xf32, #tpu.memory_space<vmem>>, %arg6: memref<1x2xf32, #tpu.memory_space<vmem>>) attributes {dimension_semantics = [#tpu.dimension_semantics<arbitrary>, #tpu.dimension_semantics<arbitrary>], iteration_bounds = array<i64: 1, 1>, scalar_prefetch = 0 : i64, scratch_operands = 0 : i64, tpu.core_type = #tpu.core_type<tc>, window_params = [{transform_indices = @transform_0, window_bounds = array<i64: 128, 18>}, {transform_indices = @transform_1, window_bounds = array<i64: 18, 2>}, {transform_indices = @transform_2, window_bounds = array<i64: 128, 2>}, {pipeline_mode = #tpu.pipeline_mode<synchronous>, transform_indices = @transform_3, window_bounds = array<i64: 1, 2>}, {pipeline_mode = #tpu.pipeline_mode<synchronous>, transform_indices = @transform_4, window_bounds = array<i64: 1, 2>}]} {
    %c0_i32 = arith.constant 0 : i32
    %0 = arith.cmpi eq, %arg1, %c0_i32 : i32
    %1 = arith.extui %0 : i1 to i32
    %c0_i32_0 = arith.constant 0 : i32
    %2 = arith.cmpi ne, %1, %c0_i32_0 : i32
    scf.if %2 {
      %cst_12 = arith.constant 0.000000e+00 : f32
      %16 = vector.broadcast %cst_12 : f32 to vector<128x2xf32>
      %c0_13 = arith.constant 0 : index
      %c0_14 = arith.constant 0 : index
      %17 = vector.load %arg4[%c0_13, %c0_14] : memref<128x2xf32, #tpu.memory_space<vmem>>, vector<128x2xf32>
      tpu.vector_store %arg4[%c0_13, %c0_14], %16 {strides = array<i32>} : memref<128x2xf32, #tpu.memory_space<vmem>>, vector<128x2xf32>,
    } else {
    }
    %c0 = arith.constant 0 : index
    %c0_1 = arith.constant 0 : index
    %3 = vector.load %arg4[%c0, %c0_1] : memref<128x2xf32, #tpu.memory_space<vmem>>, vector<128x2xf32>
    %c0_2 = arith.constant 0 : index
    %c0_3 = arith.constant 0 : index
    %4 = vector.load %arg2[%c0_2, %c0_3] : memref<128x18xbf16, #tpu.memory_space<vmem>>, vector<128x18xbf16>
    %c0_4 = arith.constant 0 : index
    %c0_5 = arith.constant 0 : index
    %5 = vector.load %arg3[%c0_4, %c0_5] : memref<18x2xbf16, #tpu.memory_space<vmem>>, vector<18x2xbf16>
    %cst = arith.constant dense<0.000000e+00> : vector<128x2xf32>
    %6 = tpu.matmul %4, %5, %cst {dimension_numbers = #tpu.dot_dimension_numbers<[1], [0], [0], [1], [0, 0, 1, 1], [], []>} : vector<128x18xbf16>, vector<18x2xbf16>, vector<128x2xf32> -> vector<128x2xf32>
    %7 = arith.addf %3, %6 : vector<128x2xf32>
    %c0_6 = arith.constant 0 : index
    %c0_7 = arith.constant 0 : index
    %8 = vector.load %arg4[%c0_6, %c0_7] : memref<128x2xf32, #tpu.memory_space<vmem>>, vector<128x2xf32>
    tpu.vector_store %arg4[%c0_6, %c0_7], %7 {strides = array<i32>} : memref<128x2xf32, #tpu.memory_space<vmem>>, vector<128x2xf32>,
    %c0_i32_8 = arith.constant 0 : i32
    %9 = arith.cmpi eq, %arg1, %c0_i32_8 : i32
    %c0_i32_9 = arith.constant 0 : i32
    %10 = arith.cmpi eq, %arg0, %c0_i32_9 : i32
    %11 = arith.andi %9, %10 : i1
    %12 = arith.extui %11 : i1 to i32
    %c0_i32_10 = arith.constant 0 : i32
    %13 = arith.cmpi ne, %12, %c0_i32_10 : i32
    scf.if %13 {
      %cst_12 = arith.constant 0.000000e+00 : f32
      %16 = vector.broadcast %cst_12 : f32 to vector<1x2xf32>
      %c0_13 = arith.constant 0 : index
      %c0_14 = arith.constant 0 : index
      %17 = vector.load %arg5[%c0_13, %c0_14] : memref<1x2xf32, #tpu.memory_space<vmem>>, vector<1x2xf32>
      tpu.vector_store %arg5[%c0_13, %c0_14], %16 {strides = array<i32>} : memref<1x2xf32, #tpu.memory_space<vmem>>, vector<1x2xf32>,
      %cst_15 = arith.constant 0.000000e+00 : f32
      %18 = vector.broadcast %cst_15 : f32 to vector<1x2xf32>
      %c0_16 = arith.constant 0 : index
      %c0_17 = arith.constant 0 : index
      %19 = vector.load %arg6[%c0_16, %c0_17] : memref<1x2xf32, #tpu.memory_space<vmem>>, vector<1x2xf32>
      tpu.vector_store %arg6[%c0_16, %c0_17], %18 {strides = array<i32>} : memref<1x2xf32, #tpu.memory_space<vmem>>, vector<1x2xf32>,
    } else {
    }
    %14 = arith.extui %9 : i1 to i32
    %c0_i32_11 = arith.constant 0 : i32
    %15 = arith.cmpi ne, %14, %c0_i32_11 : i32
    scf.if %15 {
      %c0_12 = arith.constant 0 : index
      %c0_13 = arith.constant 0 : index
      %16 = vector.load %arg4[%c0_12, %c0_13] : memref<128x2xf32, #tpu.memory_space<vmem>>, vector<128x2xf32>
      %c0_14 = arith.constant 0 : index
      %c0_15 = arith.constant 0 : index
      %17 = vector.load %arg5[%c0_14, %c0_15] : memref<1x2xf32, #tpu.memory_space<vmem>>, vector<1x2xf32>
      %cst_16 = arith.constant dense<0.000000e+00> : vector<2xf32>
      %18 = vector.multi_reduction <add>, %16, %cst_16 [0] : vector<128x2xf32> to vector<2xf32>
      %19 = vector.shape_cast %18 : vector<2xf32> to vector<1x2xf32>
      %20 = arith.addf %17, %19 : vector<1x2xf32>
      %c0_17 = arith.constant 0 : index
      %c0_18 = arith.constant 0 : index
      %21 = vector.load %arg5[%c0_17, %c0_18] : memref<1x2xf32, #tpu.memory_space<vmem>>, vector<1x2xf32>
      tpu.vector_store %arg5[%c0_17, %c0_18], %20 {strides = array<i32>} : memref<1x2xf32, #tpu.memory_space<vmem>>, vector<1x2xf32>,
      %c0_19 = arith.constant 0 : index
      %c0_20 = arith.constant 0 : index
      %22 = vector.load %arg6[%c0_19, %c0_20] : memref<1x2xf32, #tpu.memory_space<vmem>>, vector<1x2xf32>
      %23 = arith.mulf %16, %16 : vector<128x2xf32>
      %cst_21 = arith.constant dense<0.000000e+00> : vector<2xf32>
      %24 = vector.multi_reduction <add>, %23, %cst_21 [0] : vector<128x2xf32> to vector<2xf32>
      %25 = vector.shape_cast %24 : vector<2xf32> to vector<1x2xf32>
      %26 = arith.addf %22, %25 : vector<1x2xf32>
      %c0_22 = arith.constant 0 : index
      %c0_23 = arith.constant 0 : index
      %27 = vector.load %arg6[%c0_22, %c0_23] : memref<1x2xf32, #tpu.memory_space<vmem>>, vector<1x2xf32>
      tpu.vector_store %arg6[%c0_22, %c0_23], %26 {strides = array<i32>} : memref<1x2xf32, #tpu.memory_space<vmem>>, vector<1x2xf32>,
    } else {
    }
    return
  }
  func.func @transform_0(%arg0: i32, %arg1: i32) -> (i32, i32) {
    %c0_i32 = arith.constant 0 : i32
    return %arg0, %arg1 : i32, i32
  }
  func.func @transform_1(%arg0: i32, %arg1: i32) -> (i32, i32) {
    %c0_i32 = arith.constant 0 : i32
    %c0_i32_0 = arith.constant 0 : i32
    return %arg1, %c0_i32 : i32, i32
  }
  func.func @transform_2(%arg0: i32, %arg1: i32) -> (i32, i32) {
    %c0_i32 = arith.constant 0 : i32
    %c0_i32_0 = arith.constant 0 : i32
    return %arg0, %c0_i32 : i32, i32
  }
  func.func @transform_3(%arg0: i32, %arg1: i32) -> (i32, i32) {
    %c0_i32 = arith.constant 0 : i32
    %c0_i32_0 = arith.constant 0 : i32
    %c0_i32_1 = arith.constant 0 : i32
    return %c0_i32, %c0_i32_0 : i32, i32
  }
  func.func @transform_4(%arg0: i32, %arg1: i32) -> (i32, i32) {
    %c0_i32 = arith.constant 0 : i32
    %c0_i32_0 = arith.constant 0 : i32
    %c0_i32_1 = arith.constant 0 : i32
    return %c0_i32, %c0_i32_0 : i32, i32
  }
}

module attributes {stable_mosaic.version = 11 : i64} {
  func.func @_mm_stats_kernel(%arg0: i32, %arg1: i32, %arg2: memref<128x2xbf16, #tpu.memory_space<vmem>>, %arg3: memref<2x8xbf16, #tpu.memory_space<vmem>>, %arg4: memref<128x8xf32, #tpu.memory_space<vmem>>, %arg5: memref<1x8xf32, #tpu.memory_space<vmem>>, %arg6: memref<1x8xf32, #tpu.memory_space<vmem>>) attributes {dimension_semantics = [#tpu.dimension_semantics<arbitrary>, #tpu.dimension_semantics<arbitrary>], iteration_bounds = array<i64: 1, 1>, scalar_prefetch = 0 : i64, scratch_operands = 0 : i64, tpu.core_type = #tpu.core_type<tc>, window_params = [{transform_indices = @transform_0, window_bounds = array<i64: 128, 2>}, {transform_indices = @transform_1, window_bounds = array<i64: 2, 8>}, {transform_indices = @transform_2, window_bounds = array<i64: 128, 8>}, {pipeline_mode = #tpu.pipeline_mode<synchronous>, transform_indices = @transform_3, window_bounds = array<i64: 1, 8>}, {pipeline_mode = #tpu.pipeline_mode<synchronous>, transform_indices = @transform_4, window_bounds = array<i64: 1, 8>}]} {
    %c0_i32 = arith.constant 0 : i32
    %0 = arith.cmpi eq, %arg1, %c0_i32 : i32
    %1 = arith.extui %0 : i1 to i32
    %c0_i32_0 = arith.constant 0 : i32
    %2 = arith.cmpi ne, %1, %c0_i32_0 : i32
    scf.if %2 {
      %cst_12 = arith.constant 0.000000e+00 : f32
      %16 = vector.broadcast %cst_12 : f32 to vector<128x8xf32>
      %c0_13 = arith.constant 0 : index
      %c0_14 = arith.constant 0 : index
      %17 = vector.load %arg4[%c0_13, %c0_14] : memref<128x8xf32, #tpu.memory_space<vmem>>, vector<128x8xf32>
      tpu.vector_store %arg4[%c0_13, %c0_14], %16 {strides = array<i32>} : memref<128x8xf32, #tpu.memory_space<vmem>>, vector<128x8xf32>,
    } else {
    }
    %c0 = arith.constant 0 : index
    %c0_1 = arith.constant 0 : index
    %3 = vector.load %arg4[%c0, %c0_1] : memref<128x8xf32, #tpu.memory_space<vmem>>, vector<128x8xf32>
    %c0_2 = arith.constant 0 : index
    %c0_3 = arith.constant 0 : index
    %4 = vector.load %arg2[%c0_2, %c0_3] : memref<128x2xbf16, #tpu.memory_space<vmem>>, vector<128x2xbf16>
    %c0_4 = arith.constant 0 : index
    %c0_5 = arith.constant 0 : index
    %5 = vector.load %arg3[%c0_4, %c0_5] : memref<2x8xbf16, #tpu.memory_space<vmem>>, vector<2x8xbf16>
    %cst = arith.constant dense<0.000000e+00> : vector<128x8xf32>
    %6 = tpu.matmul %4, %5, %cst {dimension_numbers = #tpu.dot_dimension_numbers<[1], [0], [0], [1], [0, 0, 1, 1], [], []>} : vector<128x2xbf16>, vector<2x8xbf16>, vector<128x8xf32> -> vector<128x8xf32>
    %7 = arith.addf %3, %6 : vector<128x8xf32>
    %c0_6 = arith.constant 0 : index
    %c0_7 = arith.constant 0 : index
    %8 = vector.load %arg4[%c0_6, %c0_7] : memref<128x8xf32, #tpu.memory_space<vmem>>, vector<128x8xf32>
    tpu.vector_store %arg4[%c0_6, %c0_7], %7 {strides = array<i32>} : memref<128x8xf32, #tpu.memory_space<vmem>>, vector<128x8xf32>,
    %c0_i32_8 = arith.constant 0 : i32
    %9 = arith.cmpi eq, %arg1, %c0_i32_8 : i32
    %c0_i32_9 = arith.constant 0 : i32
    %10 = arith.cmpi eq, %arg0, %c0_i32_9 : i32
    %11 = arith.andi %9, %10 : i1
    %12 = arith.extui %11 : i1 to i32
    %c0_i32_10 = arith.constant 0 : i32
    %13 = arith.cmpi ne, %12, %c0_i32_10 : i32
    scf.if %13 {
      %cst_12 = arith.constant 0.000000e+00 : f32
      %16 = vector.broadcast %cst_12 : f32 to vector<1x8xf32>
      %c0_13 = arith.constant 0 : index
      %c0_14 = arith.constant 0 : index
      %17 = vector.load %arg5[%c0_13, %c0_14] : memref<1x8xf32, #tpu.memory_space<vmem>>, vector<1x8xf32>
      tpu.vector_store %arg5[%c0_13, %c0_14], %16 {strides = array<i32>} : memref<1x8xf32, #tpu.memory_space<vmem>>, vector<1x8xf32>,
      %cst_15 = arith.constant 0.000000e+00 : f32
      %18 = vector.broadcast %cst_15 : f32 to vector<1x8xf32>
      %c0_16 = arith.constant 0 : index
      %c0_17 = arith.constant 0 : index
      %19 = vector.load %arg6[%c0_16, %c0_17] : memref<1x8xf32, #tpu.memory_space<vmem>>, vector<1x8xf32>
      tpu.vector_store %arg6[%c0_16, %c0_17], %18 {strides = array<i32>} : memref<1x8xf32, #tpu.memory_space<vmem>>, vector<1x8xf32>,
    } else {
    }
    %14 = arith.extui %9 : i1 to i32
    %c0_i32_11 = arith.constant 0 : i32
    %15 = arith.cmpi ne, %14, %c0_i32_11 : i32
    scf.if %15 {
      %c0_12 = arith.constant 0 : index
      %c0_13 = arith.constant 0 : index
      %16 = vector.load %arg4[%c0_12, %c0_13] : memref<128x8xf32, #tpu.memory_space<vmem>>, vector<128x8xf32>
      %c0_14 = arith.constant 0 : index
      %c0_15 = arith.constant 0 : index
      %17 = vector.load %arg5[%c0_14, %c0_15] : memref<1x8xf32, #tpu.memory_space<vmem>>, vector<1x8xf32>
      %cst_16 = arith.constant dense<0.000000e+00> : vector<8xf32>
      %18 = vector.multi_reduction <add>, %16, %cst_16 [0] : vector<128x8xf32> to vector<8xf32>
      %19 = vector.shape_cast %18 : vector<8xf32> to vector<1x8xf32>
      %20 = arith.addf %17, %19 : vector<1x8xf32>
      %c0_17 = arith.constant 0 : index
      %c0_18 = arith.constant 0 : index
      %21 = vector.load %arg5[%c0_17, %c0_18] : memref<1x8xf32, #tpu.memory_space<vmem>>, vector<1x8xf32>
      tpu.vector_store %arg5[%c0_17, %c0_18], %20 {strides = array<i32>} : memref<1x8xf32, #tpu.memory_space<vmem>>, vector<1x8xf32>,
      %c0_19 = arith.constant 0 : index
      %c0_20 = arith.constant 0 : index
      %22 = vector.load %arg6[%c0_19, %c0_20] : memref<1x8xf32, #tpu.memory_space<vmem>>, vector<1x8xf32>
      %23 = arith.mulf %16, %16 : vector<128x8xf32>
      %cst_21 = arith.constant dense<0.000000e+00> : vector<8xf32>
      %24 = vector.multi_reduction <add>, %23, %cst_21 [0] : vector<128x8xf32> to vector<8xf32>
      %25 = vector.shape_cast %24 : vector<8xf32> to vector<1x8xf32>
      %26 = arith.addf %22, %25 : vector<1x8xf32>
      %c0_22 = arith.constant 0 : index
      %c0_23 = arith.constant 0 : index
      %27 = vector.load %arg6[%c0_22, %c0_23] : memref<1x8xf32, #tpu.memory_space<vmem>>, vector<1x8xf32>
      tpu.vector_store %arg6[%c0_22, %c0_23], %26 {strides = array<i32>} : memref<1x8xf32, #tpu.memory_space<vmem>>, vector<1x8xf32>,
    } else {
    }
    return
  }
  func.func @transform_0(%arg0: i32, %arg1: i32) -> (i32, i32) {
    %c0_i32 = arith.constant 0 : i32
    return %arg0, %arg1 : i32, i32
  }
  func.func @transform_1(%arg0: i32, %arg1: i32) -> (i32, i32) {
    %c0_i32 = arith.constant 0 : i32
    %c0_i32_0 = arith.constant 0 : i32
    return %arg1, %c0_i32 : i32, i32
  }
  func.func @transform_2(%arg0: i32, %arg1: i32) -> (i32, i32) {
    %c0_i32 = arith.constant 0 : i32
    %c0_i32_0 = arith.constant 0 : i32
    return %arg0, %c0_i32 : i32, i32
  }
  func.func @transform_3(%arg0: i32, %arg1: i32) -> (i32, i32) {
    %c0_i32 = arith.constant 0 : i32
    %c0_i32_0 = arith.constant 0 : i32
    %c0_i32_1 = arith.constant 0 : i32
    return %c0_i32, %c0_i32_0 : i32, i32
  }
  func.func @transform_4(%arg0: i32, %arg1: i32) -> (i32, i32) {
    %c0_i32 = arith.constant 0 : i32
    %c0_i32_0 = arith.constant 0 : i32
    %c0_i32_1 = arith.constant 0 : i32
    return %c0_i32, %c0_i32_0 : i32, i32
  }
}

module attributes {stable_mosaic.version = 11 : i64} {
  func.func @_bn_apply_kernel(%arg0: i32, %arg1: memref<128x2xf32, #tpu.memory_space<vmem>>, %arg2: memref<1x2xf32, #tpu.memory_space<vmem>>, %arg3: memref<1x2xf32, #tpu.memory_space<vmem>>, %arg4: memref<1x2xf32, #tpu.memory_space<vmem>>, %arg5: memref<1x2xf32, #tpu.memory_space<vmem>>, %arg6: memref<128x2xbf16, #tpu.memory_space<vmem>>) attributes {dimension_semantics = [#tpu.dimension_semantics<parallel>], iteration_bounds = array<i64: 1>, scalar_prefetch = 0 : i64, scratch_operands = 0 : i64, tpu.core_type = #tpu.core_type<tc>, window_params = [{transform_indices = @transform_0, window_bounds = array<i64: 128, 2>}, {pipeline_mode = #tpu.pipeline_mode<synchronous>, transform_indices = @transform_1, window_bounds = array<i64: 1, 2>}, {pipeline_mode = #tpu.pipeline_mode<synchronous>, transform_indices = @transform_2, window_bounds = array<i64: 1, 2>}, {pipeline_mode = #tpu.pipeline_mode<synchronous>, transform_indices = @transform_3, window_bounds = array<i64: 1, 2>}, {pipeline_mode = #tpu.pipeline_mode<synchronous>, transform_indices = @transform_4, window_bounds = array<i64: 1, 2>}, {transform_indices = @transform_5, window_bounds = array<i64: 128, 2>}]} {
    %c0 = arith.constant 0 : index
    %c0_0 = arith.constant 0 : index
    %0 = vector.load %arg1[%c0, %c0_0] : memref<128x2xf32, #tpu.memory_space<vmem>>, vector<128x2xf32>
    %c0_1 = arith.constant 0 : index
    %c0_2 = arith.constant 0 : index
    %1 = vector.load %arg2[%c0_1, %c0_2] : memref<1x2xf32, #tpu.memory_space<vmem>>, vector<1x2xf32>
    %cst = arith.constant 7.812500e-03 : f32
    %2 = vector.broadcast %cst : f32 to vector<1x2xf32>
    %3 = arith.mulf %1, %2 : vector<1x2xf32>
    %c0_3 = arith.constant 0 : index
    %c0_4 = arith.constant 0 : index
    %4 = vector.load %arg3[%c0_3, %c0_4] : memref<1x2xf32, #tpu.memory_space<vmem>>, vector<1x2xf32>
    %cst_5 = arith.constant 7.812500e-03 : f32
    %5 = vector.broadcast %cst_5 : f32 to vector<1x2xf32>
    %6 = arith.mulf %4, %5 : vector<1x2xf32>
    %7 = arith.mulf %3, %3 : vector<1x2xf32>
    %8 = arith.subf %6, %7 : vector<1x2xf32>
    %cst_6 = arith.constant 0.000000e+00 : f32
    %9 = vector.broadcast %cst_6 : f32 to vector<1x2xf32>
    %10 = arith.maximumf %8, %9 : vector<1x2xf32>
    %11 = vector.broadcast %3 : vector<1x2xf32> to vector<128x2xf32>
    %12 = arith.subf %0, %11 : vector<128x2xf32>
    %cst_7 = arith.constant 9.99999974E-6 : f32
    %13 = vector.broadcast %cst_7 : f32 to vector<1x2xf32>
    %14 = arith.addf %10, %13 : vector<1x2xf32>
    %15 = math.rsqrt %14 : vector<1x2xf32>
    %16 = vector.broadcast %15 : vector<1x2xf32> to vector<128x2xf32>
    %17 = arith.mulf %12, %16 : vector<128x2xf32>
    %c0_8 = arith.constant 0 : index
    %c0_9 = arith.constant 0 : index
    %18 = vector.load %arg4[%c0_8, %c0_9] : memref<1x2xf32, #tpu.memory_space<vmem>>, vector<1x2xf32>
    %19 = vector.broadcast %18 : vector<1x2xf32> to vector<128x2xf32>
    %20 = arith.mulf %17, %19 : vector<128x2xf32>
    %c0_10 = arith.constant 0 : index
    %c0_11 = arith.constant 0 : index
    %21 = vector.load %arg5[%c0_10, %c0_11] : memref<1x2xf32, #tpu.memory_space<vmem>>, vector<1x2xf32>
    %22 = vector.broadcast %21 : vector<1x2xf32> to vector<128x2xf32>
    %23 = arith.addf %20, %22 : vector<128x2xf32>
    %cst_12 = arith.constant 0.000000e+00 : f32
    %24 = vector.broadcast %cst_12 : f32 to vector<128x2xf32>
    %25 = arith.maximumf %23, %24 : vector<128x2xf32>
    %26 = arith.truncf %25 : vector<128x2xf32> to vector<128x2xbf16>
    %c0_13 = arith.constant 0 : index
    %c0_14 = arith.constant 0 : index
    %27 = vector.load %arg6[%c0_13, %c0_14] : memref<128x2xbf16, #tpu.memory_space<vmem>>, vector<128x2xbf16>
    tpu.vector_store %arg6[%c0_13, %c0_14], %26 {strides = array<i32>} : memref<128x2xbf16, #tpu.memory_space<vmem>>, vector<128x2xbf16>,
    return
  }
  func.func @transform_0(%arg0: i32) -> (i32, i32) {
    %c0_i32 = arith.constant 0 : i32
    %c0_i32_0 = arith.constant 0 : i32
    return %arg0, %c0_i32 : i32, i32
  }
  func.func @transform_1(%arg0: i32) -> (i32, i32) {
    %c0_i32 = arith.constant 0 : i32
    %c0_i32_0 = arith.constant 0 : i32
    %c0_i32_1 = arith.constant 0 : i32
    return %c0_i32, %c0_i32_0 : i32, i32
  }
  func.func @transform_2(%arg0: i32) -> (i32, i32) {
    %c0_i32 = arith.constant 0 : i32
    %c0_i32_0 = arith.constant 0 : i32
    %c0_i32_1 = arith.constant 0 : i32
    return %c0_i32, %c0_i32_0 : i32, i32
  }
  func.func @transform_3(%arg0: i32) -> (i32, i32) {
    %c0_i32 = arith.constant 0 : i32
    %c0_i32_0 = arith.constant 0 : i32
    %c0_i32_1 = arith.constant 0 : i32
    return %c0_i32, %c0_i32_0 : i32, i32
  }
  func.func @transform_4(%arg0: i32) -> (i32, i32) {
    %c0_i32 = arith.constant 0 : i32
    %c0_i32_0 = arith.constant 0 : i32
    %c0_i32_1 = arith.constant 0 : i32
    return %c0_i32, %c0_i32_0 : i32, i32
  }
  func.func @transform_5(%arg0: i32) -> (i32, i32) {
    %c0_i32 = arith.constant 0 : i32
    %c0_i32_0 = arith.constant 0 : i32
    return %arg0, %c0_i32 : i32, i32
  }
}

module attributes {stable_mosaic.version = 11 : i64} {
  func.func @_mm_stats_kernel(%arg0: i32, %arg1: i32, %arg2: memref<128x4xbf16, #tpu.memory_space<vmem>>, %arg3: memref<4x8xbf16, #tpu.memory_space<vmem>>, %arg4: memref<128x8xf32, #tpu.memory_space<vmem>>, %arg5: memref<1x8xf32, #tpu.memory_space<vmem>>, %arg6: memref<1x8xf32, #tpu.memory_space<vmem>>) attributes {dimension_semantics = [#tpu.dimension_semantics<arbitrary>, #tpu.dimension_semantics<arbitrary>], iteration_bounds = array<i64: 1, 1>, scalar_prefetch = 0 : i64, scratch_operands = 0 : i64, tpu.core_type = #tpu.core_type<tc>, window_params = [{transform_indices = @transform_0, window_bounds = array<i64: 128, 4>}, {transform_indices = @transform_1, window_bounds = array<i64: 4, 8>}, {transform_indices = @transform_2, window_bounds = array<i64: 128, 8>}, {pipeline_mode = #tpu.pipeline_mode<synchronous>, transform_indices = @transform_3, window_bounds = array<i64: 1, 8>}, {pipeline_mode = #tpu.pipeline_mode<synchronous>, transform_indices = @transform_4, window_bounds = array<i64: 1, 8>}]} {
    %c0_i32 = arith.constant 0 : i32
    %0 = arith.cmpi eq, %arg1, %c0_i32 : i32
    %1 = arith.extui %0 : i1 to i32
    %c0_i32_0 = arith.constant 0 : i32
    %2 = arith.cmpi ne, %1, %c0_i32_0 : i32
    scf.if %2 {
      %cst_12 = arith.constant 0.000000e+00 : f32
      %16 = vector.broadcast %cst_12 : f32 to vector<128x8xf32>
      %c0_13 = arith.constant 0 : index
      %c0_14 = arith.constant 0 : index
      %17 = vector.load %arg4[%c0_13, %c0_14] : memref<128x8xf32, #tpu.memory_space<vmem>>, vector<128x8xf32>
      tpu.vector_store %arg4[%c0_13, %c0_14], %16 {strides = array<i32>} : memref<128x8xf32, #tpu.memory_space<vmem>>, vector<128x8xf32>,
    } else {
    }
    %c0 = arith.constant 0 : index
    %c0_1 = arith.constant 0 : index
    %3 = vector.load %arg4[%c0, %c0_1] : memref<128x8xf32, #tpu.memory_space<vmem>>, vector<128x8xf32>
    %c0_2 = arith.constant 0 : index
    %c0_3 = arith.constant 0 : index
    %4 = vector.load %arg2[%c0_2, %c0_3] : memref<128x4xbf16, #tpu.memory_space<vmem>>, vector<128x4xbf16>
    %c0_4 = arith.constant 0 : index
    %c0_5 = arith.constant 0 : index
    %5 = vector.load %arg3[%c0_4, %c0_5] : memref<4x8xbf16, #tpu.memory_space<vmem>>, vector<4x8xbf16>
    %cst = arith.constant dense<0.000000e+00> : vector<128x8xf32>
    %6 = tpu.matmul %4, %5, %cst {dimension_numbers = #tpu.dot_dimension_numbers<[1], [0], [0], [1], [0, 0, 1, 1], [], []>} : vector<128x4xbf16>, vector<4x8xbf16>, vector<128x8xf32> -> vector<128x8xf32>
    %7 = arith.addf %3, %6 : vector<128x8xf32>
    %c0_6 = arith.constant 0 : index
    %c0_7 = arith.constant 0 : index
    %8 = vector.load %arg4[%c0_6, %c0_7] : memref<128x8xf32, #tpu.memory_space<vmem>>, vector<128x8xf32>
    tpu.vector_store %arg4[%c0_6, %c0_7], %7 {strides = array<i32>} : memref<128x8xf32, #tpu.memory_space<vmem>>, vector<128x8xf32>,
    %c0_i32_8 = arith.constant 0 : i32
    %9 = arith.cmpi eq, %arg1, %c0_i32_8 : i32
    %c0_i32_9 = arith.constant 0 : i32
    %10 = arith.cmpi eq, %arg0, %c0_i32_9 : i32
    %11 = arith.andi %9, %10 : i1
    %12 = arith.extui %11 : i1 to i32
    %c0_i32_10 = arith.constant 0 : i32
    %13 = arith.cmpi ne, %12, %c0_i32_10 : i32
    scf.if %13 {
      %cst_12 = arith.constant 0.000000e+00 : f32
      %16 = vector.broadcast %cst_12 : f32 to vector<1x8xf32>
      %c0_13 = arith.constant 0 : index
      %c0_14 = arith.constant 0 : index
      %17 = vector.load %arg5[%c0_13, %c0_14] : memref<1x8xf32, #tpu.memory_space<vmem>>, vector<1x8xf32>
      tpu.vector_store %arg5[%c0_13, %c0_14], %16 {strides = array<i32>} : memref<1x8xf32, #tpu.memory_space<vmem>>, vector<1x8xf32>,
      %cst_15 = arith.constant 0.000000e+00 : f32
      %18 = vector.broadcast %cst_15 : f32 to vector<1x8xf32>
      %c0_16 = arith.constant 0 : index
      %c0_17 = arith.constant 0 : index
      %19 = vector.load %arg6[%c0_16, %c0_17] : memref<1x8xf32, #tpu.memory_space<vmem>>, vector<1x8xf32>
      tpu.vector_store %arg6[%c0_16, %c0_17], %18 {strides = array<i32>} : memref<1x8xf32, #tpu.memory_space<vmem>>, vector<1x8xf32>,
    } else {
    }
    %14 = arith.extui %9 : i1 to i32
    %c0_i32_11 = arith.constant 0 : i32
    %15 = arith.cmpi ne, %14, %c0_i32_11 : i32
    scf.if %15 {
      %c0_12 = arith.constant 0 : index
      %c0_13 = arith.constant 0 : index
      %16 = vector.load %arg4[%c0_12, %c0_13] : memref<128x8xf32, #tpu.memory_space<vmem>>, vector<128x8xf32>
      %c0_14 = arith.constant 0 : index
      %c0_15 = arith.constant 0 : index
      %17 = vector.load %arg5[%c0_14, %c0_15] : memref<1x8xf32, #tpu.memory_space<vmem>>, vector<1x8xf32>
      %cst_16 = arith.constant dense<0.000000e+00> : vector<8xf32>
      %18 = vector.multi_reduction <add>, %16, %cst_16 [0] : vector<128x8xf32> to vector<8xf32>
      %19 = vector.shape_cast %18 : vector<8xf32> to vector<1x8xf32>
      %20 = arith.addf %17, %19 : vector<1x8xf32>
      %c0_17 = arith.constant 0 : index
      %c0_18 = arith.constant 0 : index
      %21 = vector.load %arg5[%c0_17, %c0_18] : memref<1x8xf32, #tpu.memory_space<vmem>>, vector<1x8xf32>
      tpu.vector_store %arg5[%c0_17, %c0_18], %20 {strides = array<i32>} : memref<1x8xf32, #tpu.memory_space<vmem>>, vector<1x8xf32>,
      %c0_19 = arith.constant 0 : index
      %c0_20 = arith.constant 0 : index
      %22 = vector.load %arg6[%c0_19, %c0_20] : memref<1x8xf32, #tpu.memory_space<vmem>>, vector<1x8xf32>
      %23 = arith.mulf %16, %16 : vector<128x8xf32>
      %cst_21 = arith.constant dense<0.000000e+00> : vector<8xf32>
      %24 = vector.multi_reduction <add>, %23, %cst_21 [0] : vector<128x8xf32> to vector<8xf32>
      %25 = vector.shape_cast %24 : vector<8xf32> to vector<1x8xf32>
      %26 = arith.addf %22, %25 : vector<1x8xf32>
      %c0_22 = arith.constant 0 : index
      %c0_23 = arith.constant 0 : index
      %27 = vector.load %arg6[%c0_22, %c0_23] : memref<1x8xf32, #tpu.memory_space<vmem>>, vector<1x8xf32>
      tpu.vector_store %arg6[%c0_22, %c0_23], %26 {strides = array<i32>} : memref<1x8xf32, #tpu.memory_space<vmem>>, vector<1x8xf32>,
    } else {
    }
    return
  }
  func.func @transform_0(%arg0: i32, %arg1: i32) -> (i32, i32) {
    %c0_i32 = arith.constant 0 : i32
    return %arg0, %arg1 : i32, i32
  }
  func.func @transform_1(%arg0: i32, %arg1: i32) -> (i32, i32) {
    %c0_i32 = arith.constant 0 : i32
    %c0_i32_0 = arith.constant 0 : i32
    return %arg1, %c0_i32 : i32, i32
  }
  func.func @transform_2(%arg0: i32, %arg1: i32) -> (i32, i32) {
    %c0_i32 = arith.constant 0 : i32
    %c0_i32_0 = arith.constant 0 : i32
    return %arg0, %c0_i32 : i32, i32
  }
  func.func @transform_3(%arg0: i32, %arg1: i32) -> (i32, i32) {
    %c0_i32 = arith.constant 0 : i32
    %c0_i32_0 = arith.constant 0 : i32
    %c0_i32_1 = arith.constant 0 : i32
    return %c0_i32, %c0_i32_0 : i32, i32
  }
  func.func @transform_4(%arg0: i32, %arg1: i32) -> (i32, i32) {
    %c0_i32 = arith.constant 0 : i32
    %c0_i32_0 = arith.constant 0 : i32
    %c0_i32_1 = arith.constant 0 : i32
    return %c0_i32, %c0_i32_0 : i32, i32
  }
}

module attributes {stable_mosaic.version = 11 : i64} {
  func.func @_bn_apply_kernel(%arg0: i32, %arg1: memref<128x8xf32, #tpu.memory_space<vmem>>, %arg2: memref<1x8xf32, #tpu.memory_space<vmem>>, %arg3: memref<1x8xf32, #tpu.memory_space<vmem>>, %arg4: memref<1x8xf32, #tpu.memory_space<vmem>>, %arg5: memref<1x8xf32, #tpu.memory_space<vmem>>, %arg6: memref<128x8xbf16, #tpu.memory_space<vmem>>) attributes {dimension_semantics = [#tpu.dimension_semantics<parallel>], iteration_bounds = array<i64: 1>, scalar_prefetch = 0 : i64, scratch_operands = 0 : i64, tpu.core_type = #tpu.core_type<tc>, window_params = [{transform_indices = @transform_0, window_bounds = array<i64: 128, 8>}, {pipeline_mode = #tpu.pipeline_mode<synchronous>, transform_indices = @transform_1, window_bounds = array<i64: 1, 8>}, {pipeline_mode = #tpu.pipeline_mode<synchronous>, transform_indices = @transform_2, window_bounds = array<i64: 1, 8>}, {pipeline_mode = #tpu.pipeline_mode<synchronous>, transform_indices = @transform_3, window_bounds = array<i64: 1, 8>}, {pipeline_mode = #tpu.pipeline_mode<synchronous>, transform_indices = @transform_4, window_bounds = array<i64: 1, 8>}, {transform_indices = @transform_5, window_bounds = array<i64: 128, 8>}]} {
    %c0 = arith.constant 0 : index
    %c0_0 = arith.constant 0 : index
    %0 = vector.load %arg1[%c0, %c0_0] : memref<128x8xf32, #tpu.memory_space<vmem>>, vector<128x8xf32>
    %c0_1 = arith.constant 0 : index
    %c0_2 = arith.constant 0 : index
    %1 = vector.load %arg2[%c0_1, %c0_2] : memref<1x8xf32, #tpu.memory_space<vmem>>, vector<1x8xf32>
    %cst = arith.constant 7.812500e-03 : f32
    %2 = vector.broadcast %cst : f32 to vector<1x8xf32>
    %3 = arith.mulf %1, %2 : vector<1x8xf32>
    %c0_3 = arith.constant 0 : index
    %c0_4 = arith.constant 0 : index
    %4 = vector.load %arg3[%c0_3, %c0_4] : memref<1x8xf32, #tpu.memory_space<vmem>>, vector<1x8xf32>
    %cst_5 = arith.constant 7.812500e-03 : f32
    %5 = vector.broadcast %cst_5 : f32 to vector<1x8xf32>
    %6 = arith.mulf %4, %5 : vector<1x8xf32>
    %7 = arith.mulf %3, %3 : vector<1x8xf32>
    %8 = arith.subf %6, %7 : vector<1x8xf32>
    %cst_6 = arith.constant 0.000000e+00 : f32
    %9 = vector.broadcast %cst_6 : f32 to vector<1x8xf32>
    %10 = arith.maximumf %8, %9 : vector<1x8xf32>
    %11 = vector.broadcast %3 : vector<1x8xf32> to vector<128x8xf32>
    %12 = arith.subf %0, %11 : vector<128x8xf32>
    %cst_7 = arith.constant 9.99999974E-6 : f32
    %13 = vector.broadcast %cst_7 : f32 to vector<1x8xf32>
    %14 = arith.addf %10, %13 : vector<1x8xf32>
    %15 = math.rsqrt %14 : vector<1x8xf32>
    %16 = vector.broadcast %15 : vector<1x8xf32> to vector<128x8xf32>
    %17 = arith.mulf %12, %16 : vector<128x8xf32>
    %c0_8 = arith.constant 0 : index
    %c0_9 = arith.constant 0 : index
    %18 = vector.load %arg4[%c0_8, %c0_9] : memref<1x8xf32, #tpu.memory_space<vmem>>, vector<1x8xf32>
    %19 = vector.broadcast %18 : vector<1x8xf32> to vector<128x8xf32>
    %20 = arith.mulf %17, %19 : vector<128x8xf32>
    %c0_10 = arith.constant 0 : index
    %c0_11 = arith.constant 0 : index
    %21 = vector.load %arg5[%c0_10, %c0_11] : memref<1x8xf32, #tpu.memory_space<vmem>>, vector<1x8xf32>
    %22 = vector.broadcast %21 : vector<1x8xf32> to vector<128x8xf32>
    %23 = arith.addf %20, %22 : vector<128x8xf32>
    %24 = arith.truncf %23 : vector<128x8xf32> to vector<128x8xbf16>
    %c0_12 = arith.constant 0 : index
    %c0_13 = arith.constant 0 : index
    %25 = vector.load %arg6[%c0_12, %c0_13] : memref<128x8xbf16, #tpu.memory_space<vmem>>, vector<128x8xbf16>
    tpu.vector_store %arg6[%c0_12, %c0_13], %24 {strides = array<i32>} : memref<128x8xbf16, #tpu.memory_space<vmem>>, vector<128x8xbf16>,
    return
  }
  func.func @transform_0(%arg0: i32) -> (i32, i32) {
    %c0_i32 = arith.constant 0 : i32
    %c0_i32_0 = arith.constant 0 : i32
    return %arg0, %c0_i32 : i32, i32
  }
  func.func @transform_1(%arg0: i32) -> (i32, i32) {
    %c0_i32 = arith.constant 0 : i32
    %c0_i32_0 = arith.constant 0 : i32
    %c0_i32_1 = arith.constant 0 : i32
    return %c0_i32, %c0_i32_0 : i32, i32
  }
  func.func @transform_2(%arg0: i32) -> (i32, i32) {
    %c0_i32 = arith.constant 0 : i32
    %c0_i32_0 = arith.constant 0 : i32
    %c0_i32_1 = arith.constant 0 : i32
    return %c0_i32, %c0_i32_0 : i32, i32
  }
  func.func @transform_3(%arg0: i32) -> (i32, i32) {
    %c0_i32 = arith.constant 0 : i32
    %c0_i32_0 = arith.constant 0 : i32
    %c0_i32_1 = arith.constant 0 : i32
    return %c0_i32, %c0_i32_0 : i32, i32
  }
  func.func @transform_4(%arg0: i32) -> (i32, i32) {
    %c0_i32 = arith.constant 0 : i32
    %c0_i32_0 = arith.constant 0 : i32
    %c0_i32_1 = arith.constant 0 : i32
    return %c0_i32, %c0_i32_0 : i32, i32
  }
  func.func @transform_5(%arg0: i32) -> (i32, i32) {
    %c0_i32 = arith.constant 0 : i32
    %c0_i32_0 = arith.constant 0 : i32
    return %arg0, %c0_i32 : i32, i32
  }
}

module attributes {stable_mosaic.version = 11 : i64} {
  func.func @_bn_add_relu_kernel(%arg0: i32, %arg1: memref<128x8xf32, #tpu.memory_space<vmem>>, %arg2: memref<128x8xbf16, #tpu.memory_space<vmem>>, %arg3: memref<1x8xf32, #tpu.memory_space<vmem>>, %arg4: memref<1x8xf32, #tpu.memory_space<vmem>>, %arg5: memref<1x8xf32, #tpu.memory_space<vmem>>, %arg6: memref<1x8xf32, #tpu.memory_space<vmem>>, %arg7: memref<128x8xf32, #tpu.memory_space<vmem>>) attributes {dimension_semantics = [#tpu.dimension_semantics<parallel>], iteration_bounds = array<i64: 1>, scalar_prefetch = 0 : i64, scratch_operands = 0 : i64, tpu.core_type = #tpu.core_type<tc>, window_params = [{transform_indices = @transform_0, window_bounds = array<i64: 128, 8>}, {transform_indices = @transform_1, window_bounds = array<i64: 128, 8>}, {pipeline_mode = #tpu.pipeline_mode<synchronous>, transform_indices = @transform_2, window_bounds = array<i64: 1, 8>}, {pipeline_mode = #tpu.pipeline_mode<synchronous>, transform_indices = @transform_3, window_bounds = array<i64: 1, 8>}, {pipeline_mode = #tpu.pipeline_mode<synchronous>, transform_indices = @transform_4, window_bounds = array<i64: 1, 8>}, {pipeline_mode = #tpu.pipeline_mode<synchronous>, transform_indices = @transform_5, window_bounds = array<i64: 1, 8>}, {transform_indices = @transform_6, window_bounds = array<i64: 128, 8>}]} {
    %c0 = arith.constant 0 : index
    %c0_0 = arith.constant 0 : index
    %0 = vector.load %arg1[%c0, %c0_0] : memref<128x8xf32, #tpu.memory_space<vmem>>, vector<128x8xf32>
    %c0_1 = arith.constant 0 : index
    %c0_2 = arith.constant 0 : index
    %1 = vector.load %arg3[%c0_1, %c0_2] : memref<1x8xf32, #tpu.memory_space<vmem>>, vector<1x8xf32>
    %cst = arith.constant 7.812500e-03 : f32
    %2 = vector.broadcast %cst : f32 to vector<1x8xf32>
    %3 = arith.mulf %1, %2 : vector<1x8xf32>
    %c0_3 = arith.constant 0 : index
    %c0_4 = arith.constant 0 : index
    %4 = vector.load %arg4[%c0_3, %c0_4] : memref<1x8xf32, #tpu.memory_space<vmem>>, vector<1x8xf32>
    %cst_5 = arith.constant 7.812500e-03 : f32
    %5 = vector.broadcast %cst_5 : f32 to vector<1x8xf32>
    %6 = arith.mulf %4, %5 : vector<1x8xf32>
    %7 = arith.mulf %3, %3 : vector<1x8xf32>
    %8 = arith.subf %6, %7 : vector<1x8xf32>
    %cst_6 = arith.constant 0.000000e+00 : f32
    %9 = vector.broadcast %cst_6 : f32 to vector<1x8xf32>
    %10 = arith.maximumf %8, %9 : vector<1x8xf32>
    %11 = vector.broadcast %3 : vector<1x8xf32> to vector<128x8xf32>
    %12 = arith.subf %0, %11 : vector<128x8xf32>
    %cst_7 = arith.constant 9.99999974E-6 : f32
    %13 = vector.broadcast %cst_7 : f32 to vector<1x8xf32>
    %14 = arith.addf %10, %13 : vector<1x8xf32>
    %15 = math.rsqrt %14 : vector<1x8xf32>
    %16 = vector.broadcast %15 : vector<1x8xf32> to vector<128x8xf32>
    %17 = arith.mulf %12, %16 : vector<128x8xf32>
    %c0_8 = arith.constant 0 : index
    %c0_9 = arith.constant 0 : index
    %18 = vector.load %arg5[%c0_8, %c0_9] : memref<1x8xf32, #tpu.memory_space<vmem>>, vector<1x8xf32>
    %19 = vector.broadcast %18 : vector<1x8xf32> to vector<128x8xf32>
    %20 = arith.mulf %17, %19 : vector<128x8xf32>
    %c0_10 = arith.constant 0 : index
    %c0_11 = arith.constant 0 : index
    %21 = vector.load %arg6[%c0_10, %c0_11] : memref<1x8xf32, #tpu.memory_space<vmem>>, vector<1x8xf32>
    %22 = vector.broadcast %21 : vector<1x8xf32> to vector<128x8xf32>
    %23 = arith.addf %20, %22 : vector<128x8xf32>
    %c0_12 = arith.constant 0 : index
    %c0_13 = arith.constant 0 : index
    %24 = vector.load %arg2[%c0_12, %c0_13] : memref<128x8xbf16, #tpu.memory_space<vmem>>, vector<128x8xbf16>
    %25 = arith.extf %24 : vector<128x8xbf16> to vector<128x8xf32>
    %26 = arith.addf %23, %25 : vector<128x8xf32>
    %cst_14 = arith.constant 0.000000e+00 : f32
    %27 = vector.broadcast %cst_14 : f32 to vector<128x8xf32>
    %28 = arith.maximumf %26, %27 : vector<128x8xf32>
    %c0_15 = arith.constant 0 : index
    %c0_16 = arith.constant 0 : index
    %29 = vector.load %arg7[%c0_15, %c0_16] : memref<128x8xf32, #tpu.memory_space<vmem>>, vector<128x8xf32>
    tpu.vector_store %arg7[%c0_15, %c0_16], %28 {strides = array<i32>} : memref<128x8xf32, #tpu.memory_space<vmem>>, vector<128x8xf32>,
    return
  }
  func.func @transform_0(%arg0: i32) -> (i32, i32) {
    %c0_i32 = arith.constant 0 : i32
    %c0_i32_0 = arith.constant 0 : i32
    return %arg0, %c0_i32 : i32, i32
  }
  func.func @transform_1(%arg0: i32) -> (i32, i32) {
    %c0_i32 = arith.constant 0 : i32
    %c0_i32_0 = arith.constant 0 : i32
    return %arg0, %c0_i32 : i32, i32
  }
  func.func @transform_2(%arg0: i32) -> (i32, i32) {
    %c0_i32 = arith.constant 0 : i32
    %c0_i32_0 = arith.constant 0 : i32
    %c0_i32_1 = arith.constant 0 : i32
    return %c0_i32, %c0_i32_0 : i32, i32
  }
  func.func @transform_3(%arg0: i32) -> (i32, i32) {
    %c0_i32 = arith.constant 0 : i32
    %c0_i32_0 = arith.constant 0 : i32
    %c0_i32_1 = arith.constant 0 : i32
    return %c0_i32, %c0_i32_0 : i32, i32
  }
  func.func @transform_4(%arg0: i32) -> (i32, i32) {
    %c0_i32 = arith.constant 0 : i32
    %c0_i32_0 = arith.constant 0 : i32
    %c0_i32_1 = arith.constant 0 : i32
    return %c0_i32, %c0_i32_0 : i32, i32
  }
  func.func @transform_5(%arg0: i32) -> (i32, i32) {
    %c0_i32 = arith.constant 0 : i32
    %c0_i32_0 = arith.constant 0 : i32
    %c0_i32_1 = arith.constant 0 : i32
    return %c0_i32, %c0_i32_0 : i32, i32
  }
  func.func @transform_6(%arg0: i32) -> (i32, i32) {
    %c0_i32 = arith.constant 0 : i32
    %c0_i32_0 = arith.constant 0 : i32
    return %arg0, %c0_i32 : i32, i32
  }
}

</mosaic_0001>

<bundles_post_ra>
// kernel: residual_block_forward.11
= control target key start
LH: loop header
LB: loop body
LE: loop exit
PB: predicated region body
PF: predicated region fallthrough
CT: control target
= control target key end

     0   :  { %s506_s18 = smov 0   ;;  %s657_s0 = inlined_call_operand.vmem [shape: f32[512,2], index: 0, kind: input, shape index: {}]   ;;  %s658_s1 = inlined_call_operand.vmem [shape: f32[1,2], index: 1, kind: input, shape index: {}]   ;;  %s659_s2 = inlined_call_operand.vmem [shape: f32[1,2], index: 2, kind: input, shape index: {}]   ;;  %s660_s3 = inlined_call_operand.vmem [shape: f32[1,2], index: 3, kind: input, shape index: {}]   ;;  %s661_s4 = inlined_call_operand.vmem [shape: f32[1,2], index: 4, kind: input, shape index: {}]   ;;  %s662_s5 = inlined_call_operand.vmem [shape: bf16[512,2], index: 5, kind: output, shape index: {}]  }
   0x1 LB: > { %s445_s19 = sadd.s32 4294967295, %s474_s18   ;;  %p449_p0 = scmp.ge.s32.totalorder %s474_s18, 1  ;;  %s474_s18 = sphi %s506_s18, %s15_s18  }
   0x2   : > { %p188_p1 = scmp.lt.s32.totalorder %s474_s18, 5 }
   0x4   : > { %p189_p2 = pnand %p449_p0, %p188_p1 }
   0x5   : > { %s450_s24 = sshll.u32 (!%p189_p2), %s445_s19, 4 }
   0x6   : > { %192 = sbr.rel (%p189_p2) target bundleno = 70 (0x46), region = 40  ;;  %p217_p3 = scmp.lt.s32.totalorder (!%p189_p2), %s450_s24, 63 }
   0xb   : > { %v244_v0 = vld [vmem:[%s658_s1] sm:$0x1]  ;;  %s666_s24 = smov (!%p217_p3, %s450_s24), 63  ;;  %vm372_vm3 = vcmask 11264  }
   0xc   : > { %v246_v1 = vld [vmem:[%s659_s2] sm:$0x1]  ;;  %v245_v2 = vmul.f32 0.001953125, %v244_v0  ;;  %s451_s25 = sshll.u32 %s666_s24, 3  ;;  %s453_s8 = sshll.u32 %s666_s24, 2 }
   0xd   : > { %v247_v3 = vmul.f32 0.001953125, %v246_v1  ;;  %s220_s28 = scalar_lea.vmem %s657_s0, %s451_s25  ;;  %v563_v43 = vld [vmem:[%s660_s3] ss:$0 sm:$0xff]  ;;  %s604_s11 = scalar_lea.vmem %s662_s5, %s453_s8 }
   0xe   : > { %v248_v4 = vmul.f32 %v245_v2, %v245_v2  ;;  %v228_v11 = vld [vmem:[%s220_s28] sm:$0xff]  ;;  %v526_v12 = vperm.slane %v245_v2, 0  ;;  %v229_v14 = vld [vmem:[%s220_s28 + $0x8] sm:$0xff]  ;;  %v230_v15 = vld [vmem:[%s220_s28 + $0x10] sm:$0xff] }
   0xf   : > { %v231_v16 = vld [vmem:[%s220_s28 + $0x18] sm:$0xff]  ;;  %v232_v17 = vld [vmem:[%s220_s28 + $0x20] sm:$0xff]  ;;  %v233_v19 = vld [vmem:[%s220_s28 + $0x28] sm:$0xff] }
  0x10   : > { %v249_v5 = vsub.f32 %v247_v3, %v248_v4  ;;  %v234_v20 = vld [vmem:[%s220_s28 + $0x30] sm:$0xff]  ;;  %v235_v21 = vld [vmem:[%s220_s28 + $0x38] sm:$0xff]  ;;  %v532_v23 = vld [vmem:[%s220_s28 + $0x40] sm:$0xff]  ;;  %v254_v25 = vsub.f32 %v228_v11, %v526_v12  ;;  %v255_v27 = vsub.f32 %v229_v14, %v526_v12  ;;  %v256_v31 = vsub.f32 %v230_v15, %v526_v12 }
  0x11   : > { %v534_v24 = vld [vmem:[%s220_s28 + $0x48] sm:$0xff]  ;;  %v538_v28 = vld [vmem:[%s220_s28 + $0x50] sm:$0xff]  ;;  %v540_v29 = vld [vmem:[%s220_s28 + $0x58] sm:$0xff]  ;;  %v257_v32 = vsub.f32 %v231_v16, %v526_v12  ;;  %v258_v33 = vsub.f32 %v232_v17, %v526_v12  ;;  %v259_v34 = vsub.f32 %v233_v19, %v526_v12  ;;  %v260_v39 = vsub.f32 %v234_v20, %v526_v12 }
  0x12   : > { %v250_v6 = vmax.f32 %v249_v5, 0.0  ;;  %v542_v30 = vld [vmem:[%s220_s28 + $0x60] sm:$0xff]  ;;  %v548_v35 = vld [vmem:[%s220_s28 + $0x68] sm:$0xff]  ;;  %v550_v36 = vld [vmem:[%s220_s28 + $0x70] sm:$0xff]  ;;  %v261_v40 = vsub.f32 %v235_v21, %v526_v12  ;;  %v262_v41 = vsub.f32 %v532_v23, %v526_v12  ;;  %v263_v44 = vsub.f32 %v534_v24, %v526_v12 }
  0x13   : > { %v552_v37 = vld [vmem:[%s220_s28 + $0x78] sm:$0xff]  ;;  %v264_v45 = vsub.f32 %v538_v28, %v526_v12  ;;  %v265_v46 = vsub.f32 %v540_v29, %v526_v12  ;;  %v266_v47 = vsub.f32 %v542_v30, %v526_v12  ;;  %v267_v48 = vsub.f32 %v548_v35, %v526_v12  ;;  %v582_v52 = vld [vmem:[%s661_s4] ss:$0 sm:$0xff] }
  0x14   : > { %v270_v7 = vadd.f32 1e-05, %v250_v6  ;;  %v268_v49 = vsub.f32 %v550_v36, %v526_v12  ;;  %v269_v50 = vsub.f32 %v552_v37, %v526_v12 }
  0x16   : > { %466 = vrsqrt.f32 %v270_v7  ;;  %vm277_vm0 = vweird.f32 %v270_v7 }
  0x1c   : > { %v467_v8 = vpop.eup %466 }
  0x1d   : > { %v272_v9 = vmul.f32 %v467_v8, %v270_v7  ;;  %vm278_vm1 = vweird.f32 %v467_v8 }
  0x1e   : > { %vm528_vm2 = vmor %vm277_vm0, %vm278_vm1 }
  0x1f   : > { %v273_v10 = vmul.f32 %v467_v8, %v272_v9 }
  0x21   : > { %v274_v13 = vmul.f32 0.5, %v273_v10 }
  0x23   : > { %v275_v18 = vsub.f32 1.5, %v274_v13 }
  0x25   : > { %v276_v26 = vmul.f32 %v467_v8, %v275_v18 }
  0x27   : > { %v280_v38 = vsel %vm528_vm2, %v467_v8, %v276_v26 }
  0x28   : > { %v282_v42 = vperm.slane %v280_v38, 0 }
  0x2a   : > { %v284_v51 = vmul.f32 %v282_v42, %v254_v25  ;;  %v285_v53 = vmul.f32 %v282_v42, %v255_v27  ;;  %v286_v54 = vmul.f32 %v282_v42, %v256_v31  ;;  %v287_v55 = vmul.f32 %v282_v42, %v257_v32 }
  0x2b   : > { %v288_v56 = vmul.f32 %v282_v42, %v258_v33  ;;  %v289_v57 = vmul.f32 %v282_v42, %v259_v34  ;;  %v290_v58 = vmul.f32 %v282_v42, %v260_v39  ;;  %v291_v59 = vmul.f32 %v282_v42, %v261_v40 }
  0x2c   : > { %v304_v60 = vmul.f32 %v563_v43, %v284_v51  ;;  %v305_v61 = vmul.f32 %v563_v43, %v285_v53  ;;  %v306_v62 = vmul.f32 %v563_v43, %v286_v54  ;;  %v307_v63 = vmul.f32 %v563_v43, %v287_v55 }
  0x2d   : > { %v308_v0 = vmul.f32 %v563_v43, %v288_v56  ;;  %v309_v1 = vmul.f32 %v563_v43, %v289_v57  ;;  %v310_v2 = vmul.f32 %v563_v43, %v290_v58  ;;  %v311_v3 = vmul.f32 %v563_v43, %v291_v59 }
  0x2e   : > { %v324_v4 = vadd.f32 %v582_v52, %v304_v60  ;;  %v325_v5 = vadd.f32 %v582_v52, %v305_v61  ;;  %v326_v6 = vadd.f32 %v582_v52, %v306_v62  ;;  %v327_v7 = vadd.f32 %v582_v52, %v307_v63 }
  0x2f   : > { %v328_v8 = vadd.f32 %v582_v52, %v308_v0  ;;  %v329_v9 = vadd.f32 %v582_v52, %v309_v1  ;;  %v330_v10 = vadd.f32 %v582_v52, %v310_v2  ;;  %v331_v11 = vadd.f32 %v582_v52, %v311_v3 }
  0x30   : > { %v340_v12 = vmax.f32 %v324_v4, 0.0  ;;  %v341_v13 = vmax.f32 %v325_v5, 0.0  ;;  %v342_v14 = vmax.f32 %v326_v6, 0.0  ;;  %v343_v15 = vmax.f32 %v327_v7, 0.0 }
  0x31   : > { %v344_v16 = vmax.f32 %v328_v8, 0.0  ;;  %v345_v17 = vmax.f32 %v329_v9, 0.0  ;;  %v346_v18 = vmax.f32 %v330_v10, 0.0  ;;  %v347_v19 = vmax.f32 %v331_v11, 0.0 }
  0x32   : > { %v356_v20 = vpack.c.bf16 %v340_v12, %v340_v12  ;;  %v357_v21 = vpack.c.bf16 %v341_v13, %v341_v13  ;;  %v358_v22 = vpack.c.bf16 %v342_v14, %v342_v14  ;;  %v359_v23 = vpack.c.bf16 %v343_v15, %v343_v15 }
  0x33   : > { %v360_v24 = vpack.c.bf16 %v344_v16, %v344_v16  ;;  %v361_v25 = vpack.c.bf16 %v345_v17, %v345_v17  ;;  %v362_v26 = vpack.c.bf16 %v346_v18, %v346_v18  ;;  %v363_v27 = vpack.c.bf16 %v347_v19, %v347_v19 }
  0x34   : > { %373 = vst.msk [vmem:[%s604_s11] sm:$0xf] %vm372_vm3, %v356_v20  ;;  %v292_v28 = vmul.f32 %v282_v42, %v262_v41  ;;  %v293_v29 = vmul.f32 %v282_v42, %v263_v44  ;;  %v294_v30 = vmul.f32 %v282_v42, %v264_v45  ;;  %v295_v31 = vmul.f32 %v282_v42, %v265_v46 }
  0x35   : > { %374 = vst.msk [vmem:[%s604_s11 + $0x4] sm:$0xf] %vm372_vm3, %v357_v21  ;;  %v296_v32 = vmul.f32 %v282_v42, %v266_v47  ;;  %v297_v33 = vmul.f32 %v282_v42, %v267_v48  ;;  %v298_v34 = vmul.f32 %v282_v42, %v268_v49  ;;  %v299_v35 = vmul.f32 %v282_v42, %v269_v50 }
  0x36   : > { %375 = vst.msk [vmem:[%s604_s11 + $0x8] sm:$0xf] %vm372_vm3, %v358_v22  ;;  %v312_v36 = vmul.f32 %v563_v43, %v292_v28  ;;  %v313_v37 = vmul.f32 %v563_v43, %v293_v29  ;;  %v314_v38 = vmul.f32 %v563_v43, %v294_v30  ;;  %v315_v39 = vmul.f32 %v563_v43, %v295_v31 }
  0x37   : > { %376 = vst.msk [vmem:[%s604_s11 + $0xc] sm:$0xf] %vm372_vm3, %v359_v23  ;;  %v316_v40 = vmul.f32 %v563_v43, %v296_v32  ;;  %v317_v41 = vmul.f32 %v563_v43, %v297_v33  ;;  %v318_v42 = vmul.f32 %v563_v43, %v298_v34  ;;  %v319_v44 = vmul.f32 %v563_v43, %v299_v35 }
  0x38   : > { %377 = vst.msk [vmem:[%s604_s11 + $0x10] sm:$0xf] %vm372_vm3, %v360_v24  ;;  %v332_v45 = vadd.f32 %v582_v52, %v312_v36  ;;  %v333_v46 = vadd.f32 %v582_v52, %v313_v37  ;;  %v334_v47 = vadd.f32 %v582_v52, %v314_v38  ;;  %v335_v48 = vadd.f32 %v582_v52, %v315_v39 }
  0x39   : > { %378 = vst.msk [vmem:[%s604_s11 + $0x14] sm:$0xf] %vm372_vm3, %v361_v25  ;;  %v336_v49 = vadd.f32 %v582_v52, %v316_v40  ;;  %v337_v50 = vadd.f32 %v582_v52, %v317_v41  ;;  %v338_v51 = vadd.f32 %v582_v52, %v318_v42  ;;  %v339_v43 = vadd.f32 %v582_v52, %v319_v44 }
  0x3a   : > { %379 = vst.msk [vmem:[%s604_s11 + $0x18] sm:$0xf] %vm372_vm3, %v362_v26  ;;  %v348_v53 = vmax.f32 %v332_v45, 0.0  ;;  %v349_v54 = vmax.f32 %v333_v46, 0.0  ;;  %v350_v55 = vmax.f32 %v334_v47, 0.0  ;;  %v351_v56 = vmax.f32 %v335_v48, 0.0 }
  0x3b   : > { %380 = vst.msk [vmem:[%s604_s11 + $0x1c] sm:$0xf] %vm372_vm3, %v363_v27  ;;  %v352_v57 = vmax.f32 %v336_v49, 0.0  ;;  %v353_v58 = vmax.f32 %v337_v50, 0.0  ;;  %v354_v61 = vmax.f32 %v338_v51, 0.0  ;;  %v355_v63 = vmax.f32 %v339_v43, 0.0 }
  0x3c   : > { %v364_v59 = vpack.c.bf16 %v348_v53, %v348_v53  ;;  %v365_v60 = vpack.c.bf16 %v349_v54, %v349_v54  ;;  %v366_v52 = vpack.c.bf16 %v350_v55, %v350_v55  ;;  %v367_v62 = vpack.c.bf16 %v351_v56, %v351_v56 }
  0x3d   : > { %v368_v0 = vpack.c.bf16 %v352_v57, %v352_v57  ;;  %v369_v1 = vpack.c.bf16 %v353_v58, %v353_v58  ;;  %v370_v2 = vpack.c.bf16 %v354_v61, %v354_v61  ;;  %v371_v3 = vpack.c.bf16 %v355_v63, %v355_v63 }
  0x3e   : > { %381 = vst.msk [vmem:[%s604_s11 + $0x20] sm:$0xf] %vm372_vm3, %v364_v59 }
  0x3f   : > { %382 = vst.msk [vmem:[%s604_s11 + $0x24] sm:$0xf] %vm372_vm3, %v365_v60 }
  0x40   : > { %383 = vst.msk [vmem:[%s604_s11 + $0x28] sm:$0xf] %vm372_vm3, %v366_v52 }
  0x41   : > { %384 = vst.msk [vmem:[%s604_s11 + $0x2c] sm:$0xf] %vm372_vm3, %v367_v62 }
  0x42   : > { %385 = vst.msk [vmem:[%s604_s11 + $0x30] sm:$0xf] %vm372_vm3, %v368_v0 }
  0x43   : > { %386 = vst.msk [vmem:[%s604_s11 + $0x34] sm:$0xf] %vm372_vm3, %v369_v1 }
  0x44   : > { %387 = vst.msk [vmem:[%s604_s11 + $0x38] sm:$0xf] %vm372_vm3, %v370_v2 }
  0x45   : > { %388 = vst.msk [vmem:[%s604_s11 + $0x3c] sm:$0xf] %vm372_vm3, %v371_v3 }
  0x46 PF: > { %s15_s18 = sadd.s32 1, %s474_s18  }
  0x47   : > { %p12_p4 = scmp.ge.s32.totalorder %s15_s18, 6  }
  0x49   :  { %14 = sbr.rel (!%p12_p4) target bundleno = 1 (0x1), region = 70 }

// kernel: residual_block_forward.10
= control target key start
LH: loop header
LB: loop body
LE: loop exit
PB: predicated region body
PF: predicated region fallthrough
CT: control target
= control target key end

     0   :  { %s803_s15 = smov 0   ;;  %s805_s16 = smov 0   ;;  %s1001_s0 = inlined_call_operand.vmem [shape: bf16[512,4], index: 0, kind: input, shape index: {}]   ;;  %s1002_s1 = inlined_call_operand.vmem [shape: bf16[4,2], index: 1, kind: input, shape index: {}]   ;;  %s1003_s2 = inlined_call_operand.vmem [shape: f32[512,2], index: 2, kind: output, shape index: {0}]   ;;  %s1004_s3 = inlined_call_operand.vmem [shape: f32[1,2], index: 3, kind: output, shape index: {1}]   ;;  %s1005_s4 = inlined_call_operand.vmem [shape: f32[1,2], index: 4, kind: output, shape index: {2}]  }
   0x1   :  { %s807_s17 = smov 0  }
   0x2 LB: > { %s27_s18 = sadd.s32 1, %s770_s16  ;;  %p666_p0 = scmp.ge.s32.totalorder %s774_s17, 1  ;;  %s774_s17 = sphi %s807_s17, %s15_s17   ;;  %s770_s16 = sphi %s805_s16, %s1007_s16   ;;  %s766_s15 = sphi %s803_s15, %s1006_s15  }
   0x3   : > { %p29_p1 = scmp.ge.s32.totalorder %s27_s18, 4  ;;  %p184_p2 = scmp.lt.s32.totalorder %s774_s17, 5 }
   0x5   : > { %s1009_s18 = smov (%p29_p1, %s27_s18), 0  ;;  %p185_p3 = pnand %p666_p0, %p184_p2 }
   0x6   : > { %s667_s21 = sshll.u32 (!%p185_p3), %s766_s15, 4  ;;  %p442_p5 = scmp.eq.s32.totalorder (!%p185_p3), %s766_s15, 0 }
   0x7   : > { %188 = sbr.rel (%p185_p3) target bundleno = 228 (0xe4), region = 28  ;;  %p218_p4 = scmp.lt.s32.totalorder (!%p185_p3), %s667_s21, 63 }
   0xc   : > { %v290_v0 = vld [vmem:[%s1002_s1] sm:$0x3]  ;;  %vm356_vm0 = vcmask 1041408   ;;  %s1011_s21 = smov (!%p218_p4, %s667_s21), 63  ;;  %vm241_vm1 = vcmask 15360   ;;  %vm331_vm2 = vcmask 31744  }
   0xd   : > { %v358_v1 = vsel %vm356_vm0, %v290_v0, 0  ;;  %s668_s22 = sshll.u32 %s1011_s21, 2  ;;  %s670_s23 = sshll.u32 %s1011_s21, 3  ;;  %v776_v5 = vmov 0.0   ;;  %vm447_vm3 = vcmask (%p442_p5), 8192   ;;  %v777_v59 = vmov (%p442_p5), 0.0  }
   0xe   : > { %367 = vmatpush.bf16.msra.mxu0 %v358_v1  ;;  %723 = vmatpush.bf16.msra.mxu1 %v358_v1  ;;  %s224_s26 = scalar_lea.vmem %s1001_s0, %s668_s22  ;;  %s833_s29 = scalar_lea.vmem %s1003_s2, %s670_s23  ;;  %448 = vst.msk [vmem:[%s1004_s3] sm:$0x1] (%p442_p5), %vm447_vm3, %v777_v59 }
   0xf   : > { %724 = vmatpush.bf16.msra.mxu2 %v358_v1  ;;  %725 = vmatpush.bf16.msra.mxu3 %v358_v1  ;;  %v714_v2 = vld [vmem:[%s224_s26] sm:$0xff]  ;;  %v716_v3 = vld [vmem:[%s224_s26 + $0x10] sm:$0xff]  ;;  %242 = vst.msk [vmem:[%s833_s29] sm:$0xff] %vm241_vm1, %v776_v5  ;;  %v715_v7 = vld [vmem:[%s224_s26 + $0x8] sm:$0xff] }
  0x10   : > { %v718_v4 = vld [vmem:[%s224_s26 + $0x20] sm:$0xff]  ;;  %v720_v6 = vld [vmem:[%s224_s26 + $0x30] sm:$0xff]  ;;  %243 = vst.msk [vmem:[%s833_s29 + $0x8] sm:$0xff] %vm241_vm1, %v776_v5  ;;  %v717_v8 = vld [vmem:[%s224_s26 + $0x18] sm:$0xff] }
  0x11   : > { %703 = vmatmul.msk.bf16.vlgmr.msra.gmra.mxu0 %vm331_vm2, %v714_v2  ;;  %705 = vmatmul.msk.bf16.vlgmr.msra.gmra.mxu1 %vm331_vm2, %v716_v3  ;;  %244 = vst.msk [vmem:[%s833_s29 + $0x10] sm:$0xff] %vm241_vm1, %v776_v5  ;;  %v719_v9 = vld [vmem:[%s224_s26 + $0x28] sm:$0xff]  ;;  %v721_v10 = vld [vmem:[%s224_s26 + $0x38] sm:$0xff] }
  0x12   : > { %707 = vmatmul.msk.bf16.vlgmr.msra.gmra.mxu2 %vm331_vm2, %v718_v4  ;;  %709 = vmatmul.msk.bf16.vlgmr.msra.gmra.mxu3 %vm331_vm2, %v720_v6  ;;  %245 = vst.msk [vmem:[%s833_s29 + $0x18] sm:$0xff] %vm241_vm1, %v776_v5 }
  0x13   : > { %246 = vst.msk [vmem:[%s833_s29 + $0x20] sm:$0xff] %vm241_vm1, %v776_v5 }
  0x14   : > { %247 = vst.msk [vmem:[%s833_s29 + $0x28] sm:$0xff] %vm241_vm1, %v776_v5 }
  0x15   : > { %248 = vst.msk [vmem:[%s833_s29 + $0x30] sm:$0xff] %vm241_vm1, %v776_v5 }
  0x16   : > { %249 = vst.msk [vmem:[%s833_s29 + $0x38] sm:$0xff] %vm241_vm1, %v776_v5  ;;  %v258_v11 = vld [vmem:[%s833_s29] sm:$0xff] }
  0x17   : > { %250 = vst.msk [vmem:[%s833_s29 + $0x40] sm:$0xff] %vm241_vm1, %v776_v5  ;;  %v259_v19 = vld [vmem:[%s833_s29 + $0x8] sm:$0xff] }
  0x18   : > { %251 = vst.msk [vmem:[%s833_s29 + $0x48] sm:$0xff] %vm241_vm1, %v776_v5  ;;  %v260_v31 = vld [vmem:[%s833_s29 + $0x10] sm:$0xff] }
  0x19   : > { %252 = vst.msk [vmem:[%s833_s29 + $0x50] sm:$0xff] %vm241_vm1, %v776_v5  ;;  %v261_v43 = vld [vmem:[%s833_s29 + $0x18] sm:$0xff] }
  0x1a   : > { %253 = vst.msk [vmem:[%s833_s29 + $0x58] sm:$0xff] %vm241_vm1, %v776_v5  ;;  %v262_v12 = vld [vmem:[%s833_s29 + $0x20] sm:$0xff] }
  0x1b   : > { %254 = vst.msk [vmem:[%s833_s29 + $0x60] sm:$0xff] %vm241_vm1, %v776_v5  ;;  %v263_v20 = vld [vmem:[%s833_s29 + $0x28] sm:$0xff] }
  0x1c   : > { %255 = vst.msk [vmem:[%s833_s29 + $0x68] sm:$0xff] %vm241_vm1, %v776_v5  ;;  %v264_v32 = vld [vmem:[%s833_s29 + $0x30] sm:$0xff] }
  0x1d   : > { %256 = vst.msk [vmem:[%s833_s29 + $0x70] sm:$0xff] %vm241_vm1, %v776_v5  ;;  %v265_v44 = vld [vmem:[%s833_s29 + $0x38] sm:$0xff] }
  0x1e   : > { %257 = vst.msk [vmem:[%s833_s29 + $0x78] sm:$0xff] %vm241_vm1, %v776_v5  ;;  %v266_v17 = vld [vmem:[%s833_s29 + $0x40] sm:$0xff] }
  0x1f   : > { %v267_v29 = vld [vmem:[%s833_s29 + $0x48] sm:$0xff]  ;;  %449 = vst.msk [vmem:[%s1005_s4] sm:$0x1] (%p442_p5), %vm447_vm3, %v777_v59 }
  0x20   : > { %v268_v41 = vld [vmem:[%s833_s29 + $0x50] sm:$0xff] }
  0x21   : > { %704 = vmatmul.msk.bf16.gmra.mxu0 %vm331_vm2, %v715_v7  ;;  %706 = vmatmul.msk.bf16.gmra.mxu1 %vm331_vm2, %v717_v8  ;;  %v269_v53 = vld [vmem:[%s833_s29 + $0x58] sm:$0xff] }
  0x22   : > { %708 = vmatmul.msk.bf16.gmra.mxu2 %vm331_vm2, %v719_v9  ;;  %710 = vmatmul.msk.bf16.gmra.mxu3 %vm331_vm2, %v721_v10  ;;  %v270_v18 = vld [vmem:[%s833_s29 + $0x60] sm:$0xff] }
  0x23   : > { %v271_v30 = vld [vmem:[%s833_s29 + $0x68] sm:$0xff] }
  0x24   : > { %v272_v42 = vld [vmem:[%s833_s29 + $0x70] sm:$0xff] }
  0x25   : > { %v273_v54 = vld [vmem:[%s833_s29 + $0x78] sm:$0xff] }
  0x8e   : > { %v369_v13 = vpop.f32.mrf.mxu0  ;;  %v379_v14 = vpop.f32.mrf.mxu1 }
  0x8f   : > { %v409_v15 = vadd.f32 %v369_v13, %v258_v11  ;;  %v413_v16 = vadd.f32 %v379_v14, %v262_v12 }
  0x91   : > { %426 = vst.msk [vmem:[%s833_s29] sm:$0xff] %vm241_vm1, %v409_v15 }
  0x92   : > { %430 = vst.msk [vmem:[%s833_s29 + $0x20] sm:$0xff] %vm241_vm1, %v413_v16 }
  0x95   : > { %v389_v21 = vpop.f32.mrf.mxu2  ;;  %v399_v22 = vpop.f32.mrf.mxu3 }
  0x96   : > { %v417_v23 = vadd.f32 %v389_v21, %v266_v17  ;;  %v421_v24 = vadd.f32 %v399_v22, %v270_v18  ;;  %v371_v25 = vpop.f32.mrf.mxu0  ;;  %v381_v26 = vpop.f32.mrf.mxu1 }
  0x97   : > { %v410_v27 = vadd.f32 %v371_v25, %v259_v19  ;;  %v414_v28 = vadd.f32 %v381_v26, %v263_v20 }
  0x98   : > { %434 = vst.msk [vmem:[%s833_s29 + $0x40] sm:$0xff] %vm241_vm1, %v417_v23 }
  0x99   : > { %438 = vst.msk [vmem:[%s833_s29 + $0x60] sm:$0xff] %vm241_vm1, %v421_v24 }
  0x9a   : > { %427 = vst.msk [vmem:[%s833_s29 + $0x8] sm:$0xff] %vm241_vm1, %v410_v27 }
  0x9b   : > { %431 = vst.msk [vmem:[%s833_s29 + $0x28] sm:$0xff] %vm241_vm1, %v414_v28 }
  0x9d   : > { %v391_v33 = vpop.f32.mrf.mxu2  ;;  %v401_v34 = vpop.f32.mrf.mxu3 }
  0x9e   : > { %v418_v35 = vadd.f32 %v391_v33, %v267_v29  ;;  %v422_v36 = vadd.f32 %v401_v34, %v271_v30  ;;  %v374_v37 = vpop.f32.mrf.mxu0  ;;  %v384_v38 = vpop.f32.mrf.mxu1 }
  0x9f   : > { %v411_v39 = vadd.f32 %v374_v37, %v260_v31  ;;  %v415_v40 = vadd.f32 %v384_v38, %v264_v32 }
  0xa0   : > { %435 = vst.msk [vmem:[%s833_s29 + $0x48] sm:$0xff] %vm241_vm1, %v418_v35 }
  0xa1   : > { %439 = vst.msk [vmem:[%s833_s29 + $0x68] sm:$0xff] %vm241_vm1, %v422_v36 }
  0xa2   : > { %428 = vst.msk [vmem:[%s833_s29 + $0x10] sm:$0xff] %vm241_vm1, %v411_v39 }
  0xa3   : > { %432 = vst.msk [vmem:[%s833_s29 + $0x30] sm:$0xff] %vm241_vm1, %v415_v40 }
  0xa5   : > { %v394_v45 = vpop.f32.mrf.mxu2  ;;  %v404_v46 = vpop.f32.mrf.mxu3 }
  0xa6   : > { %v419_v47 = vadd.f32 %v394_v45, %v268_v41  ;;  %v423_v48 = vadd.f32 %v404_v46, %v272_v42  ;;  %v376_v49 = vpop.f32.mrf.mxu0  ;;  %v386_v50 = vpop.f32.mrf.mxu1 }
  0xa7   : > { %v412_v51 = vadd.f32 %v376_v49, %v261_v43  ;;  %v416_v52 = vadd.f32 %v386_v50, %v265_v44 }
  0xa8   : > { %436 = vst.msk [vmem:[%s833_s29 + $0x50] sm:$0xff] %vm241_vm1, %v419_v47 }
  0xa9   : > { %440 = vst.msk [vmem:[%s833_s29 + $0x70] sm:$0xff] %vm241_vm1, %v423_v48 }
  0xaa   : > { %429 = vst.msk [vmem:[%s833_s29 + $0x18] sm:$0xff] %vm241_vm1, %v412_v51 }
  0xab   : > { %433 = vst.msk [vmem:[%s833_s29 + $0x38] sm:$0xff] %vm241_vm1, %v416_v52 }
  0xad   : > { %v396_v55 = vpop.f32.mrf.mxu2  ;;  %v406_v56 = vpop.f32.mrf.mxu3  ;;  %446 = sbr.rel (!%p442_p5) target bundleno = 178 (0xb2), region = 36 }
  0xae   : > { %v420_v57 = vadd.f32 %v396_v55, %v269_v53  ;;  %v424_v58 = vadd.f32 %v406_v56, %v273_v54 }
  0xb0   : > { %437 = vst.msk [vmem:[%s833_s29 + $0x58] sm:$0xff] %vm241_vm1, %v420_v57 }
  0xb1   : > { %441 = vst.msk [vmem:[%s833_s29 + $0x78] sm:$0xff] %vm241_vm1, %v424_v58 }
  0xb2 PF: > { %v453_v60 = vld [vmem:[%s833_s29] sm:$0xff]  ;;  %v454_v61 = vld [vmem:[%s833_s29 + $0x8] sm:$0xff]  ;;  %v455_v62 = vld [vmem:[%s833_s29 + $0x10] sm:$0xff]  ;;  %vm508_vm4 = vcmask 8192  }
  0xb3   : > { %v470_v63 = vsel %vm241_vm1, %v453_v60, 0.0  ;;  %v471_v0 = vsel %vm241_vm1, %v454_v61, 0.0  ;;  %v473_v1 = vsel %vm241_vm1, %v455_v62, 0.0  ;;  %v456_v2 = vld [vmem:[%s833_s29 + $0x18] sm:$0xff]  ;;  %v457_v5 = vld [vmem:[%s833_s29 + $0x20] sm:$0xff]  ;;  %v458_v8 = vld [vmem:[%s833_s29 + $0x28] sm:$0xff]  ;;  %v511_v10 = vmul.f32 %v453_v60, %v453_v60 }
  0xb4   : > { %v472_v3 = vadd.f32 %v471_v0, %v470_v63  ;;  %v475_v4 = vsel %vm241_vm1, %v456_v2, 0.0  ;;  %v477_v7 = vsel %vm241_vm1, %v457_v5, 0.0  ;;  %v512_v11 = vmul.f32 %v454_v61, %v454_v61  ;;  %v459_v14 = vld [vmem:[%s833_s29 + $0x30] sm:$0xff]  ;;  %v460_v19 = vld [vmem:[%s833_s29 + $0x38] sm:$0xff]  ;;  %v461_v26 = vld [vmem:[%s833_s29 + $0x40] sm:$0xff] }
  0xb5   : > { %v513_v12 = vmul.f32 %v455_v62, %v455_v62  ;;  %v479_v13 = vsel %vm241_vm1, %v458_v8, 0.0  ;;  %v514_v16 = vmul.f32 %v456_v2, %v456_v2  ;;  %v481_v17 = vsel %vm241_vm1, %v459_v14, 0.0  ;;  %v462_v32 = vld [vmem:[%s833_s29 + $0x48] sm:$0xff]  ;;  %v463_v38 = vld [vmem:[%s833_s29 + $0x50] sm:$0xff]  ;;  %v465_v50 = vld [vmem:[%s833_s29 + $0x60] sm:$0xff] }
  0xb6   : > { %v474_v6 = vadd.f32 %v473_v1, %v472_v3  ;;  %v515_v18 = vmul.f32 %v457_v5, %v457_v5  ;;  %v527_v21 = vsel %vm241_vm1, %v511_v10, 0.0  ;;  %v528_v22 = vsel %vm241_vm1, %v512_v11, 0.0  ;;  %v466_v56 = vld [vmem:[%s833_s29 + $0x68] sm:$0xff]  ;;  %v467_v62 = vld [vmem:[%s833_s29 + $0x70] sm:$0xff] }
  0xb7   : > { %v530_v23 = vsel %vm241_vm1, %v513_v12, 0.0  ;;  %v483_v24 = vsel %vm241_vm1, %v460_v19, 0.0  ;;  %v529_v25 = vadd.f32 %v528_v22, %v527_v21  ;;  %v516_v28 = vmul.f32 %v458_v8, %v458_v8  ;;  %v464_v44 = vld [vmem:[%s833_s29 + $0x58] sm:$0xff] }
  0xb8   : > { %v476_v9 = vadd.f32 %v475_v4, %v474_v6  ;;  %v532_v29 = vsel %vm241_vm1, %v514_v16, 0.0  ;;  %v485_v30 = vsel %vm241_vm1, %v461_v26, 0.0  ;;  %v517_v34 = vmul.f32 %v459_v14, %v459_v14  ;;  %v468_v4 = vld [vmem:[%s833_s29 + $0x78] sm:$0xff] }
  0xb9   : > { %v531_v31 = vadd.f32 %v530_v23, %v529_v25  ;;  %v534_v35 = vsel %vm241_vm1, %v515_v18, 0.0  ;;  %v487_v36 = vsel %vm241_vm1, %v462_v32, 0.0  ;;  %v518_v40 = vmul.f32 %v460_v19, %v460_v19 }
  0xba   : > { %v478_v15 = vadd.f32 %v477_v7, %v476_v9  ;;  %v536_v41 = vsel %vm241_vm1, %v516_v28, 0.0  ;;  %v489_v42 = vsel %vm241_vm1, %v463_v38, 0.0  ;;  %v519_v46 = vmul.f32 %v461_v26, %v461_v26 }
  0xbb   : > { %v533_v37 = vadd.f32 %v532_v29, %v531_v31  ;;  %v538_v47 = vsel %vm241_vm1, %v517_v34, 0.0  ;;  %v491_v48 = vsel %vm241_vm1, %v464_v44, 0.0  ;;  %v520_v52 = vmul.f32 %v462_v32, %v462_v32  ;;  %v469_v31 = vld [vmem:[%s1004_s3] sm:$0x1] }
  0xbc   : > { %v480_v20 = vadd.f32 %v479_v13, %v478_v15  ;;  %v540_v53 = vsel %vm241_vm1, %v518_v40, 0.0  ;;  %v493_v54 = vsel %vm241_vm1, %v465_v50, 0.0  ;;  %v521_v58 = vmul.f32 %v463_v38, %v463_v38 }
  0xbd   : > { %v535_v43 = vadd.f32 %v534_v35, %v533_v37  ;;  %v542_v59 = vsel %vm241_vm1, %v519_v46, 0.0  ;;  %v495_v60 = vsel %vm241_vm1, %v466_v56, 0.0  ;;  %v522_v0 = vmul.f32 %v464_v44, %v464_v44 }
  0xbe   : > { %v482_v27 = vadd.f32 %v481_v17, %v480_v20  ;;  %v544_v1 = vsel %vm241_vm1, %v520_v52, 0.0  ;;  %v497_v2 = vsel %vm241_vm1, %v467_v62, 0.0  ;;  %v523_v6 = vmul.f32 %v465_v50, %v465_v50 }
  0xbf   : > { %v537_v49 = vadd.f32 %v536_v41, %v535_v43  ;;  %v546_v7 = vsel %vm241_vm1, %v521_v58, 0.0  ;;  %v499_v8 = vsel %vm241_vm1, %v468_v4, 0.0  ;;  %v524_v11 = vmul.f32 %v466_v56, %v466_v56 }
  0xc0   : > { %v484_v33 = vadd.f32 %v483_v24, %v482_v27  ;;  %v548_v12 = vsel %vm241_vm1, %v522_v0, 0.0  ;;  %v525_v15 = vmul.f32 %v467_v62, %v467_v62  ;;  %v550_v16 = vsel %vm241_vm1, %v523_v6, 0.0 }
  0xc1   : > { %v539_v55 = vadd.f32 %v538_v47, %v537_v49  ;;  %v526_v19 = vmul.f32 %v468_v4, %v468_v4  ;;  %v552_v20 = vsel %vm241_vm1, %v524_v11, 0.0 }
  0xc2   : > { %v486_v39 = vadd.f32 %v485_v30, %v484_v33  ;;  %v554_v23 = vsel %vm241_vm1, %v525_v15, 0.0 }
  0xc3   : > { %v541_v61 = vadd.f32 %v540_v53, %v539_v55  ;;  %v556_v26 = vsel %vm241_vm1, %v526_v19, 0.0 }
  0xc4   : > { %v488_v45 = vadd.f32 %v487_v36, %v486_v39  ;;  %v510_v39 = vld [vmem:[%s1005_s4] sm:$0x1] }
  0xc5   : > { %v543_v3 = vadd.f32 %v542_v59, %v541_v61 }
  0xc6   : > { %v490_v51 = vadd.f32 %v489_v42, %v488_v45 }
  0xc7   : > { %v545_v9 = vadd.f32 %v544_v1, %v543_v3 }
  0xc8   : > { %v492_v57 = vadd.f32 %v491_v48, %v490_v51 }
  0xc9   : > { %v547_v13 = vadd.f32 %v546_v7, %v545_v9 }
  0xca   : > { %v494_v63 = vadd.f32 %v493_v54, %v492_v57 }
  0xcb   : > { %v549_v17 = vadd.f32 %v548_v12, %v547_v13 }
  0xcc   : > { %v496_v5 = vadd.f32 %v495_v60, %v494_v63 }
  0xcd   : > { %v551_v21 = vadd.f32 %v550_v16, %v549_v17 }
  0xce   : > { %v498_v10 = vadd.f32 %v497_v2, %v496_v5 }
  0xcf   : > { %v553_v24 = vadd.f32 %v552_v20, %v551_v21 }
  0xd0   : > { %v500_v14 = vadd.f32 %v499_v8, %v498_v10 }
  0xd1   : > { %v555_v27 = vadd.f32 %v554_v23, %v553_v24 }
  0xd2   : > { %v501_v18 = vrot.slane %v500_v14, 4 }
  0xd3   : > { %v557_v29 = vadd.f32 %v556_v26, %v555_v27 }
  0xd4   : > { %v502_v22 = vadd.f32 %v501_v18, %v500_v14 }
  0xd5   : > { %v558_v32 = vrot.slane %v557_v29, 4 }
  0xd6   : > { %v503_v25 = vrot.slane %v502_v22, 2 }
  0xd7   : > { %v559_v34 = vadd.f32 %v558_v32, %v557_v29 }
  0xd8   : > { %v504_v28 = vadd.f32 %v503_v25, %v502_v22 }
  0xd9   : > { %v560_v36 = vrot.slane %v559_v34, 2 }
  0xda   : > { %v505_v30 = vrot.slane %v504_v28, 1 }
  0xdb   : > { %v561_v37 = vadd.f32 %v560_v36, %v559_v34 }
  0xdc   : > { %v506_v33 = vadd.f32 %v505_v30, %v504_v28 }
  0xdd   : > { %v562_v38 = vrot.slane %v561_v37, 1 }
  0xde   : > { %v507_v35 = vadd.f32 %v506_v33, %v469_v31 }
  0xdf   : > { %v563_v40 = vadd.f32 %v562_v38, %v561_v37 }
  0xe0   : > { %509 = vst.msk [vmem:[%s1004_s3] sm:$0x1] %vm508_vm4, %v507_v35 }
  0xe1   : > { %v564_v41 = vadd.f32 %v563_v40, %v510_v39 }
  0xe3   : > { %565 = vst.msk [vmem:[%s1005_s4] sm:$0x1] %vm508_vm4, %v564_v41 }
  0xe4 PF: > { %s15_s17 = sadd.s32 1, %s774_s17   ;;  %s1006_s15 = smov %s770_s16 }
  0xe5   : > { %p12_p6 = scmp.ge.s32.totalorder %s15_s17, 6   ;;  %s1007_s16 = smov %s1009_s18 }
  0xe7   :  { %14 = sbr.rel (!%p12_p6) target bundleno = 2 (0x2), region = 89 }

// kernel: residual_block_forward.14
= control target key start
LH: loop header
LB: loop body
LE: loop exit
PB: predicated region body
PF: predicated region fallthrough
CT: control target
= control target key end

     0   :  { %vm134_vm0 = vcmask 1040384   ;;  %vm19_vm1 = vcmask 64512   ;;  %v408_v1 = vmov 0.0   ;;  %vm109_vm2 = vcmask 15360   ;;  %s765_s1 = inlined_call_operand.vmem [shape: bf16[2,8], index: 1, kind: input, shape index: {}]   ;;  %s766_s0 = inlined_call_operand.vmem [shape: bf16[128,2], index: 0, kind: input, shape index: {}]   ;;  %s767_s2 = inlined_call_operand.vmem [shape: f32[128,8], index: 2, kind: output, shape index: {0}]   ;;  %s768_s3 = inlined_call_operand.vmem [shape: f32[1,8], index: 3, kind: output, shape index: {1}]   ;;  %s769_s4 = inlined_call_operand.vmem [shape: f32[1,8], index: 4, kind: output, shape index: {2}]  }
   0x1   :  { %v68_v0 = vld [vmem:[%s765_s1] sm:$0x1]  ;;  %20 = vst.msk [vmem:[%s767_s2] sm:$0xff] %vm19_vm1, %v408_v1  ;;  %v398_v4 = vld [vmem:[%s766_s0 + $0x10] sm:$0xff]  ;;  %v397_v7 = vld [vmem:[%s766_s0 + $0x8] sm:$0xff]  ;;  %vm225_vm3 = vcmask 57344  }
   0x2   :  { %v136_v2 = vsel %vm134_vm0, %v68_v0, 0  ;;  %v396_v3 = vld [vmem:[%s766_s0] sm:$0xff]  ;;  %21 = vst.msk [vmem:[%s767_s2 + $0x8] sm:$0xff] %vm19_vm1, %v408_v1  ;;  %v402_v6 = vld [vmem:[%s766_s0 + $0x30] sm:$0xff]  ;;  %v399_v8 = vld [vmem:[%s766_s0 + $0x18] sm:$0xff] }
   0x3   :  { %145 = vmatpush.bf16.msra.mxu0 %v136_v2  ;;  %404 = vmatpush.bf16.msra.mxu1 %v136_v2  ;;  %v400_v5 = vld [vmem:[%s766_s0 + $0x20] sm:$0xff]  ;;  %22 = vst.msk [vmem:[%s767_s2 + $0x10] sm:$0xff] %vm19_vm1, %v408_v1  ;;  %v401_v9 = vld [vmem:[%s766_s0 + $0x28] sm:$0xff]  ;;  %v403_v10 = vld [vmem:[%s766_s0 + $0x38] sm:$0xff] }
   0x4   :  { %405 = vmatpush.bf16.msra.mxu2 %v136_v2  ;;  %406 = vmatpush.bf16.msra.mxu3 %v136_v2  ;;  %23 = vst.msk [vmem:[%s767_s2 + $0x18] sm:$0xff] %vm19_vm1, %v408_v1 }
   0x5   :  { %24 = vst.msk [vmem:[%s767_s2 + $0x20] sm:$0xff] %vm19_vm1, %v408_v1 }
   0x6   :  { %388 = vmatmul.msk.bf16.vlgmr.msra.gmra.mxu0 %vm109_vm2, %v396_v3  ;;  %390 = vmatmul.msk.bf16.vlgmr.msra.gmra.mxu1 %vm109_vm2, %v398_v4  ;;  %25 = vst.msk [vmem:[%s767_s2 + $0x28] sm:$0xff] %vm19_vm1, %v408_v1 }
   0x7   :  { %392 = vmatmul.msk.bf16.vlgmr.msra.gmra.mxu2 %vm109_vm2, %v400_v5  ;;  %394 = vmatmul.msk.bf16.vlgmr.msra.gmra.mxu3 %vm109_vm2, %v402_v6  ;;  %26 = vst.msk [vmem:[%s767_s2 + $0x30] sm:$0xff] %vm19_vm1, %v408_v1 }
   0x8   :  { %27 = vst.msk [vmem:[%s767_s2 + $0x38] sm:$0xff] %vm19_vm1, %v408_v1  ;;  %v36_v11 = vld [vmem:[%s767_s2] sm:$0xff] }
   0x9   :  { %28 = vst.msk [vmem:[%s767_s2 + $0x40] sm:$0xff] %vm19_vm1, %v408_v1  ;;  %v37_v18 = vld [vmem:[%s767_s2 + $0x8] sm:$0xff] }
   0xa   :  { %29 = vst.msk [vmem:[%s767_s2 + $0x48] sm:$0xff] %vm19_vm1, %v408_v1  ;;  %v38_v30 = vld [vmem:[%s767_s2 + $0x10] sm:$0xff] }
   0xb   :  { %30 = vst.msk [vmem:[%s767_s2 + $0x50] sm:$0xff] %vm19_vm1, %v408_v1  ;;  %v39_v42 = vld [vmem:[%s767_s2 + $0x18] sm:$0xff] }
   0xc   :  { %31 = vst.msk [vmem:[%s767_s2 + $0x58] sm:$0xff] %vm19_vm1, %v408_v1  ;;  %v40_v12 = vld [vmem:[%s767_s2 + $0x20] sm:$0xff] }
   0xd   :  { %32 = vst.msk [vmem:[%s767_s2 + $0x60] sm:$0xff] %vm19_vm1, %v408_v1  ;;  %v41_v19 = vld [vmem:[%s767_s2 + $0x28] sm:$0xff] }
   0xe   :  { %33 = vst.msk [vmem:[%s767_s2 + $0x68] sm:$0xff] %vm19_vm1, %v408_v1  ;;  %v42_v31 = vld [vmem:[%s767_s2 + $0x30] sm:$0xff] }
   0xf   :  { %34 = vst.msk [vmem:[%s767_s2 + $0x70] sm:$0xff] %vm19_vm1, %v408_v1  ;;  %v43_v43 = vld [vmem:[%s767_s2 + $0x38] sm:$0xff] }
  0x10   :  { %35 = vst.msk [vmem:[%s767_s2 + $0x78] sm:$0xff] %vm19_vm1, %v408_v1  ;;  %v44_v17 = vld [vmem:[%s767_s2 + $0x40] sm:$0xff] }
  0x11   :  { %v45_v29 = vld [vmem:[%s767_s2 + $0x48] sm:$0xff]  ;;  %226 = vst.msk [vmem:[%s768_s3] sm:$0x1] %vm225_vm3, %v408_v1 }
  0x12   :  { %v46_v41 = vld [vmem:[%s767_s2 + $0x50] sm:$0xff]  ;;  %227 = vst.msk [vmem:[%s769_s4] sm:$0x1] %vm225_vm3, %v408_v1 }
  0x13   :  { %v47_v60 = vld [vmem:[%s767_s2 + $0x58] sm:$0xff] }
  0x14   :  { %v48_v20 = vld [vmem:[%s767_s2 + $0x60] sm:$0xff] }
  0x15   :  { %v49_v32 = vld [vmem:[%s767_s2 + $0x68] sm:$0xff] }
  0x16   :  { %389 = vmatmul.msk.bf16.gmra.mxu0 %vm109_vm2, %v397_v7  ;;  %391 = vmatmul.msk.bf16.gmra.mxu1 %vm109_vm2, %v399_v8  ;;  %v50_v44 = vld [vmem:[%s767_s2 + $0x70] sm:$0xff] }
  0x17   :  { %393 = vmatmul.msk.bf16.gmra.mxu2 %vm109_vm2, %v401_v9  ;;  %395 = vmatmul.msk.bf16.gmra.mxu3 %vm109_vm2, %v403_v10  ;;  %v51_v61 = vld [vmem:[%s767_s2 + $0x78] sm:$0xff] }
  0x83   :  { %v147_v13 = vpop.f32.mrf.mxu0  ;;  %v157_v14 = vpop.f32.mrf.mxu1 }
  0x84   :  { %v187_v15 = vadd.f32 %v147_v13, %v36_v11  ;;  %v191_v16 = vadd.f32 %v157_v14, %v40_v12 }
  0x86   :  { %204 = vst.msk [vmem:[%s767_s2] sm:$0xff] %vm19_vm1, %v187_v15 }
  0x87   :  { %208 = vst.msk [vmem:[%s767_s2 + $0x20] sm:$0xff] %vm19_vm1, %v191_v16 }
  0x8a   :  { %v167_v21 = vpop.f32.mrf.mxu2  ;;  %v177_v22 = vpop.f32.mrf.mxu3 }
  0x8b   :  { %v149_v23 = vpop.f32.mrf.mxu0  ;;  %v159_v24 = vpop.f32.mrf.mxu1  ;;  %v195_v25 = vadd.f32 %v167_v21, %v44_v17  ;;  %v199_v28 = vadd.f32 %v177_v22, %v48_v20 }
  0x8c   :  { %v188_v26 = vadd.f32 %v149_v23, %v37_v18  ;;  %v192_v27 = vadd.f32 %v159_v24, %v41_v19 }
  0x8d   :  { %212 = vst.msk [vmem:[%s767_s2 + $0x40] sm:$0xff] %vm19_vm1, %v195_v25  ;;  %v231_v54 = vld [vmem:[%s767_s2] sm:$0xff] }
  0x8e   :  { %205 = vst.msk [vmem:[%s767_s2 + $0x8] sm:$0xff] %vm19_vm1, %v188_v26  ;;  %v289_v57 = vmul.f32 %v231_v54, %v231_v54  ;;  %v248_v62 = vsel %vm19_vm1, %v231_v54, 0.0  ;;  %v235_v4 = vld [vmem:[%s767_s2 + $0x20] sm:$0xff] }
  0x8f   :  { %209 = vst.msk [vmem:[%s767_s2 + $0x28] sm:$0xff] %vm19_vm1, %v192_v27  ;;  %v293_v13 = vmul.f32 %v235_v4, %v235_v4  ;;  %v255_v19 = vsel %vm19_vm1, %v235_v4, 0.0 }
  0x90   :  { %216 = vst.msk [vmem:[%s767_s2 + $0x60] sm:$0xff] %vm19_vm1, %v199_v28  ;;  %v305_v8 = vsel %vm19_vm1, %v289_v57, 0.0 }
  0x91   :  { %v312_v25 = vsel %vm19_vm1, %v293_v13, 0.0 }
  0x92   :  { %v169_v33 = vpop.f32.mrf.mxu2  ;;  %v179_v34 = vpop.f32.mrf.mxu3 }
  0x93   :  { %v152_v35 = vpop.f32.mrf.mxu0  ;;  %v162_v36 = vpop.f32.mrf.mxu1  ;;  %v196_v37 = vadd.f32 %v169_v33, %v45_v29  ;;  %v200_v40 = vadd.f32 %v179_v34, %v49_v32 }
  0x94   :  { %v189_v38 = vadd.f32 %v152_v35, %v38_v30  ;;  %v193_v39 = vadd.f32 %v162_v36, %v42_v31  ;;  %v239_v28 = vld [vmem:[%s767_s2 + $0x40] sm:$0xff] }
  0x95   :  { %213 = vst.msk [vmem:[%s767_s2 + $0x48] sm:$0xff] %vm19_vm1, %v196_v37  ;;  %v232_v47 = vld [vmem:[%s767_s2 + $0x8] sm:$0xff]  ;;  %v297_v37 = vmul.f32 %v239_v28, %v239_v28 }
  0x96   :  { %206 = vst.msk [vmem:[%s767_s2 + $0x10] sm:$0xff] %vm19_vm1, %v189_v38  ;;  %v290_v56 = vmul.f32 %v232_v47, %v232_v47  ;;  %v249_v58 = vsel %vm19_vm1, %v232_v47, 0.0  ;;  %v236_v11 = vld [vmem:[%s767_s2 + $0x28] sm:$0xff] }
  0x97   :  { %210 = vst.msk [vmem:[%s767_s2 + $0x30] sm:$0xff] %vm19_vm1, %v193_v39  ;;  %v250_v5 = vadd.f32 %v249_v58, %v248_v62  ;;  %v294_v20 = vmul.f32 %v236_v11, %v236_v11  ;;  %v257_v26 = vsel %vm19_vm1, %v236_v11, 0.0 }
  0x98   :  { %217 = vst.msk [vmem:[%s767_s2 + $0x68] sm:$0xff] %vm19_vm1, %v200_v40  ;;  %v306_v63 = vsel %vm19_vm1, %v290_v56, 0.0 }
  0x99   :  { %v307_v10 = vadd.f32 %v306_v63, %v305_v8  ;;  %v314_v31 = vsel %vm19_vm1, %v294_v20, 0.0 }
  0x9a   :  { %v172_v45 = vpop.f32.mrf.mxu2  ;;  %v182_v46 = vpop.f32.mrf.mxu3 }
  0x9b   :  { %v154_v48 = vpop.f32.mrf.mxu0  ;;  %v164_v49 = vpop.f32.mrf.mxu1  ;;  %v197_v50 = vadd.f32 %v172_v45, %v46_v41  ;;  %v201_v53 = vadd.f32 %v182_v46, %v50_v44 }
  0x9c   :  { %v190_v51 = vadd.f32 %v154_v48, %v39_v42  ;;  %v194_v52 = vadd.f32 %v164_v49, %v43_v43  ;;  %v240_v34 = vld [vmem:[%s767_s2 + $0x48] sm:$0xff]  ;;  %v263_v43 = vsel %vm19_vm1, %v239_v28, 0.0  ;;  %v320_v49 = vsel %vm19_vm1, %v297_v37, 0.0  ;;  %v288_v37 = vld [vmem:[%s769_s4] sm:$0x1] }
  0x9d   :  { %v233_v55 = vld [vmem:[%s767_s2 + $0x10] sm:$0xff]  ;;  %214 = vst.msk [vmem:[%s767_s2 + $0x50] sm:$0xff] %vm19_vm1, %v197_v50  ;;  %v298_v44 = vmul.f32 %v240_v34, %v240_v34  ;;  %v265_v50 = vsel %vm19_vm1, %v240_v34, 0.0  ;;  %v247_v34 = vld [vmem:[%s768_s3] sm:$0x1] }
  0x9e   :  { %207 = vst.msk [vmem:[%s767_s2 + $0x18] sm:$0xff] %vm19_vm1, %v190_v51  ;;  %v291_v59 = vmul.f32 %v233_v55, %v233_v55  ;;  %v251_v0 = vsel %vm19_vm1, %v233_v55, 0.0  ;;  %v237_v17 = vld [vmem:[%s767_s2 + $0x30] sm:$0xff] }
  0x9f   :  { %211 = vst.msk [vmem:[%s767_s2 + $0x38] sm:$0xff] %vm19_vm1, %v194_v52  ;;  %v252_v12 = vadd.f32 %v251_v0, %v250_v5  ;;  %v295_v27 = vmul.f32 %v237_v17, %v237_v17  ;;  %v259_v32 = vsel %vm19_vm1, %v237_v17, 0.0  ;;  %v243_v52 = vld [vmem:[%s767_s2 + $0x60] sm:$0xff]  ;;  %v322_v55 = vsel %vm19_vm1, %v298_v44, 0.0 }
  0xa0   :  { %218 = vst.msk [vmem:[%s767_s2 + $0x70] sm:$0xff] %vm19_vm1, %v201_v53  ;;  %v308_v9 = vsel %vm19_vm1, %v291_v59, 0.0  ;;  %v271_v4 = vsel %vm19_vm1, %v243_v52, 0.0 }
  0xa1   :  { %v309_v16 = vadd.f32 %v308_v9, %v307_v10  ;;  %v316_v38 = vsel %vm19_vm1, %v295_v27, 0.0 }
  0xa2   :  { %v174_v2 = vpop.f32.mrf.mxu2  ;;  %v184_v3 = vpop.f32.mrf.mxu3 }
  0xa3   :  { %v198_v6 = vadd.f32 %v174_v2, %v47_v60  ;;  %v202_v7 = vadd.f32 %v184_v3, %v51_v61  ;;  %v244_v60 = vld [vmem:[%s767_s2 + $0x68] sm:$0xff]  ;;  %v301_v61 = vmul.f32 %v243_v52, %v243_v52 }
  0xa4   :  { %v241_v42 = vld [vmem:[%s767_s2 + $0x50] sm:$0xff]  ;;  %v302_v5 = vmul.f32 %v244_v60, %v244_v60  ;;  %v273_v11 = vsel %vm19_vm1, %v244_v60, 0.0 }
  0xa5   :  { %v234_v1 = vld [vmem:[%s767_s2 + $0x18] sm:$0xff]  ;;  %215 = vst.msk [vmem:[%s767_s2 + $0x58] sm:$0xff] %vm19_vm1, %v198_v6  ;;  %v299_v51 = vmul.f32 %v241_v42, %v241_v42  ;;  %v267_v56 = vsel %vm19_vm1, %v241_v42, 0.0  ;;  %v328_v10 = vsel %vm19_vm1, %v301_v61, 0.0 }
  0xa6   :  { %v253_v14 = vsel %vm19_vm1, %v234_v1, 0.0  ;;  %v292_v15 = vmul.f32 %v234_v1, %v234_v1  ;;  %219 = vst.msk [vmem:[%s767_s2 + $0x78] sm:$0xff] %vm19_vm1, %v202_v7  ;;  %v238_v24 = vld [vmem:[%s767_s2 + $0x38] sm:$0xff] }
  0xa7   :  { %v254_v18 = vadd.f32 %v253_v14, %v252_v12  ;;  %v296_v33 = vmul.f32 %v238_v24, %v238_v24  ;;  %v261_v39 = vsel %vm19_vm1, %v238_v24, 0.0  ;;  %v324_v62 = vsel %vm19_vm1, %v299_v51, 0.0  ;;  %v245_v3 = vld [vmem:[%s767_s2 + $0x70] sm:$0xff] }
  0xa8   :  { %v310_v21 = vsel %vm19_vm1, %v292_v15, 0.0  ;;  %v303_v12 = vmul.f32 %v245_v3, %v245_v3  ;;  %v330_v14 = vsel %vm19_vm1, %v302_v5, 0.0  ;;  %v275_v15 = vsel %vm19_vm1, %v245_v3, 0.0 }
  0xa9   :  { %v256_v22 = vadd.f32 %v255_v19, %v254_v18  ;;  %v311_v23 = vadd.f32 %v310_v21, %v309_v16  ;;  %v318_v45 = vsel %vm19_vm1, %v296_v33, 0.0 }
  0xaa   :  { %v332_v19 = vsel %vm19_vm1, %v303_v12, 0.0 }
  0xab   :  { %v313_v29 = vadd.f32 %v312_v25, %v311_v23  ;;  %v258_v30 = vadd.f32 %v257_v26, %v256_v22 }
  0xac   :  { %v242_v48 = vld [vmem:[%s767_s2 + $0x58] sm:$0xff] }
  0xad   :  { %v260_v35 = vadd.f32 %v259_v32, %v258_v30  ;;  %v315_v36 = vadd.f32 %v314_v31, %v313_v29  ;;  %v300_v57 = vmul.f32 %v242_v48, %v242_v48  ;;  %v269_v63 = vsel %vm19_vm1, %v242_v48, 0.0  ;;  %v246_v9 = vld [vmem:[%s767_s2 + $0x78] sm:$0xff] }
  0xae   :  { %v304_v16 = vmul.f32 %v246_v9, %v246_v9  ;;  %v277_v20 = vsel %vm19_vm1, %v246_v9, 0.0 }
  0xaf   :  { %v262_v40 = vadd.f32 %v261_v39, %v260_v35  ;;  %v317_v41 = vadd.f32 %v316_v38, %v315_v36  ;;  %v326_v6 = vsel %vm19_vm1, %v300_v57, 0.0 }
  0xb0   :  { %v334_v23 = vsel %vm19_vm1, %v304_v16, 0.0 }
  0xb1   :  { %v264_v46 = vadd.f32 %v263_v43, %v262_v40  ;;  %v319_v47 = vadd.f32 %v318_v45, %v317_v41 }
  0xb3   :  { %v321_v53 = vadd.f32 %v320_v49, %v319_v47  ;;  %v266_v54 = vadd.f32 %v265_v50, %v264_v46 }
  0xb5   :  { %v268_v58 = vadd.f32 %v267_v56, %v266_v54  ;;  %v323_v59 = vadd.f32 %v322_v55, %v321_v53 }
  0xb7   :  { %v325_v0 = vadd.f32 %v324_v62, %v323_v59  ;;  %v270_v2 = vadd.f32 %v269_v63, %v268_v58 }
  0xb9   :  { %v272_v7 = vadd.f32 %v271_v4, %v270_v2  ;;  %v327_v8 = vadd.f32 %v326_v6, %v325_v0 }
  0xbb   :  { %v329_v1 = vadd.f32 %v328_v10, %v327_v8  ;;  %v274_v13 = vadd.f32 %v273_v11, %v272_v7 }
  0xbd   :  { %v276_v17 = vadd.f32 %v275_v15, %v274_v13  ;;  %v331_v18 = vadd.f32 %v330_v14, %v329_v1 }
  0xbf   :  { %v333_v21 = vadd.f32 %v332_v19, %v331_v18  ;;  %v278_v22 = vadd.f32 %v277_v20, %v276_v17 }
  0xc1   :  { %v279_v24 = vrot.slane %v278_v22, 4  ;;  %v335_v25 = vadd.f32 %v334_v23, %v333_v21 }
  0xc3   :  { %v280_v26 = vadd.f32 %v279_v24, %v278_v22  ;;  %v336_v27 = vrot.slane %v335_v25, 4 }
  0xc5   :  { %v281_v28 = vrot.slane %v280_v26, 2  ;;  %v337_v29 = vadd.f32 %v336_v27, %v335_v25 }
  0xc7   :  { %v282_v30 = vadd.f32 %v281_v28, %v280_v26  ;;  %v338_v31 = vrot.slane %v337_v29, 2 }
  0xc9   :  { %v283_v32 = vrot.slane %v282_v30, 1  ;;  %v339_v33 = vadd.f32 %v338_v31, %v337_v29 }
  0xcb   :  { %v284_v35 = vadd.f32 %v283_v32, %v282_v30  ;;  %v340_v36 = vrot.slane %v339_v33, 1 }
  0xcd   :  { %v285_v38 = vadd.f32 %v284_v35, %v247_v34  ;;  %v341_v39 = vadd.f32 %v340_v36, %v339_v33 }
  0xcf   :  { %287 = vst.msk [vmem:[%s768_s3] sm:$0x1] %vm225_vm3, %v285_v38  ;;  %v342_v40 = vadd.f32 %v341_v39, %v288_v37 }
  0xd1   :  { %343 = vst.msk [vmem:[%s769_s4] sm:$0x1] %vm225_vm3, %v342_v40 }

// kernel: residual_block_forward.12
= control target key start
LH: loop header
LB: loop body
LE: loop exit
PB: predicated region body
PF: predicated region fallthrough
CT: control target
= control target key end

     0   :  { %vm19_vm0 = vcmask 15360   ;;  %v427_v1 = vmov 0.0   ;;  %vm145_vm1 = vcmask 1040384   ;;  %vm120_vm2 = vcmask 146432   ;;  %s787_s1 = inlined_call_operand.vmem [shape: bf16[18,2], index: 1, kind: input, shape index: {}]   ;;  %s788_s2 = inlined_call_operand.vmem [shape: f32[128,2], index: 2, kind: output, shape index: {0}]   ;;  %s789_s0 = inlined_call_operand.vmem [shape: bf16[128,18], index: 0, kind: input, shape index: {}]   ;;  %s790_s3 = inlined_call_operand.vmem [shape: f32[1,2], index: 3, kind: output, shape index: {1}]   ;;  %s791_s4 = inlined_call_operand.vmem [shape: f32[1,2], index: 4, kind: output, shape index: {2}]  }
   0x1   :  { %v70_v0 = vld [vmem:[%s787_s1 + $0x8] sm:$0x1]  ;;  %20 = vst.msk [vmem:[%s788_s2] sm:$0xff] %vm19_vm0, %v427_v1  ;;  %v419_v5 = vld [vmem:[%s787_s1] sm:$0xff]  ;;  %v413_v7 = vld [vmem:[%s789_s0 + $0x10] sm:$0xff]  ;;  %vm236_vm3 = vcmask 8192  }
   0x2   :  { %v116_v2 = vunpack.c.l.b16 %v70_v0  ;;  %21 = vst.msk [vmem:[%s788_s2 + $0x8] sm:$0xff] %vm19_vm0, %v427_v1  ;;  %v411_v6 = vld [vmem:[%s789_s0] sm:$0xff]  ;;  %v417_v9 = vld [vmem:[%s789_s0 + $0x30] sm:$0xff]  ;;  %v412_v10 = vld [vmem:[%s789_s0 + $0x8] sm:$0xff] }
   0x3   :  { %22 = vst.msk [vmem:[%s788_s2 + $0x10] sm:$0xff] %vm19_vm0, %v427_v1  ;;  %v415_v8 = vld [vmem:[%s789_s0 + $0x20] sm:$0xff]  ;;  %v414_v11 = vld [vmem:[%s789_s0 + $0x18] sm:$0xff]  ;;  %v416_v12 = vld [vmem:[%s789_s0 + $0x28] sm:$0xff] }
   0x4   :  { %v118_v3 = vpack.c.b16 %v116_v2, %v116_v2  ;;  %23 = vst.msk [vmem:[%s788_s2 + $0x18] sm:$0xff] %vm19_vm0, %v427_v1  ;;  %v418_v13 = vld [vmem:[%s789_s0 + $0x38] sm:$0xff] }
   0x5   :  { %24 = vst.msk [vmem:[%s788_s2 + $0x20] sm:$0xff] %vm19_vm0, %v427_v1 }
   0x6   :  { %v147_v4 = vsel %vm145_vm1, %v118_v3, 0  ;;  %25 = vst.msk [vmem:[%s788_s2 + $0x28] sm:$0xff] %vm19_vm0, %v427_v1 }
   0x7   :  { %155 = vmatpush.bf16.msra.mxu0 %v147_v4  ;;  %420 = vmatpush.bf16.msra.mxu1 %v147_v4  ;;  %26 = vst.msk [vmem:[%s788_s2 + $0x30] sm:$0xff] %vm19_vm0, %v427_v1 }
   0x8   :  { %421 = vmatpush.bf16.msra.mxu2 %v147_v4  ;;  %422 = vmatpush.bf16.msra.mxu3 %v147_v4  ;;  %27 = vst.msk [vmem:[%s788_s2 + $0x38] sm:$0xff] %vm19_vm0, %v427_v1  ;;  %v36_v14 = vld [vmem:[%s788_s2] sm:$0xff] }
   0x9   :  { %28 = vst.msk [vmem:[%s788_s2 + $0x40] sm:$0xff] %vm19_vm0, %v427_v1  ;;  %v37_v21 = vld [vmem:[%s788_s2 + $0x8] sm:$0xff] }
   0xa   :  { %29 = vst.msk [vmem:[%s788_s2 + $0x48] sm:$0xff] %vm19_vm0, %v427_v1  ;;  %v38_v33 = vld [vmem:[%s788_s2 + $0x10] sm:$0xff] }
   0xb   :  { %156 = vmatpush.bf16.msra.mxu0 %v419_v5  ;;  %423 = vmatpush.bf16.msra.mxu1 %v419_v5  ;;  %30 = vst.msk [vmem:[%s788_s2 + $0x50] sm:$0xff] %vm19_vm0, %v427_v1  ;;  %v39_v45 = vld [vmem:[%s788_s2 + $0x18] sm:$0xff] }
   0xc   :  { %424 = vmatpush.bf16.msra.mxu2 %v419_v5  ;;  %425 = vmatpush.bf16.msra.mxu3 %v419_v5  ;;  %31 = vst.msk [vmem:[%s788_s2 + $0x58] sm:$0xff] %vm19_vm0, %v427_v1  ;;  %v40_v15 = vld [vmem:[%s788_s2 + $0x20] sm:$0xff] }
   0xd   :  { %32 = vst.msk [vmem:[%s788_s2 + $0x60] sm:$0xff] %vm19_vm0, %v427_v1  ;;  %v41_v22 = vld [vmem:[%s788_s2 + $0x28] sm:$0xff] }
   0xe   :  { %403 = vmatmul.msk.bf16.vlgmr.msra.gmra.mxu0 %vm120_vm2, %v411_v6  ;;  %405 = vmatmul.msk.bf16.vlgmr.msra.gmra.mxu1 %vm120_vm2, %v413_v7  ;;  %33 = vst.msk [vmem:[%s788_s2 + $0x68] sm:$0xff] %vm19_vm0, %v427_v1  ;;  %v42_v34 = vld [vmem:[%s788_s2 + $0x30] sm:$0xff] }
   0xf   :  { %407 = vmatmul.msk.bf16.vlgmr.msra.gmra.mxu2 %vm120_vm2, %v415_v8  ;;  %409 = vmatmul.msk.bf16.vlgmr.msra.gmra.mxu3 %vm120_vm2, %v417_v9  ;;  %34 = vst.msk [vmem:[%s788_s2 + $0x70] sm:$0xff] %vm19_vm0, %v427_v1  ;;  %v43_v46 = vld [vmem:[%s788_s2 + $0x38] sm:$0xff] }
  0x10   :  { %35 = vst.msk [vmem:[%s788_s2 + $0x78] sm:$0xff] %vm19_vm0, %v427_v1  ;;  %v44_v20 = vld [vmem:[%s788_s2 + $0x40] sm:$0xff] }
  0x11   :  { %v45_v32 = vld [vmem:[%s788_s2 + $0x48] sm:$0xff]  ;;  %237 = vst.msk [vmem:[%s790_s3] sm:$0x1] %vm236_vm3, %v427_v1 }
  0x12   :  { %v46_v44 = vld [vmem:[%s788_s2 + $0x50] sm:$0xff]  ;;  %238 = vst.msk [vmem:[%s791_s4] sm:$0x1] %vm236_vm3, %v427_v1 }
  0x13   :  { %v47_v63 = vld [vmem:[%s788_s2 + $0x58] sm:$0xff] }
  0x14   :  { %v48_v23 = vld [vmem:[%s788_s2 + $0x60] sm:$0xff] }
  0x15   :  { %v49_v35 = vld [vmem:[%s788_s2 + $0x68] sm:$0xff] }
  0x16   :  { %v50_v47 = vld [vmem:[%s788_s2 + $0x70] sm:$0xff] }
  0x17   :  { %v51_v0 = vld [vmem:[%s788_s2 + $0x78] sm:$0xff] }
  0x1e   :  { %404 = vmatmul.msk.bf16.gmra.mxu0 %vm120_vm2, %v412_v10  ;;  %406 = vmatmul.msk.bf16.gmra.mxu1 %vm120_vm2, %v414_v11 }
  0x1f   :  { %408 = vmatmul.msk.bf16.gmra.mxu2 %vm120_vm2, %v416_v12  ;;  %410 = vmatmul.msk.bf16.gmra.mxu3 %vm120_vm2, %v418_v13 }
  0x8b   :  { %v158_v16 = vpop.f32.mrf.mxu0  ;;  %v168_v17 = vpop.f32.mrf.mxu1 }
  0x8c   :  { %v198_v18 = vadd.f32 %v158_v16, %v36_v14  ;;  %v202_v19 = vadd.f32 %v168_v17, %v40_v15 }
  0x8e   :  { %215 = vst.msk [vmem:[%s788_s2] sm:$0xff] %vm19_vm0, %v198_v18 }
  0x8f   :  { %219 = vst.msk [vmem:[%s788_s2 + $0x20] sm:$0xff] %vm19_vm0, %v202_v19 }
  0x92   :  { %v178_v24 = vpop.f32.mrf.mxu2  ;;  %v188_v25 = vpop.f32.mrf.mxu3 }
  0x93   :  { %v160_v26 = vpop.f32.mrf.mxu0  ;;  %v170_v27 = vpop.f32.mrf.mxu1  ;;  %v206_v28 = vadd.f32 %v178_v24, %v44_v20  ;;  %v210_v31 = vadd.f32 %v188_v25, %v48_v23 }
  0x94   :  { %v199_v29 = vadd.f32 %v160_v26, %v37_v21  ;;  %v203_v30 = vadd.f32 %v170_v27, %v41_v22 }
  0x95   :  { %223 = vst.msk [vmem:[%s788_s2 + $0x40] sm:$0xff] %vm19_vm0, %v206_v28  ;;  %v242_v57 = vld [vmem:[%s788_s2] sm:$0xff] }
  0x96   :  { %216 = vst.msk [vmem:[%s788_s2 + $0x8] sm:$0xff] %vm19_vm0, %v199_v29  ;;  %v300_v60 = vmul.f32 %v242_v57, %v242_v57  ;;  %v259_v2 = vsel %vm19_vm0, %v242_v57, 0.0  ;;  %v246_v7 = vld [vmem:[%s788_s2 + $0x20] sm:$0xff] }
  0x97   :  { %220 = vst.msk [vmem:[%s788_s2 + $0x28] sm:$0xff] %vm19_vm0, %v203_v30  ;;  %v304_v16 = vmul.f32 %v246_v7, %v246_v7  ;;  %v266_v22 = vsel %vm19_vm0, %v246_v7, 0.0 }
  0x98   :  { %227 = vst.msk [vmem:[%s788_s2 + $0x60] sm:$0xff] %vm19_vm0, %v210_v31  ;;  %v316_v11 = vsel %vm19_vm0, %v300_v60, 0.0 }
  0x99   :  { %v323_v28 = vsel %vm19_vm0, %v304_v16, 0.0 }
  0x9a   :  { %v180_v36 = vpop.f32.mrf.mxu2  ;;  %v190_v37 = vpop.f32.mrf.mxu3 }
  0x9b   :  { %v163_v38 = vpop.f32.mrf.mxu0  ;;  %v173_v39 = vpop.f32.mrf.mxu1  ;;  %v207_v40 = vadd.f32 %v180_v36, %v45_v32  ;;  %v211_v43 = vadd.f32 %v190_v37, %v49_v35 }
  0x9c   :  { %v200_v41 = vadd.f32 %v163_v38, %v38_v33  ;;  %v204_v42 = vadd.f32 %v173_v39, %v42_v34  ;;  %v250_v31 = vld [vmem:[%s788_s2 + $0x40] sm:$0xff] }
  0x9d   :  { %224 = vst.msk [vmem:[%s788_s2 + $0x48] sm:$0xff] %vm19_vm0, %v207_v40  ;;  %v243_v50 = vld [vmem:[%s788_s2 + $0x8] sm:$0xff]  ;;  %v308_v40 = vmul.f32 %v250_v31, %v250_v31 }
  0x9e   :  { %217 = vst.msk [vmem:[%s788_s2 + $0x10] sm:$0xff] %vm19_vm0, %v200_v41  ;;  %v301_v59 = vmul.f32 %v243_v50, %v243_v50  ;;  %v260_v61 = vsel %vm19_vm0, %v243_v50, 0.0  ;;  %v247_v14 = vld [vmem:[%s788_s2 + $0x28] sm:$0xff] }
  0x9f   :  { %221 = vst.msk [vmem:[%s788_s2 + $0x30] sm:$0xff] %vm19_vm0, %v204_v42  ;;  %v261_v8 = vadd.f32 %v260_v61, %v259_v2  ;;  %v305_v23 = vmul.f32 %v247_v14, %v247_v14  ;;  %v268_v29 = vsel %vm19_vm0, %v247_v14, 0.0 }
  0xa0   :  { %228 = vst.msk [vmem:[%s788_s2 + $0x68] sm:$0xff] %vm19_vm0, %v211_v43  ;;  %v317_v3 = vsel %vm19_vm0, %v301_v59, 0.0 }
  0xa1   :  { %v318_v13 = vadd.f32 %v317_v3, %v316_v11  ;;  %v325_v34 = vsel %vm19_vm0, %v305_v23, 0.0 }
  0xa2   :  { %v183_v48 = vpop.f32.mrf.mxu2  ;;  %v193_v49 = vpop.f32.mrf.mxu3 }
  0xa3   :  { %v165_v51 = vpop.f32.mrf.mxu0  ;;  %v175_v52 = vpop.f32.mrf.mxu1  ;;  %v208_v53 = vadd.f32 %v183_v48, %v46_v44  ;;  %v212_v56 = vadd.f32 %v193_v49, %v50_v47 }
  0xa4   :  { %v201_v54 = vadd.f32 %v165_v51, %v39_v45  ;;  %v205_v55 = vadd.f32 %v175_v52, %v43_v46  ;;  %v251_v37 = vld [vmem:[%s788_s2 + $0x48] sm:$0xff]  ;;  %v274_v46 = vsel %vm19_vm0, %v250_v31, 0.0  ;;  %v331_v52 = vsel %vm19_vm0, %v308_v40, 0.0  ;;  %v299_v40 = vld [vmem:[%s791_s4] sm:$0x1] }
  0xa5   :  { %v244_v58 = vld [vmem:[%s788_s2 + $0x10] sm:$0xff]  ;;  %225 = vst.msk [vmem:[%s788_s2 + $0x50] sm:$0xff] %vm19_vm0, %v208_v53  ;;  %v309_v47 = vmul.f32 %v251_v37, %v251_v37  ;;  %v276_v53 = vsel %vm19_vm0, %v251_v37, 0.0  ;;  %v258_v37 = vld [vmem:[%s790_s3] sm:$0x1] }
  0xa6   :  { %218 = vst.msk [vmem:[%s788_s2 + $0x18] sm:$0xff] %vm19_vm0, %v201_v54  ;;  %v302_v62 = vmul.f32 %v244_v58, %v244_v58  ;;  %v262_v4 = vsel %vm19_vm0, %v244_v58, 0.0  ;;  %v248_v20 = vld [vmem:[%s788_s2 + $0x30] sm:$0xff] }
  0xa7   :  { %222 = vst.msk [vmem:[%s788_s2 + $0x38] sm:$0xff] %vm19_vm0, %v205_v55  ;;  %v263_v15 = vadd.f32 %v262_v4, %v261_v8  ;;  %v306_v30 = vmul.f32 %v248_v20, %v248_v20  ;;  %v270_v35 = vsel %vm19_vm0, %v248_v20, 0.0  ;;  %v254_v55 = vld [vmem:[%s788_s2 + $0x60] sm:$0xff]  ;;  %v333_v58 = vsel %vm19_vm0, %v309_v47, 0.0 }
  0xa8   :  { %229 = vst.msk [vmem:[%s788_s2 + $0x70] sm:$0xff] %vm19_vm0, %v212_v56  ;;  %v319_v12 = vsel %vm19_vm0, %v302_v62, 0.0  ;;  %v282_v7 = vsel %vm19_vm0, %v254_v55, 0.0 }
  0xa9   :  { %v320_v19 = vadd.f32 %v319_v12, %v318_v13  ;;  %v327_v41 = vsel %vm19_vm0, %v306_v30, 0.0 }
  0xaa   :  { %v185_v5 = vpop.f32.mrf.mxu2  ;;  %v195_v6 = vpop.f32.mrf.mxu3 }
  0xab   :  { %v209_v9 = vadd.f32 %v185_v5, %v47_v63  ;;  %v213_v10 = vadd.f32 %v195_v6, %v51_v0  ;;  %v255_v63 = vld [vmem:[%s788_s2 + $0x68] sm:$0xff]  ;;  %v312_v0 = vmul.f32 %v254_v55, %v254_v55 }
  0xac   :  { %v252_v45 = vld [vmem:[%s788_s2 + $0x50] sm:$0xff]  ;;  %v313_v8 = vmul.f32 %v255_v63, %v255_v63  ;;  %v284_v14 = vsel %vm19_vm0, %v255_v63, 0.0 }
  0xad   :  { %v245_v1 = vld [vmem:[%s788_s2 + $0x18] sm:$0xff]  ;;  %226 = vst.msk [vmem:[%s788_s2 + $0x58] sm:$0xff] %vm19_vm0, %v209_v9  ;;  %v310_v54 = vmul.f32 %v252_v45, %v252_v45  ;;  %v278_v59 = vsel %vm19_vm0, %v252_v45, 0.0  ;;  %v339_v13 = vsel %vm19_vm0, %v312_v0, 0.0 }
  0xae   :  { %v264_v17 = vsel %vm19_vm0, %v245_v1, 0.0  ;;  %v303_v18 = vmul.f32 %v245_v1, %v245_v1  ;;  %230 = vst.msk [vmem:[%s788_s2 + $0x78] sm:$0xff] %vm19_vm0, %v213_v10  ;;  %v249_v27 = vld [vmem:[%s788_s2 + $0x38] sm:$0xff] }
  0xaf   :  { %v265_v21 = vadd.f32 %v264_v17, %v263_v15  ;;  %v307_v36 = vmul.f32 %v249_v27, %v249_v27  ;;  %v272_v42 = vsel %vm19_vm0, %v249_v27, 0.0  ;;  %v335_v2 = vsel %vm19_vm0, %v310_v54, 0.0  ;;  %v256_v6 = vld [vmem:[%s788_s2 + $0x70] sm:$0xff] }
  0xb0   :  { %v321_v24 = vsel %vm19_vm0, %v303_v18, 0.0  ;;  %v314_v15 = vmul.f32 %v256_v6, %v256_v6  ;;  %v341_v17 = vsel %vm19_vm0, %v313_v8, 0.0  ;;  %v286_v18 = vsel %vm19_vm0, %v256_v6, 0.0 }
  0xb1   :  { %v267_v25 = vadd.f32 %v266_v22, %v265_v21  ;;  %v322_v26 = vadd.f32 %v321_v24, %v320_v19  ;;  %v329_v48 = vsel %vm19_vm0, %v307_v36, 0.0 }
  0xb2   :  { %v343_v22 = vsel %vm19_vm0, %v314_v15, 0.0 }
  0xb3   :  { %v324_v32 = vadd.f32 %v323_v28, %v322_v26  ;;  %v269_v33 = vadd.f32 %v268_v29, %v267_v25 }
  0xb4   :  { %v253_v51 = vld [vmem:[%s788_s2 + $0x58] sm:$0xff] }
  0xb5   :  { %v271_v38 = vadd.f32 %v270_v35, %v269_v33  ;;  %v326_v39 = vadd.f32 %v325_v34, %v324_v32  ;;  %v311_v60 = vmul.f32 %v253_v51, %v253_v51  ;;  %v280_v3 = vsel %vm19_vm0, %v253_v51, 0.0  ;;  %v257_v12 = vld [vmem:[%s788_s2 + $0x78] sm:$0xff] }
  0xb6   :  { %v315_v19 = vmul.f32 %v257_v12, %v257_v12  ;;  %v288_v23 = vsel %vm19_vm0, %v257_v12, 0.0 }
  0xb7   :  { %v273_v43 = vadd.f32 %v272_v42, %v271_v38  ;;  %v328_v44 = vadd.f32 %v327_v41, %v326_v39  ;;  %v337_v9 = vsel %vm19_vm0, %v311_v60, 0.0 }
  0xb8   :  { %v345_v26 = vsel %vm19_vm0, %v315_v19, 0.0 }
  0xb9   :  { %v275_v49 = vadd.f32 %v274_v46, %v273_v43  ;;  %v330_v50 = vadd.f32 %v329_v48, %v328_v44 }
  0xbb   :  { %v332_v56 = vadd.f32 %v331_v52, %v330_v50  ;;  %v277_v57 = vadd.f32 %v276_v53, %v275_v49 }
  0xbd   :  { %v279_v61 = vadd.f32 %v278_v59, %v277_v57  ;;  %v334_v62 = vadd.f32 %v333_v58, %v332_v56 }
  0xbf   :  { %v336_v4 = vadd.f32 %v335_v2, %v334_v62  ;;  %v281_v5 = vadd.f32 %v280_v3, %v279_v61 }
  0xc1   :  { %v283_v10 = vadd.f32 %v282_v7, %v281_v5  ;;  %v338_v11 = vadd.f32 %v337_v9, %v336_v4 }
  0xc3   :  { %v340_v1 = vadd.f32 %v339_v13, %v338_v11  ;;  %v285_v16 = vadd.f32 %v284_v14, %v283_v10 }
  0xc5   :  { %v287_v20 = vadd.f32 %v286_v18, %v285_v16  ;;  %v342_v21 = vadd.f32 %v341_v17, %v340_v1 }
  0xc7   :  { %v344_v24 = vadd.f32 %v343_v22, %v342_v21  ;;  %v289_v25 = vadd.f32 %v288_v23, %v287_v20 }
  0xc9   :  { %v290_v27 = vrot.slane %v289_v25, 4  ;;  %v346_v28 = vadd.f32 %v345_v26, %v344_v24 }
  0xcb   :  { %v291_v29 = vadd.f32 %v290_v27, %v289_v25  ;;  %v347_v30 = vrot.slane %v346_v28, 4 }
  0xcd   :  { %v292_v31 = vrot.slane %v291_v29, 2  ;;  %v348_v32 = vadd.f32 %v347_v30, %v346_v28 }
  0xcf   :  { %v293_v33 = vadd.f32 %v292_v31, %v291_v29  ;;  %v349_v34 = vrot.slane %v348_v32, 2 }
  0xd1   :  { %v294_v35 = vrot.slane %v293_v33, 1  ;;  %v350_v36 = vadd.f32 %v349_v34, %v348_v32 }
  0xd3   :  { %v295_v38 = vadd.f32 %v294_v35, %v293_v33  ;;  %v351_v39 = vrot.slane %v350_v36, 1 }
  0xd5   :  { %v296_v41 = vadd.f32 %v295_v38, %v258_v37  ;;  %v352_v42 = vadd.f32 %v351_v39, %v350_v36 }
  0xd7   :  { %298 = vst.msk [vmem:[%s790_s3] sm:$0x1] %vm236_vm3, %v296_v41  ;;  %v353_v43 = vadd.f32 %v352_v42, %v299_v40 }
  0xd9   :  { %354 = vst.msk [vmem:[%s791_s4] sm:$0x1] %vm236_vm3, %v353_v43 }

// kernel: residual_block_forward.13
= control target key start
LH: loop header
LB: loop body
LE: loop exit
PB: predicated region body
PF: predicated region fallthrough
CT: control target
= control target key end

     0   :  { %vm164_vm3 = vcmask 11264   ;;  %s427_s1 = inlined_call_operand.vmem [shape: f32[1,2], index: 1, kind: input, shape index: {}]   ;;  %s428_s2 = inlined_call_operand.vmem [shape: f32[1,2], index: 2, kind: input, shape index: {}]   ;;  %s429_s3 = inlined_call_operand.vmem [shape: f32[1,2], index: 3, kind: input, shape index: {}]   ;;  %s430_s4 = inlined_call_operand.vmem [shape: f32[1,2], index: 4, kind: input, shape index: {}]   ;;  %s431_s0 = inlined_call_operand.vmem [shape: f32[128,2], index: 0, kind: input, shape index: {}]   ;;  %s432_s5 = inlined_call_operand.vmem [shape: bf16[128,2], index: 5, kind: output, shape index: {}]  }
   0x1   :  { %v36_v0 = vld [vmem:[%s427_s1] sm:$0x1]  ;;  %v21_v14 = vld [vmem:[%s431_s0 + $0x8] sm:$0xff]  ;;  %v22_v15 = vld [vmem:[%s431_s0 + $0x10] sm:$0xff] }
   0x2   :  { %v38_v1 = vld [vmem:[%s428_s2] sm:$0x1]  ;;  %v37_v2 = vmul.f32 0.0078125, %v36_v0  ;;  %v23_v16 = vld [vmem:[%s431_s0 + $0x18] sm:$0xff]  ;;  %v25_v19 = vld [vmem:[%s431_s0 + $0x28] sm:$0xff] }
   0x3   :  { %v39_v3 = vmul.f32 0.0078125, %v38_v1  ;;  %v20_v11 = vld [vmem:[%s431_s0] sm:$0xff]  ;;  %v26_v20 = vld [vmem:[%s431_s0 + $0x30] sm:$0xff]  ;;  %v27_v21 = vld [vmem:[%s431_s0 + $0x38] sm:$0xff] }
   0x4   :  { %v40_v4 = vmul.f32 %v37_v2, %v37_v2  ;;  %v228_v12 = vperm.slane %v37_v2, 0  ;;  %v24_v17 = vld [vmem:[%s431_s0 + $0x20] sm:$0xff]  ;;  %v263_v24 = vld [vmem:[%s431_s0 + $0x48] sm:$0xff]  ;;  %v270_v28 = vld [vmem:[%s431_s0 + $0x50] sm:$0xff] }
   0x5   :  { %v258_v23 = vld [vmem:[%s431_s0 + $0x40] sm:$0xff]  ;;  %v275_v29 = vld [vmem:[%s431_s0 + $0x58] sm:$0xff]  ;;  %v289_v35 = vld [vmem:[%s431_s0 + $0x68] sm:$0xff] }
   0x6   :  { %v41_v5 = vsub.f32 %v39_v3, %v40_v4  ;;  %v46_v25 = vsub.f32 %v20_v11, %v228_v12  ;;  %v47_v27 = vsub.f32 %v21_v14, %v228_v12  ;;  %v280_v30 = vld [vmem:[%s431_s0 + $0x60] sm:$0xff]  ;;  %v48_v31 = vsub.f32 %v22_v15, %v228_v12  ;;  %v294_v36 = vld [vmem:[%s431_s0 + $0x70] sm:$0xff]  ;;  %v299_v37 = vld [vmem:[%s431_s0 + $0x78] sm:$0xff] }
   0x7   :  { %v49_v32 = vsub.f32 %v23_v16, %v228_v12  ;;  %v50_v33 = vsub.f32 %v24_v17, %v228_v12  ;;  %v51_v34 = vsub.f32 %v25_v19, %v228_v12  ;;  %v52_v39 = vsub.f32 %v26_v20, %v228_v12  ;;  %v310_v43 = vld [vmem:[%s429_s3] ss:$0 sm:$0xff] }
   0x8   :  { %v42_v6 = vmax.f32 %v41_v5, 0.0  ;;  %v53_v40 = vsub.f32 %v27_v21, %v228_v12  ;;  %v54_v41 = vsub.f32 %v258_v23, %v228_v12  ;;  %v55_v44 = vsub.f32 %v263_v24, %v228_v12  ;;  %v329_v52 = vld [vmem:[%s430_s4] ss:$0 sm:$0xff] }
   0x9   :  { %v56_v45 = vsub.f32 %v270_v28, %v228_v12  ;;  %v57_v46 = vsub.f32 %v275_v29, %v228_v12  ;;  %v58_v47 = vsub.f32 %v280_v30, %v228_v12  ;;  %v59_v48 = vsub.f32 %v289_v35, %v228_v12 }
   0xa   :  { %v62_v7 = vadd.f32 1e-05, %v42_v6  ;;  %v60_v49 = vsub.f32 %v294_v36, %v228_v12  ;;  %v61_v50 = vsub.f32 %v299_v37, %v228_v12 }
   0xc   :  { %187 = vrsqrt.f32 %v62_v7  ;;  %vm69_vm0 = vweird.f32 %v62_v7 }
  0x12   :  { %v188_v8 = vpop.eup %187 }
  0x13   :  { %v64_v9 = vmul.f32 %v188_v8, %v62_v7  ;;  %vm70_vm1 = vweird.f32 %v188_v8 }
  0x14   :  { %vm251_vm2 = vmor %vm69_vm0, %vm70_vm1 }
  0x15   :  { %v65_v10 = vmul.f32 %v188_v8, %v64_v9 }
  0x17   :  { %v66_v13 = vmul.f32 0.5, %v65_v10 }
  0x19   :  { %v67_v18 = vsub.f32 1.5, %v66_v13 }
  0x1b   :  { %v68_v26 = vmul.f32 %v188_v8, %v67_v18 }
  0x1d   :  { %v72_v38 = vsel %vm251_vm2, %v188_v8, %v68_v26 }
  0x1e   :  { %v74_v42 = vperm.slane %v72_v38, 0 }
  0x20   :  { %v76_v51 = vmul.f32 %v74_v42, %v46_v25  ;;  %v77_v53 = vmul.f32 %v74_v42, %v47_v27  ;;  %v78_v54 = vmul.f32 %v74_v42, %v48_v31  ;;  %v79_v55 = vmul.f32 %v74_v42, %v49_v32 }
  0x21   :  { %v80_v56 = vmul.f32 %v74_v42, %v50_v33  ;;  %v81_v57 = vmul.f32 %v74_v42, %v51_v34  ;;  %v82_v58 = vmul.f32 %v74_v42, %v52_v39  ;;  %v83_v59 = vmul.f32 %v74_v42, %v53_v40 }
  0x22   :  { %v96_v60 = vmul.f32 %v310_v43, %v76_v51  ;;  %v97_v61 = vmul.f32 %v310_v43, %v77_v53  ;;  %v98_v62 = vmul.f32 %v310_v43, %v78_v54  ;;  %v99_v63 = vmul.f32 %v310_v43, %v79_v55 }
  0x23   :  { %v100_v0 = vmul.f32 %v310_v43, %v80_v56  ;;  %v101_v1 = vmul.f32 %v310_v43, %v81_v57  ;;  %v102_v2 = vmul.f32 %v310_v43, %v82_v58  ;;  %v103_v3 = vmul.f32 %v310_v43, %v83_v59 }
  0x24   :  { %v116_v4 = vadd.f32 %v329_v52, %v96_v60  ;;  %v117_v5 = vadd.f32 %v329_v52, %v97_v61  ;;  %v118_v6 = vadd.f32 %v329_v52, %v98_v62  ;;  %v119_v7 = vadd.f32 %v329_v52, %v99_v63 }
  0x25   :  { %v120_v8 = vadd.f32 %v329_v52, %v100_v0  ;;  %v121_v9 = vadd.f32 %v329_v52, %v101_v1  ;;  %v122_v10 = vadd.f32 %v329_v52, %v102_v2  ;;  %v123_v11 = vadd.f32 %v329_v52, %v103_v3 }
  0x26   :  { %v132_v12 = vmax.f32 %v116_v4, 0.0  ;;  %v133_v13 = vmax.f32 %v117_v5, 0.0  ;;  %v134_v14 = vmax.f32 %v118_v6, 0.0  ;;  %v135_v15 = vmax.f32 %v119_v7, 0.0 }
  0x27   :  { %v136_v16 = vmax.f32 %v120_v8, 0.0  ;;  %v137_v17 = vmax.f32 %v121_v9, 0.0  ;;  %v138_v18 = vmax.f32 %v122_v10, 0.0  ;;  %v139_v19 = vmax.f32 %v123_v11, 0.0 }
  0x28   :  { %v148_v20 = vpack.c.bf16 %v132_v12, %v132_v12  ;;  %v149_v21 = vpack.c.bf16 %v133_v13, %v133_v13  ;;  %v150_v22 = vpack.c.bf16 %v134_v14, %v134_v14  ;;  %v151_v23 = vpack.c.bf16 %v135_v15, %v135_v15 }
  0x29   :  { %v152_v24 = vpack.c.bf16 %v136_v16, %v136_v16  ;;  %v153_v25 = vpack.c.bf16 %v137_v17, %v137_v17  ;;  %v154_v26 = vpack.c.bf16 %v138_v18, %v138_v18  ;;  %v155_v27 = vpack.c.bf16 %v139_v19, %v139_v19 }
  0x2a   :  { %165 = vst.msk [vmem:[%s432_s5] sm:$0xf] %vm164_vm3, %v148_v20  ;;  %v84_v28 = vmul.f32 %v74_v42, %v54_v41  ;;  %v85_v29 = vmul.f32 %v74_v42, %v55_v44  ;;  %v86_v30 = vmul.f32 %v74_v42, %v56_v45  ;;  %v87_v31 = vmul.f32 %v74_v42, %v57_v46 }
  0x2b   :  { %166 = vst.msk [vmem:[%s432_s5 + $0x4] sm:$0xf] %vm164_vm3, %v149_v21  ;;  %v88_v32 = vmul.f32 %v74_v42, %v58_v47  ;;  %v89_v33 = vmul.f32 %v74_v42, %v59_v48  ;;  %v90_v34 = vmul.f32 %v74_v42, %v60_v49  ;;  %v91_v35 = vmul.f32 %v74_v42, %v61_v50 }
  0x2c   :  { %167 = vst.msk [vmem:[%s432_s5 + $0x8] sm:$0xf] %vm164_vm3, %v150_v22  ;;  %v104_v36 = vmul.f32 %v310_v43, %v84_v28  ;;  %v105_v37 = vmul.f32 %v310_v43, %v85_v29  ;;  %v106_v38 = vmul.f32 %v310_v43, %v86_v30  ;;  %v107_v39 = vmul.f32 %v310_v43, %v87_v31 }
  0x2d   :  { %168 = vst.msk [vmem:[%s432_s5 + $0xc] sm:$0xf] %vm164_vm3, %v151_v23  ;;  %v108_v40 = vmul.f32 %v310_v43, %v88_v32  ;;  %v109_v41 = vmul.f32 %v310_v43, %v89_v33  ;;  %v110_v42 = vmul.f32 %v310_v43, %v90_v34  ;;  %v111_v44 = vmul.f32 %v310_v43, %v91_v35 }
  0x2e   :  { %169 = vst.msk [vmem:[%s432_s5 + $0x10] sm:$0xf] %vm164_vm3, %v152_v24  ;;  %v124_v45 = vadd.f32 %v329_v52, %v104_v36  ;;  %v125_v46 = vadd.f32 %v329_v52, %v105_v37  ;;  %v126_v47 = vadd.f32 %v329_v52, %v106_v38  ;;  %v127_v48 = vadd.f32 %v329_v52, %v107_v39 }
  0x2f   :  { %170 = vst.msk [vmem:[%s432_s5 + $0x14] sm:$0xf] %vm164_vm3, %v153_v25  ;;  %v128_v43 = vadd.f32 %v329_v52, %v108_v40  ;;  %v129_v49 = vadd.f32 %v329_v52, %v109_v41  ;;  %v130_v50 = vadd.f32 %v329_v52, %v110_v42  ;;  %v131_v51 = vadd.f32 %v329_v52, %v111_v44 }
  0x30   :  { %171 = vst.msk [vmem:[%s432_s5 + $0x18] sm:$0xf] %vm164_vm3, %v154_v26  ;;  %v140_v53 = vmax.f32 %v124_v45, 0.0  ;;  %v141_v54 = vmax.f32 %v125_v46, 0.0  ;;  %v142_v55 = vmax.f32 %v126_v47, 0.0  ;;  %v143_v56 = vmax.f32 %v127_v48, 0.0 }
  0x31   :  { %172 = vst.msk [vmem:[%s432_s5 + $0x1c] sm:$0xf] %vm164_vm3, %v155_v27  ;;  %v144_v57 = vmax.f32 %v128_v43, 0.0  ;;  %v145_v58 = vmax.f32 %v129_v49, 0.0  ;;  %v146_v52 = vmax.f32 %v130_v50, 0.0  ;;  %v147_v63 = vmax.f32 %v131_v51, 0.0 }
  0x32   :  { %v156_v59 = vpack.c.bf16 %v140_v53, %v140_v53  ;;  %v157_v60 = vpack.c.bf16 %v141_v54, %v141_v54  ;;  %v158_v61 = vpack.c.bf16 %v142_v55, %v142_v55  ;;  %v159_v62 = vpack.c.bf16 %v143_v56, %v143_v56 }
  0x33   :  { %v160_v0 = vpack.c.bf16 %v144_v57, %v144_v57  ;;  %v161_v1 = vpack.c.bf16 %v145_v58, %v145_v58  ;;  %v162_v2 = vpack.c.bf16 %v146_v52, %v146_v52  ;;  %v163_v3 = vpack.c.bf16 %v147_v63, %v147_v63 }
  0x34   :  { %173 = vst.msk [vmem:[%s432_s5 + $0x20] sm:$0xf] %vm164_vm3, %v156_v59 }
  0x35   :  { %174 = vst.msk [vmem:[%s432_s5 + $0x24] sm:$0xf] %vm164_vm3, %v157_v60 }
  0x36   :  { %175 = vst.msk [vmem:[%s432_s5 + $0x28] sm:$0xf] %vm164_vm3, %v158_v61 }
  0x37   :  { %176 = vst.msk [vmem:[%s432_s5 + $0x2c] sm:$0xf] %vm164_vm3, %v159_v62 }
  0x38   :  { %177 = vst.msk [vmem:[%s432_s5 + $0x30] sm:$0xf] %vm164_vm3, %v160_v0 }
  0x39   :  { %178 = vst.msk [vmem:[%s432_s5 + $0x34] sm:$0xf] %vm164_vm3, %v161_v1 }
  0x3a   :  { %179 = vst.msk [vmem:[%s432_s5 + $0x38] sm:$0xf] %vm164_vm3, %v162_v2 }
  0x3b   :  { %180 = vst.msk [vmem:[%s432_s5 + $0x3c] sm:$0xf] %vm164_vm3, %v163_v3 }

// kernel: residual_block_forward.8
= control target key start
LH: loop header
LB: loop body
LE: loop exit
PB: predicated region body
PF: predicated region fallthrough
CT: control target
= control target key end

     0   :  { %vm134_vm0 = vcmask 1041408   ;;  %vm19_vm1 = vcmask 64512   ;;  %v408_v1 = vmov 0.0   ;;  %vm109_vm2 = vcmask 31744   ;;  %s765_s1 = inlined_call_operand.vmem [shape: bf16[4,8], index: 1, kind: input, shape index: {}]   ;;  %s766_s0 = inlined_call_operand.vmem [shape: bf16[128,4], index: 0, kind: input, shape index: {}]   ;;  %s767_s2 = inlined_call_operand.vmem [shape: f32[128,8], index: 2, kind: output, shape index: {0}]   ;;  %s768_s3 = inlined_call_operand.vmem [shape: f32[1,8], index: 3, kind: output, shape index: {1}]   ;;  %s769_s4 = inlined_call_operand.vmem [shape: f32[1,8], index: 4, kind: output, shape index: {2}]  }
   0x1   :  { %v68_v0 = vld [vmem:[%s765_s1] sm:$0x3]  ;;  %20 = vst.msk [vmem:[%s767_s2] sm:$0xff] %vm19_vm1, %v408_v1  ;;  %v398_v4 = vld [vmem:[%s766_s0 + $0x10] sm:$0xff]  ;;  %v397_v7 = vld [vmem:[%s766_s0 + $0x8] sm:$0xff]  ;;  %vm225_vm3 = vcmask 57344  }
   0x2   :  { %v136_v2 = vsel %vm134_vm0, %v68_v0, 0  ;;  %v396_v3 = vld [vmem:[%s766_s0] sm:$0xff]  ;;  %21 = vst.msk [vmem:[%s767_s2 + $0x8] sm:$0xff] %vm19_vm1, %v408_v1  ;;  %v402_v6 = vld [vmem:[%s766_s0 + $0x30] sm:$0xff]  ;;  %v399_v8 = vld [vmem:[%s766_s0 + $0x18] sm:$0xff] }
   0x3   :  { %145 = vmatpush.bf16.msra.mxu0 %v136_v2  ;;  %404 = vmatpush.bf16.msra.mxu1 %v136_v2  ;;  %v400_v5 = vld [vmem:[%s766_s0 + $0x20] sm:$0xff]  ;;  %22 = vst.msk [vmem:[%s767_s2 + $0x10] sm:$0xff] %vm19_vm1, %v408_v1  ;;  %v401_v9 = vld [vmem:[%s766_s0 + $0x28] sm:$0xff]  ;;  %v403_v10 = vld [vmem:[%s766_s0 + $0x38] sm:$0xff] }
   0x4   :  { %405 = vmatpush.bf16.msra.mxu2 %v136_v2  ;;  %406 = vmatpush.bf16.msra.mxu3 %v136_v2  ;;  %23 = vst.msk [vmem:[%s767_s2 + $0x18] sm:$0xff] %vm19_vm1, %v408_v1 }
   0x5   :  { %24 = vst.msk [vmem:[%s767_s2 + $0x20] sm:$0xff] %vm19_vm1, %v408_v1 }
   0x6   :  { %388 = vmatmul.msk.bf16.vlgmr.msra.gmra.mxu0 %vm109_vm2, %v396_v3  ;;  %390 = vmatmul.msk.bf16.vlgmr.msra.gmra.mxu1 %vm109_vm2, %v398_v4  ;;  %25 = vst.msk [vmem:[%s767_s2 + $0x28] sm:$0xff] %vm19_vm1, %v408_v1 }
   0x7   :  { %392 = vmatmul.msk.bf16.vlgmr.msra.gmra.mxu2 %vm109_vm2, %v400_v5  ;;  %394 = vmatmul.msk.bf16.vlgmr.msra.gmra.mxu3 %vm109_vm2, %v402_v6  ;;  %26 = vst.msk [vmem:[%s767_s2 + $0x30] sm:$0xff] %vm19_vm1, %v408_v1 }
   0x8   :  { %27 = vst.msk [vmem:[%s767_s2 + $0x38] sm:$0xff] %vm19_vm1, %v408_v1  ;;  %v36_v11 = vld [vmem:[%s767_s2] sm:$0xff] }
   0x9   :  { %28 = vst.msk [vmem:[%s767_s2 + $0x40] sm:$0xff] %vm19_vm1, %v408_v1  ;;  %v37_v18 = vld [vmem:[%s767_s2 + $0x8] sm:$0xff] }
   0xa   :  { %29 = vst.msk [vmem:[%s767_s2 + $0x48] sm:$0xff] %vm19_vm1, %v408_v1  ;;  %v38_v30 = vld [vmem:[%s767_s2 + $0x10] sm:$0xff] }
   0xb   :  { %30 = vst.msk [vmem:[%s767_s2 + $0x50] sm:$0xff] %vm19_vm1, %v408_v1  ;;  %v39_v42 = vld [vmem:[%s767_s2 + $0x18] sm:$0xff] }
   0xc   :  { %31 = vst.msk [vmem:[%s767_s2 + $0x58] sm:$0xff] %vm19_vm1, %v408_v1  ;;  %v40_v12 = vld [vmem:[%s767_s2 + $0x20] sm:$0xff] }
   0xd   :  { %32 = vst.msk [vmem:[%s767_s2 + $0x60] sm:$0xff] %vm19_vm1, %v408_v1  ;;  %v41_v19 = vld [vmem:[%s767_s2 + $0x28] sm:$0xff] }
   0xe   :  { %33 = vst.msk [vmem:[%s767_s2 + $0x68] sm:$0xff] %vm19_vm1, %v408_v1  ;;  %v42_v31 = vld [vmem:[%s767_s2 + $0x30] sm:$0xff] }
   0xf   :  { %34 = vst.msk [vmem:[%s767_s2 + $0x70] sm:$0xff] %vm19_vm1, %v408_v1  ;;  %v43_v43 = vld [vmem:[%s767_s2 + $0x38] sm:$0xff] }
  0x10   :  { %35 = vst.msk [vmem:[%s767_s2 + $0x78] sm:$0xff] %vm19_vm1, %v408_v1  ;;  %v44_v17 = vld [vmem:[%s767_s2 + $0x40] sm:$0xff] }
  0x11   :  { %v45_v29 = vld [vmem:[%s767_s2 + $0x48] sm:$0xff]  ;;  %226 = vst.msk [vmem:[%s768_s3] sm:$0x1] %vm225_vm3, %v408_v1 }
  0x12   :  { %v46_v41 = vld [vmem:[%s767_s2 + $0x50] sm:$0xff]  ;;  %227 = vst.msk [vmem:[%s769_s4] sm:$0x1] %vm225_vm3, %v408_v1 }
  0x13   :  { %v47_v60 = vld [vmem:[%s767_s2 + $0x58] sm:$0xff] }
  0x14   :  { %v48_v20 = vld [vmem:[%s767_s2 + $0x60] sm:$0xff] }
  0x15   :  { %v49_v32 = vld [vmem:[%s767_s2 + $0x68] sm:$0xff] }
  0x16   :  { %389 = vmatmul.msk.bf16.gmra.mxu0 %vm109_vm2, %v397_v7  ;;  %391 = vmatmul.msk.bf16.gmra.mxu1 %vm109_vm2, %v399_v8  ;;  %v50_v44 = vld [vmem:[%s767_s2 + $0x70] sm:$0xff] }
  0x17   :  { %393 = vmatmul.msk.bf16.gmra.mxu2 %vm109_vm2, %v401_v9  ;;  %395 = vmatmul.msk.bf16.gmra.mxu3 %vm109_vm2, %v403_v10  ;;  %v51_v61 = vld [vmem:[%s767_s2 + $0x78] sm:$0xff] }
  0x83   :  { %v147_v13 = vpop.f32.mrf.mxu0  ;;  %v157_v14 = vpop.f32.mrf.mxu1 }
  0x84   :  { %v187_v15 = vadd.f32 %v147_v13, %v36_v11  ;;  %v191_v16 = vadd.f32 %v157_v14, %v40_v12 }
  0x86   :  { %204 = vst.msk [vmem:[%s767_s2] sm:$0xff] %vm19_vm1, %v187_v15 }
  0x87   :  { %208 = vst.msk [vmem:[%s767_s2 + $0x20] sm:$0xff] %vm19_vm1, %v191_v16 }
  0x8a   :  { %v167_v21 = vpop.f32.mrf.mxu2  ;;  %v177_v22 = vpop.f32.mrf.mxu3 }
  0x8b   :  { %v149_v23 = vpop.f32.mrf.mxu0  ;;  %v159_v24 = vpop.f32.mrf.mxu1  ;;  %v195_v25 = vadd.f32 %v167_v21, %v44_v17  ;;  %v199_v28 = vadd.f32 %v177_v22, %v48_v20 }
  0x8c   :  { %v188_v26 = vadd.f32 %v149_v23, %v37_v18  ;;  %v192_v27 = vadd.f32 %v159_v24, %v41_v19 }
  0x8d   :  { %212 = vst.msk [vmem:[%s767_s2 + $0x40] sm:$0xff] %vm19_vm1, %v195_v25  ;;  %v231_v54 = vld [vmem:[%s767_s2] sm:$0xff] }
  0x8e   :  { %205 = vst.msk [vmem:[%s767_s2 + $0x8] sm:$0xff] %vm19_vm1, %v188_v26  ;;  %v289_v57 = vmul.f32 %v231_v54, %v231_v54  ;;  %v248_v62 = vsel %vm19_vm1, %v231_v54, 0.0  ;;  %v235_v4 = vld [vmem:[%s767_s2 + $0x20] sm:$0xff] }
  0x8f   :  { %209 = vst.msk [vmem:[%s767_s2 + $0x28] sm:$0xff] %vm19_vm1, %v192_v27  ;;  %v293_v13 = vmul.f32 %v235_v4, %v235_v4  ;;  %v255_v19 = vsel %vm19_vm1, %v235_v4, 0.0 }
  0x90   :  { %216 = vst.msk [vmem:[%s767_s2 + $0x60] sm:$0xff] %vm19_vm1, %v199_v28  ;;  %v305_v8 = vsel %vm19_vm1, %v289_v57, 0.0 }
  0x91   :  { %v312_v25 = vsel %vm19_vm1, %v293_v13, 0.0 }
  0x92   :  { %v169_v33 = vpop.f32.mrf.mxu2  ;;  %v179_v34 = vpop.f32.mrf.mxu3 }
  0x93   :  { %v152_v35 = vpop.f32.mrf.mxu0  ;;  %v162_v36 = vpop.f32.mrf.mxu1  ;;  %v196_v37 = vadd.f32 %v169_v33, %v45_v29  ;;  %v200_v40 = vadd.f32 %v179_v34, %v49_v32 }
  0x94   :  { %v189_v38 = vadd.f32 %v152_v35, %v38_v30  ;;  %v193_v39 = vadd.f32 %v162_v36, %v42_v31  ;;  %v239_v28 = vld [vmem:[%s767_s2 + $0x40] sm:$0xff] }
  0x95   :  { %213 = vst.msk [vmem:[%s767_s2 + $0x48] sm:$0xff] %vm19_vm1, %v196_v37  ;;  %v232_v47 = vld [vmem:[%s767_s2 + $0x8] sm:$0xff]  ;;  %v297_v37 = vmul.f32 %v239_v28, %v239_v28 }
  0x96   :  { %206 = vst.msk [vmem:[%s767_s2 + $0x10] sm:$0xff] %vm19_vm1, %v189_v38  ;;  %v290_v56 = vmul.f32 %v232_v47, %v232_v47  ;;  %v249_v58 = vsel %vm19_vm1, %v232_v47, 0.0  ;;  %v236_v11 = vld [vmem:[%s767_s2 + $0x28] sm:$0xff] }
  0x97   :  { %210 = vst.msk [vmem:[%s767_s2 + $0x30] sm:$0xff] %vm19_vm1, %v193_v39  ;;  %v250_v5 = vadd.f32 %v249_v58, %v248_v62  ;;  %v294_v20 = vmul.f32 %v236_v11, %v236_v11  ;;  %v257_v26 = vsel %vm19_vm1, %v236_v11, 0.0 }
  0x98   :  { %217 = vst.msk [vmem:[%s767_s2 + $0x68] sm:$0xff] %vm19_vm1, %v200_v40  ;;  %v306_v63 = vsel %vm19_vm1, %v290_v56, 0.0 }
  0x99   :  { %v307_v10 = vadd.f32 %v306_v63, %v305_v8  ;;  %v314_v31 = vsel %vm19_vm1, %v294_v20, 0.0 }
  0x9a   :  { %v172_v45 = vpop.f32.mrf.mxu2  ;;  %v182_v46 = vpop.f32.mrf.mxu3 }
  0x9b   :  { %v154_v48 = vpop.f32.mrf.mxu0  ;;  %v164_v49 = vpop.f32.mrf.mxu1  ;;  %v197_v50 = vadd.f32 %v172_v45, %v46_v41  ;;  %v201_v53 = vadd.f32 %v182_v46, %v50_v44 }
  0x9c   :  { %v190_v51 = vadd.f32 %v154_v48, %v39_v42  ;;  %v194_v52 = vadd.f32 %v164_v49, %v43_v43  ;;  %v240_v34 = vld [vmem:[%s767_s2 + $0x48] sm:$0xff]  ;;  %v263_v43 = vsel %vm19_vm1, %v239_v28, 0.0  ;;  %v320_v49 = vsel %vm19_vm1, %v297_v37, 0.0  ;;  %v288_v37 = vld [vmem:[%s769_s4] sm:$0x1] }
  0x9d   :  { %v233_v55 = vld [vmem:[%s767_s2 + $0x10] sm:$0xff]  ;;  %214 = vst.msk [vmem:[%s767_s2 + $0x50] sm:$0xff] %vm19_vm1, %v197_v50  ;;  %v298_v44 = vmul.f32 %v240_v34, %v240_v34  ;;  %v265_v50 = vsel %vm19_vm1, %v240_v34, 0.0  ;;  %v247_v34 = vld [vmem:[%s768_s3] sm:$0x1] }
  0x9e   :  { %207 = vst.msk [vmem:[%s767_s2 + $0x18] sm:$0xff] %vm19_vm1, %v190_v51  ;;  %v291_v59 = vmul.f32 %v233_v55, %v233_v55  ;;  %v251_v0 = vsel %vm19_vm1, %v233_v55, 0.0  ;;  %v237_v17 = vld [vmem:[%s767_s2 + $0x30] sm:$0xff] }
  0x9f   :  { %211 = vst.msk [vmem:[%s767_s2 + $0x38] sm:$0xff] %vm19_vm1, %v194_v52  ;;  %v252_v12 = vadd.f32 %v251_v0, %v250_v5  ;;  %v295_v27 = vmul.f32 %v237_v17, %v237_v17  ;;  %v259_v32 = vsel %vm19_vm1, %v237_v17, 0.0  ;;  %v243_v52 = vld [vmem:[%s767_s2 + $0x60] sm:$0xff]  ;;  %v322_v55 = vsel %vm19_vm1, %v298_v44, 0.0 }
  0xa0   :  { %218 = vst.msk [vmem:[%s767_s2 + $0x70] sm:$0xff] %vm19_vm1, %v201_v53  ;;  %v308_v9 = vsel %vm19_vm1, %v291_v59, 0.0  ;;  %v271_v4 = vsel %vm19_vm1, %v243_v52, 0.0 }
  0xa1   :  { %v309_v16 = vadd.f32 %v308_v9, %v307_v10  ;;  %v316_v38 = vsel %vm19_vm1, %v295_v27, 0.0 }
  0xa2   :  { %v174_v2 = vpop.f32.mrf.mxu2  ;;  %v184_v3 = vpop.f32.mrf.mxu3 }
  0xa3   :  { %v198_v6 = vadd.f32 %v174_v2, %v47_v60  ;;  %v202_v7 = vadd.f32 %v184_v3, %v51_v61  ;;  %v244_v60 = vld [vmem:[%s767_s2 + $0x68] sm:$0xff]  ;;  %v301_v61 = vmul.f32 %v243_v52, %v243_v52 }
  0xa4   :  { %v241_v42 = vld [vmem:[%s767_s2 + $0x50] sm:$0xff]  ;;  %v302_v5 = vmul.f32 %v244_v60, %v244_v60  ;;  %v273_v11 = vsel %vm19_vm1, %v244_v60, 0.0 }
  0xa5   :  { %v234_v1 = vld [vmem:[%s767_s2 + $0x18] sm:$0xff]  ;;  %215 = vst.msk [vmem:[%s767_s2 + $0x58] sm:$0xff] %vm19_vm1, %v198_v6  ;;  %v299_v51 = vmul.f32 %v241_v42, %v241_v42  ;;  %v267_v56 = vsel %vm19_vm1, %v241_v42, 0.0  ;;  %v328_v10 = vsel %vm19_vm1, %v301_v61, 0.0 }
  0xa6   :  { %v253_v14 = vsel %vm19_vm1, %v234_v1, 0.0  ;;  %v292_v15 = vmul.f32 %v234_v1, %v234_v1  ;;  %219 = vst.msk [vmem:[%s767_s2 + $0x78] sm:$0xff] %vm19_vm1, %v202_v7  ;;  %v238_v24 = vld [vmem:[%s767_s2 + $0x38] sm:$0xff] }
  0xa7   :  { %v254_v18 = vadd.f32 %v253_v14, %v252_v12  ;;  %v296_v33 = vmul.f32 %v238_v24, %v238_v24  ;;  %v261_v39 = vsel %vm19_vm1, %v238_v24, 0.0  ;;  %v324_v62 = vsel %vm19_vm1, %v299_v51, 0.0  ;;  %v245_v3 = vld [vmem:[%s767_s2 + $0x70] sm:$0xff] }
  0xa8   :  { %v310_v21 = vsel %vm19_vm1, %v292_v15, 0.0  ;;  %v303_v12 = vmul.f32 %v245_v3, %v245_v3  ;;  %v330_v14 = vsel %vm19_vm1, %v302_v5, 0.0  ;;  %v275_v15 = vsel %vm19_vm1, %v245_v3, 0.0 }
  0xa9   :  { %v256_v22 = vadd.f32 %v255_v19, %v254_v18  ;;  %v311_v23 = vadd.f32 %v310_v21, %v309_v16  ;;  %v318_v45 = vsel %vm19_vm1, %v296_v33, 0.0 }
  0xaa   :  { %v332_v19 = vsel %vm19_vm1, %v303_v12, 0.0 }
  0xab   :  { %v313_v29 = vadd.f32 %v312_v25, %v311_v23  ;;  %v258_v30 = vadd.f32 %v257_v26, %v256_v22 }
  0xac   :  { %v242_v48 = vld [vmem:[%s767_s2 + $0x58] sm:$0xff] }
  0xad   :  { %v260_v35 = vadd.f32 %v259_v32, %v258_v30  ;;  %v315_v36 = vadd.f32 %v314_v31, %v313_v29  ;;  %v300_v57 = vmul.f32 %v242_v48, %v242_v48  ;;  %v269_v63 = vsel %vm19_vm1, %v242_v48, 0.0  ;;  %v246_v9 = vld [vmem:[%s767_s2 + $0x78] sm:$0xff] }
  0xae   :  { %v304_v16 = vmul.f32 %v246_v9, %v246_v9  ;;  %v277_v20 = vsel %vm19_vm1, %v246_v9, 0.0 }
  0xaf   :  { %v262_v40 = vadd.f32 %v261_v39, %v260_v35  ;;  %v317_v41 = vadd.f32 %v316_v38, %v315_v36  ;;  %v326_v6 = vsel %vm19_vm1, %v300_v57, 0.0 }
  0xb0   :  { %v334_v23 = vsel %vm19_vm1, %v304_v16, 0.0 }
  0xb1   :  { %v264_v46 = vadd.f32 %v263_v43, %v262_v40  ;;  %v319_v47 = vadd.f32 %v318_v45, %v317_v41 }
  0xb3   :  { %v321_v53 = vadd.f32 %v320_v49, %v319_v47  ;;  %v266_v54 = vadd.f32 %v265_v50, %v264_v46 }
  0xb5   :  { %v268_v58 = vadd.f32 %v267_v56, %v266_v54  ;;  %v323_v59 = vadd.f32 %v322_v55, %v321_v53 }
  0xb7   :  { %v325_v0 = vadd.f32 %v324_v62, %v323_v59  ;;  %v270_v2 = vadd.f32 %v269_v63, %v268_v58 }
  0xb9   :  { %v272_v7 = vadd.f32 %v271_v4, %v270_v2  ;;  %v327_v8 = vadd.f32 %v326_v6, %v325_v0 }
  0xbb   :  { %v329_v1 = vadd.f32 %v328_v10, %v327_v8  ;;  %v274_v13 = vadd.f32 %v273_v11, %v272_v7 }
  0xbd   :  { %v276_v17 = vadd.f32 %v275_v15, %v274_v13  ;;  %v331_v18 = vadd.f32 %v330_v14, %v329_v1 }
  0xbf   :  { %v333_v21 = vadd.f32 %v332_v19, %v331_v18  ;;  %v278_v22 = vadd.f32 %v277_v20, %v276_v17 }
  0xc1   :  { %v279_v24 = vrot.slane %v278_v22, 4  ;;  %v335_v25 = vadd.f32 %v334_v23, %v333_v21 }
  0xc3   :  { %v280_v26 = vadd.f32 %v279_v24, %v278_v22  ;;  %v336_v27 = vrot.slane %v335_v25, 4 }
  0xc5   :  { %v281_v28 = vrot.slane %v280_v26, 2  ;;  %v337_v29 = vadd.f32 %v336_v27, %v335_v25 }
  0xc7   :  { %v282_v30 = vadd.f32 %v281_v28, %v280_v26  ;;  %v338_v31 = vrot.slane %v337_v29, 2 }
  0xc9   :  { %v283_v32 = vrot.slane %v282_v30, 1  ;;  %v339_v33 = vadd.f32 %v338_v31, %v337_v29 }
  0xcb   :  { %v284_v35 = vadd.f32 %v283_v32, %v282_v30  ;;  %v340_v36 = vrot.slane %v339_v33, 1 }
  0xcd   :  { %v285_v38 = vadd.f32 %v284_v35, %v247_v34  ;;  %v341_v39 = vadd.f32 %v340_v36, %v339_v33 }
  0xcf   :  { %287 = vst.msk [vmem:[%s768_s3] sm:$0x1] %vm225_vm3, %v285_v38  ;;  %v342_v40 = vadd.f32 %v341_v39, %v288_v37 }
  0xd1   :  { %343 = vst.msk [vmem:[%s769_s4] sm:$0x1] %vm225_vm3, %v342_v40 }

// kernel: residual_block_forward.9
= control target key start
LH: loop header
LB: loop body
LE: loop exit
PB: predicated region body
PF: predicated region fallthrough
CT: control target
= control target key end

     0   :  { %vm148_vm3 = vcmask 60416   ;;  %s378_s1 = inlined_call_operand.vmem [shape: f32[1,8], index: 1, kind: input, shape index: {}]   ;;  %s379_s2 = inlined_call_operand.vmem [shape: f32[1,8], index: 2, kind: input, shape index: {}]   ;;  %s380_s3 = inlined_call_operand.vmem [shape: f32[1,8], index: 3, kind: input, shape index: {}]   ;;  %s381_s4 = inlined_call_operand.vmem [shape: f32[1,8], index: 4, kind: input, shape index: {}]   ;;  %s382_s0 = inlined_call_operand.vmem [shape: f32[128,8], index: 0, kind: input, shape index: {}]   ;;  %s383_s5 = inlined_call_operand.vmem [shape: bf16[128,8], index: 5, kind: output, shape index: {}]  }
   0x1   :  { %v36_v0 = vld [vmem:[%s378_s1] sm:$0x1]  ;;  %v21_v14 = vld [vmem:[%s382_s0 + $0x8] sm:$0xff]  ;;  %v22_v15 = vld [vmem:[%s382_s0 + $0x10] sm:$0xff] }
   0x2   :  { %v38_v1 = vld [vmem:[%s379_s2] sm:$0x1]  ;;  %v37_v2 = vmul.f32 0.0078125, %v36_v0  ;;  %v23_v16 = vld [vmem:[%s382_s0 + $0x18] sm:$0xff]  ;;  %v25_v19 = vld [vmem:[%s382_s0 + $0x28] sm:$0xff] }
   0x3   :  { %v39_v3 = vmul.f32 0.0078125, %v38_v1  ;;  %v20_v11 = vld [vmem:[%s382_s0] sm:$0xff]  ;;  %v26_v20 = vld [vmem:[%s382_s0 + $0x30] sm:$0xff]  ;;  %v27_v21 = vld [vmem:[%s382_s0 + $0x38] sm:$0xff] }
   0x4   :  { %v40_v4 = vmul.f32 %v37_v2, %v37_v2  ;;  %v212_v12 = vperm.slane %v37_v2, 0  ;;  %v24_v17 = vld [vmem:[%s382_s0 + $0x20] sm:$0xff]  ;;  %v247_v24 = vld [vmem:[%s382_s0 + $0x48] sm:$0xff]  ;;  %v30_v28 = vld [vmem:[%s382_s0 + $0x50] sm:$0xff] }
   0x5   :  { %v242_v23 = vld [vmem:[%s382_s0 + $0x40] sm:$0xff]  ;;  %v31_v29 = vld [vmem:[%s382_s0 + $0x58] sm:$0xff]  ;;  %v33_v35 = vld [vmem:[%s382_s0 + $0x68] sm:$0xff] }
   0x6   :  { %v41_v5 = vsub.f32 %v39_v3, %v40_v4  ;;  %v46_v25 = vsub.f32 %v20_v11, %v212_v12  ;;  %v47_v27 = vsub.f32 %v21_v14, %v212_v12  ;;  %v260_v30 = vld [vmem:[%s382_s0 + $0x60] sm:$0xff]  ;;  %v48_v31 = vsub.f32 %v22_v15, %v212_v12  ;;  %v34_v36 = vld [vmem:[%s382_s0 + $0x70] sm:$0xff]  ;;  %v35_v37 = vld [vmem:[%s382_s0 + $0x78] sm:$0xff] }
   0x7   :  { %v49_v32 = vsub.f32 %v23_v16, %v212_v12  ;;  %v50_v33 = vsub.f32 %v24_v17, %v212_v12  ;;  %v51_v34 = vsub.f32 %v25_v19, %v212_v12  ;;  %v52_v39 = vsub.f32 %v26_v20, %v212_v12  ;;  %v169_v43 = vld [vmem:[%s380_s3] ss:$0 sm:$0xff] }
   0x8   :  { %v42_v6 = vmax.f32 %v41_v5, 0.0  ;;  %v53_v40 = vsub.f32 %v27_v21, %v212_v12  ;;  %v54_v41 = vsub.f32 %v242_v23, %v212_v12  ;;  %v55_v44 = vsub.f32 %v247_v24, %v212_v12  ;;  %v296_v52 = vld [vmem:[%s381_s4] ss:$0 sm:$0xff] }
   0x9   :  { %v56_v45 = vsub.f32 %v30_v28, %v212_v12  ;;  %v57_v46 = vsub.f32 %v31_v29, %v212_v12  ;;  %v58_v47 = vsub.f32 %v260_v30, %v212_v12  ;;  %v59_v48 = vsub.f32 %v33_v35, %v212_v12 }
   0xa   :  { %v62_v7 = vadd.f32 1e-05, %v42_v6  ;;  %v60_v49 = vsub.f32 %v34_v36, %v212_v12  ;;  %v61_v50 = vsub.f32 %v35_v37, %v212_v12 }
   0xc   :  { %171 = vrsqrt.f32 %v62_v7  ;;  %vm69_vm0 = vweird.f32 %v62_v7 }
  0x12   :  { %v172_v8 = vpop.eup %171 }
  0x13   :  { %v64_v9 = vmul.f32 %v172_v8, %v62_v7  ;;  %vm70_vm1 = vweird.f32 %v172_v8 }
  0x14   :  { %vm235_vm2 = vmor %vm69_vm0, %vm70_vm1 }
  0x15   :  { %v65_v10 = vmul.f32 %v172_v8, %v64_v9 }
  0x17   :  { %v66_v13 = vmul.f32 0.5, %v65_v10 }
  0x19   :  { %v67_v18 = vsub.f32 1.5, %v66_v13 }
  0x1b   :  { %v68_v26 = vmul.f32 %v172_v8, %v67_v18 }
  0x1d   :  { %v72_v38 = vsel %vm235_vm2, %v172_v8, %v68_v26 }
  0x1e   :  { %v74_v42 = vperm.slane %v72_v38, 0 }
  0x20   :  { %v76_v51 = vmul.f32 %v74_v42, %v46_v25  ;;  %v77_v53 = vmul.f32 %v74_v42, %v47_v27  ;;  %v78_v54 = vmul.f32 %v74_v42, %v48_v31  ;;  %v79_v55 = vmul.f32 %v74_v42, %v49_v32 }
  0x21   :  { %v80_v56 = vmul.f32 %v74_v42, %v50_v33  ;;  %v81_v57 = vmul.f32 %v74_v42, %v51_v34  ;;  %v82_v58 = vmul.f32 %v74_v42, %v52_v39  ;;  %v83_v59 = vmul.f32 %v74_v42, %v53_v40 }
  0x22   :  { %v96_v60 = vmul.f32 %v169_v43, %v76_v51  ;;  %v97_v61 = vmul.f32 %v169_v43, %v77_v53  ;;  %v98_v62 = vmul.f32 %v169_v43, %v78_v54  ;;  %v99_v63 = vmul.f32 %v169_v43, %v79_v55 }
  0x23   :  { %v100_v0 = vmul.f32 %v169_v43, %v80_v56  ;;  %v101_v1 = vmul.f32 %v169_v43, %v81_v57  ;;  %v102_v2 = vmul.f32 %v169_v43, %v82_v58  ;;  %v103_v3 = vmul.f32 %v169_v43, %v83_v59 }
  0x24   :  { %v116_v4 = vadd.f32 %v296_v52, %v96_v60  ;;  %v117_v5 = vadd.f32 %v296_v52, %v97_v61  ;;  %v118_v6 = vadd.f32 %v296_v52, %v98_v62  ;;  %v119_v7 = vadd.f32 %v296_v52, %v99_v63 }
  0x25   :  { %v120_v8 = vadd.f32 %v296_v52, %v100_v0  ;;  %v121_v9 = vadd.f32 %v296_v52, %v101_v1  ;;  %v122_v10 = vadd.f32 %v296_v52, %v102_v2  ;;  %v123_v11 = vadd.f32 %v296_v52, %v103_v3 }
  0x26   :  { %v132_v12 = vpack.c.bf16 %v116_v4, %v116_v4  ;;  %v133_v13 = vpack.c.bf16 %v117_v5, %v117_v5  ;;  %v134_v14 = vpack.c.bf16 %v118_v6, %v118_v6  ;;  %v135_v15 = vpack.c.bf16 %v119_v7, %v119_v7 }
  0x27   :  { %v136_v16 = vpack.c.bf16 %v120_v8, %v120_v8  ;;  %v137_v17 = vpack.c.bf16 %v121_v9, %v121_v9  ;;  %v138_v18 = vpack.c.bf16 %v122_v10, %v122_v10  ;;  %v139_v19 = vpack.c.bf16 %v123_v11, %v123_v11 }
  0x28   :  { %149 = vst.msk [vmem:[%s383_s5] sm:$0xf] %vm148_vm3, %v132_v12  ;;  %v84_v20 = vmul.f32 %v74_v42, %v54_v41  ;;  %v85_v21 = vmul.f32 %v74_v42, %v55_v44  ;;  %v86_v22 = vmul.f32 %v74_v42, %v56_v45  ;;  %v87_v23 = vmul.f32 %v74_v42, %v57_v46 }
  0x29   :  { %150 = vst.msk [vmem:[%s383_s5 + $0x4] sm:$0xf] %vm148_vm3, %v133_v13  ;;  %v88_v24 = vmul.f32 %v74_v42, %v58_v47  ;;  %v89_v25 = vmul.f32 %v74_v42, %v59_v48  ;;  %v90_v26 = vmul.f32 %v74_v42, %v60_v49  ;;  %v91_v27 = vmul.f32 %v74_v42, %v61_v50 }
  0x2a   :  { %151 = vst.msk [vmem:[%s383_s5 + $0x8] sm:$0xf] %vm148_vm3, %v134_v14  ;;  %v104_v28 = vmul.f32 %v169_v43, %v84_v20  ;;  %v105_v29 = vmul.f32 %v169_v43, %v85_v21  ;;  %v106_v30 = vmul.f32 %v169_v43, %v86_v22  ;;  %v107_v31 = vmul.f32 %v169_v43, %v87_v23 }
  0x2b   :  { %152 = vst.msk [vmem:[%s383_s5 + $0xc] sm:$0xf] %vm148_vm3, %v135_v15  ;;  %v108_v32 = vmul.f32 %v169_v43, %v88_v24  ;;  %v109_v33 = vmul.f32 %v169_v43, %v89_v25  ;;  %v110_v34 = vmul.f32 %v169_v43, %v90_v26  ;;  %v111_v35 = vmul.f32 %v169_v43, %v91_v27 }
  0x2c   :  { %153 = vst.msk [vmem:[%s383_s5 + $0x10] sm:$0xf] %vm148_vm3, %v136_v16  ;;  %v124_v36 = vadd.f32 %v296_v52, %v104_v28  ;;  %v125_v37 = vadd.f32 %v296_v52, %v105_v29  ;;  %v126_v38 = vadd.f32 %v296_v52, %v106_v30  ;;  %v127_v39 = vadd.f32 %v296_v52, %v107_v31 }
  0x2d   :  { %154 = vst.msk [vmem:[%s383_s5 + $0x14] sm:$0xf] %vm148_vm3, %v137_v17  ;;  %v128_v40 = vadd.f32 %v296_v52, %v108_v32  ;;  %v129_v41 = vadd.f32 %v296_v52, %v109_v33  ;;  %v130_v45 = vadd.f32 %v296_v52, %v110_v34  ;;  %v131_v47 = vadd.f32 %v296_v52, %v111_v35 }
  0x2e   :  { %155 = vst.msk [vmem:[%s383_s5 + $0x18] sm:$0xf] %vm148_vm3, %v138_v18  ;;  %v140_v42 = vpack.c.bf16 %v124_v36, %v124_v36  ;;  %v141_v43 = vpack.c.bf16 %v125_v37, %v125_v37  ;;  %v142_v44 = vpack.c.bf16 %v126_v38, %v126_v38  ;;  %v143_v46 = vpack.c.bf16 %v127_v39, %v127_v39 }
  0x2f   :  { %156 = vst.msk [vmem:[%s383_s5 + $0x1c] sm:$0xf] %vm148_vm3, %v139_v19  ;;  %v144_v48 = vpack.c.bf16 %v128_v40, %v128_v40  ;;  %v145_v49 = vpack.c.bf16 %v129_v41, %v129_v41  ;;  %v146_v50 = vpack.c.bf16 %v130_v45, %v130_v45  ;;  %v147_v51 = vpack.c.bf16 %v131_v47, %v131_v47 }
  0x30   :  { %157 = vst.msk [vmem:[%s383_s5 + $0x20] sm:$0xf] %vm148_vm3, %v140_v42 }
  0x31   :  { %158 = vst.msk [vmem:[%s383_s5 + $0x24] sm:$0xf] %vm148_vm3, %v141_v43 }
  0x32   :  { %159 = vst.msk [vmem:[%s383_s5 + $0x28] sm:$0xf] %vm148_vm3, %v142_v44 }
  0x33   :  { %160 = vst.msk [vmem:[%s383_s5 + $0x2c] sm:$0xf] %vm148_vm3, %v143_v46 }
  0x34   :  { %161 = vst.msk [vmem:[%s383_s5 + $0x30] sm:$0xf] %vm148_vm3, %v144_v48 }
  0x35   :  { %162 = vst.msk [vmem:[%s383_s5 + $0x34] sm:$0xf] %vm148_vm3, %v145_v49 }
  0x36   :  { %163 = vst.msk [vmem:[%s383_s5 + $0x38] sm:$0xf] %vm148_vm3, %v146_v50 }
  0x37   :  { %164 = vst.msk [vmem:[%s383_s5 + $0x3c] sm:$0xf] %vm148_vm3, %v147_v51 }

// kernel: residual_block_forward.15
= control target key start
LH: loop header
LB: loop body
LE: loop exit
PB: predicated region body
PF: predicated region fallthrough
CT: control target
= control target key end

     0   :  { %vm199_vm3 = vcmask 64512   ;;  %s625_s2 = inlined_call_operand.vmem [shape: f32[1,8], index: 2, kind: input, shape index: {}]   ;;  %s626_s3 = inlined_call_operand.vmem [shape: f32[1,8], index: 3, kind: input, shape index: {}]   ;;  %s627_s4 = inlined_call_operand.vmem [shape: f32[1,8], index: 4, kind: input, shape index: {}]   ;;  %s628_s5 = inlined_call_operand.vmem [shape: f32[1,8], index: 5, kind: input, shape index: {}]   ;;  %s629_s1 = inlined_call_operand.vmem [shape: bf16[128,8], index: 1, kind: input, shape index: {}]   ;;  %s630_s0 = inlined_call_operand.vmem [shape: f32[128,8], index: 0, kind: input, shape index: {}]   ;;  %s631_s6 = inlined_call_operand.vmem [shape: f32[128,8], index: 6, kind: output, shape index: {}]  }
   0x1   :  { %v39_v0 = vld [vmem:[%s625_s2] sm:$0x1]  ;;  %v314_v12 = vld [vmem:[%s629_s1 + $0x8] sm:$0xff]   ;;  %v329_v16 = vld [vmem:[%s630_s0 + $0x10] sm:$0xff] }
   0x2   :  { %v41_v1 = vld [vmem:[%s626_s3] sm:$0x1]  ;;  %v40_v2 = vmul.f32 0.0078125, %v39_v0  ;;  %v324_v15 = vld [vmem:[%s630_s0 + $0x8] sm:$0xff]  ;;  %v334_v17 = vld [vmem:[%s630_s0 + $0x18] sm:$0xff]  ;;  %v226_v20 = vunpack.c.l.bf16 %v314_v12  ;;  %v227_v32 = vunpack.c.h.bf16 %v314_v12 }
   0x3   :  { %v42_v3 = vmul.f32 0.0078125, %v41_v1  ;;  %v309_v11 = vld [vmem:[%s629_s1] sm:$0xff]   ;;  %v347_v22 = vld [vmem:[%s629_s1 + $0x10] sm:$0xff]   ;;  %v28_v23 = vld [vmem:[%s630_s0 + $0x28] sm:$0xff] }
   0x4   :  { %v43_v4 = vmul.f32 %v40_v2, %v40_v2  ;;  %v304_v9 = vperm.slane %v40_v2, 0  ;;  %v319_v13 = vld [vmem:[%s630_s0] sm:$0xff]  ;;  %v222_v18 = vunpack.c.l.bf16 %v309_v11  ;;  %v223_v19 = vunpack.c.h.bf16 %v309_v11  ;;  %v29_v26 = vld [vmem:[%s630_s0 + $0x30] sm:$0xff]  ;;  %v360_v27 = vld [vmem:[%s629_s1 + $0x18] sm:$0xff]  }
   0x5   :  { %v342_v21 = vld [vmem:[%s630_s0 + $0x20] sm:$0xff]  ;;  %v30_v28 = vld [vmem:[%s630_s0 + $0x38] sm:$0xff]  ;;  %v380_v34 = vld [vmem:[%s630_s0 + $0x48] sm:$0xff]  ;;  %v230_v38 = vunpack.c.l.bf16 %v347_v22  ;;  %v231_v44 = vunpack.c.h.bf16 %v347_v22  ;;  %v234_v46 = vunpack.c.l.bf16 %v360_v27  ;;  %v235_v51 = vunpack.c.h.bf16 %v360_v27 }
   0x6   :  { %v44_v5 = vsub.f32 %v42_v3, %v43_v4  ;;  %v49_v24 = vsub.f32 %v319_v13, %v304_v9  ;;  %v50_v29 = vsub.f32 %v324_v15, %v304_v9  ;;  %v51_v30 = vsub.f32 %v329_v16, %v304_v9  ;;  %v375_v33 = vld [vmem:[%s630_s0 + $0x40] sm:$0xff]  ;;  %v385_v35 = vld [vmem:[%s630_s0 + $0x50] sm:$0xff]  ;;  %v394_v40 = vld [vmem:[%s630_s0 + $0x58] sm:$0xff] }
   0x7   :  { %v52_v31 = vsub.f32 %v334_v17, %v304_v9  ;;  %v53_v37 = vsub.f32 %v342_v21, %v304_v9  ;;  %v54_v39 = vsub.f32 %v28_v23, %v304_v9  ;;  %v399_v41 = vld [vmem:[%s630_s0 + $0x60] sm:$0xff]  ;;  %v404_v42 = vld [vmem:[%s630_s0 + $0x68] sm:$0xff]  ;;  %v55_v45 = vsub.f32 %v29_v26, %v304_v9  ;;  %v424_v49 = vld [vmem:[%s630_s0 + $0x70] sm:$0xff] }
   0x8   :  { %v45_v6 = vmax.f32 %v44_v5, 0.0  ;;  %v56_v47 = vsub.f32 %v30_v28, %v304_v9  ;;  %v419_v48 = vld [vmem:[%s629_s1 + $0x20] sm:$0xff]   ;;  %v57_v52 = vsub.f32 %v375_v33, %v304_v9  ;;  %v58_v53 = vsub.f32 %v380_v34, %v304_v9  ;;  %v434_v54 = vld [vmem:[%s629_s1 + $0x28] sm:$0xff]   ;;  %v439_v55 = vld [vmem:[%s630_s0 + $0x78] sm:$0xff] }
   0x9   :  { %v59_v56 = vsub.f32 %v385_v35, %v304_v9  ;;  %v60_v57 = vsub.f32 %v394_v40, %v304_v9  ;;  %v61_v58 = vsub.f32 %v399_v41, %v304_v9  ;;  %v450_v59 = vld [vmem:[%s629_s1 + $0x30] sm:$0xff]   ;;  %v62_v60 = vsub.f32 %v404_v42, %v304_v9  ;;  %v457_v61 = vld [vmem:[%s629_s1 + $0x38] sm:$0xff]   ;;  %v468_v3 = vld [vmem:[%s627_s4] ss:$0 sm:$0xff] }
   0xa   :  { %v65_v7 = vadd.f32 1e-05, %v45_v6  ;;  %v238_v63 = vunpack.c.l.bf16 %v419_v48  ;;  %v239_v0 = vunpack.c.h.bf16 %v419_v48  ;;  %v63_v1 = vsub.f32 %v424_v49, %v304_v9  ;;  %v481_v15 = vld [vmem:[%s628_s5] ss:$0 sm:$0xff] }
   0xb   :  { %v242_v4 = vunpack.c.l.bf16 %v434_v54  ;;  %v243_v5 = vunpack.c.h.bf16 %v434_v54  ;;  %v64_v6 = vsub.f32 %v439_v55, %v304_v9  ;;  %v251_v13 = vunpack.c.h.bf16 %v457_v61 }
   0xc   :  { %261 = vrsqrt.f32 %v65_v7  ;;  %vm72_vm0 = vweird.f32 %v65_v7 }
  0x12   :  { %v262_v8 = vpop.eup %261 }
  0x13   :  { %v67_v10 = vmul.f32 %v262_v8, %v65_v7  ;;  %vm73_vm1 = vweird.f32 %v262_v8  ;;  %v246_v7 = vunpack.c.l.bf16 %v450_v59 }
  0x14   :  { %vm408_vm2 = vmor %vm72_vm0, %vm73_vm1 }
  0x15   :  { %v68_v14 = vmul.f32 %v262_v8, %v67_v10  ;;  %v250_v10 = vunpack.c.l.bf16 %v457_v61 }
  0x17   :  { %v69_v25 = vmul.f32 0.5, %v68_v14 }
  0x19   :  { %v70_v36 = vsub.f32 1.5, %v69_v25 }
  0x1b   :  { %v71_v50 = vmul.f32 %v262_v8, %v70_v36 }
  0x1d   :  { %v75_v62 = vsel %vm408_vm2, %v262_v8, %v71_v50  ;;  %v247_v8 = vunpack.c.h.bf16 %v450_v59 }
  0x1e   :  { %v77_v2 = vperm.slane %v75_v62, 0 }
  0x20   :  { %v79_v14 = vmul.f32 %v77_v2, %v49_v24  ;;  %v80_v16 = vmul.f32 %v77_v2, %v50_v29  ;;  %v81_v17 = vmul.f32 %v77_v2, %v51_v30  ;;  %v82_v21 = vmul.f32 %v77_v2, %v52_v31 }
  0x21   :  { %v83_v23 = vmul.f32 %v77_v2, %v53_v37  ;;  %v84_v25 = vmul.f32 %v77_v2, %v54_v39  ;;  %v85_v26 = vmul.f32 %v77_v2, %v55_v45  ;;  %v86_v27 = vmul.f32 %v77_v2, %v56_v47 }
  0x22   :  { %v99_v28 = vmul.f32 %v468_v3, %v79_v14  ;;  %v100_v36 = vmul.f32 %v468_v3, %v80_v16  ;;  %v101_v43 = vmul.f32 %v468_v3, %v81_v17  ;;  %v102_v24 = vmul.f32 %v468_v3, %v82_v21 }
  0x23   :  { %v103_v49 = vmul.f32 %v468_v3, %v83_v23  ;;  %v104_v50 = vmul.f32 %v468_v3, %v84_v25  ;;  %v105_v29 = vmul.f32 %v468_v3, %v85_v26  ;;  %v106_v30 = vmul.f32 %v468_v3, %v86_v27 }
  0x24   :  { %v119_v31 = vadd.f32 %v481_v15, %v99_v28  ;;  %v120_v37 = vadd.f32 %v481_v15, %v100_v36  ;;  %v121_v39 = vadd.f32 %v481_v15, %v101_v43  ;;  %v122_v45 = vadd.f32 %v481_v15, %v102_v24 }
  0x25   :  { %v123_v47 = vadd.f32 %v481_v15, %v103_v49  ;;  %v124_v55 = vadd.f32 %v481_v15, %v104_v50  ;;  %v125_v62 = vadd.f32 %v481_v15, %v105_v29  ;;  %v126_v14 = vadd.f32 %v481_v15, %v106_v30 }
  0x26   :  { %v167_v16 = vadd.f32 %v222_v18, %v119_v31  ;;  %v168_v17 = vadd.f32 %v223_v19, %v120_v37  ;;  %v169_v21 = vadd.f32 %v226_v20, %v121_v39  ;;  %v170_v23 = vadd.f32 %v227_v32, %v122_v45 }
  0x27   :  { %v171_v25 = vadd.f32 %v230_v38, %v123_v47  ;;  %v172_v26 = vadd.f32 %v231_v44, %v124_v55  ;;  %v173_v27 = vadd.f32 %v234_v46, %v125_v62  ;;  %v174_v28 = vadd.f32 %v235_v51, %v126_v14 }
  0x28   :  { %v183_v36 = vmax.f32 %v167_v16, 0.0  ;;  %v184_v43 = vmax.f32 %v168_v17, 0.0  ;;  %v185_v18 = vmax.f32 %v169_v21, 0.0  ;;  %v186_v24 = vmax.f32 %v170_v23, 0.0 }
  0x29   :  { %v187_v11 = vmax.f32 %v171_v25, 0.0  ;;  %v188_v19 = vmax.f32 %v172_v26, 0.0  ;;  %v189_v49 = vmax.f32 %v173_v27, 0.0  ;;  %v190_v50 = vmax.f32 %v174_v28, 0.0 }
  0x2a   :  { %200 = vst.msk [vmem:[%s631_s6] sm:$0xff] %vm199_vm3, %v183_v36  ;;  %v87_v12 = vmul.f32 %v77_v2, %v57_v52  ;;  %v88_v20 = vmul.f32 %v77_v2, %v58_v53  ;;  %v89_v22 = vmul.f32 %v77_v2, %v59_v56  ;;  %v90_v32 = vmul.f32 %v77_v2, %v60_v57 }
  0x2b   :  { %201 = vst.msk [vmem:[%s631_s6 + $0x8] sm:$0xff] %vm199_vm3, %v184_v43  ;;  %v91_v33 = vmul.f32 %v77_v2, %v61_v58  ;;  %v92_v34 = vmul.f32 %v77_v2, %v62_v60  ;;  %v93_v38 = vmul.f32 %v77_v2, %v63_v1  ;;  %v94_v35 = vmul.f32 %v77_v2, %v64_v6 }
  0x2c   :  { %202 = vst.msk [vmem:[%s631_s6 + $0x10] sm:$0xff] %vm199_vm3, %v185_v18  ;;  %v107_v40 = vmul.f32 %v468_v3, %v87_v12  ;;  %v108_v44 = vmul.f32 %v468_v3, %v88_v20  ;;  %v109_v46 = vmul.f32 %v468_v3, %v89_v22  ;;  %v110_v41 = vmul.f32 %v468_v3, %v90_v32 }
  0x2d   :  { %203 = vst.msk [vmem:[%s631_s6 + $0x18] sm:$0xff] %vm199_vm3, %v186_v24  ;;  %v111_v9 = vmul.f32 %v468_v3, %v91_v33  ;;  %v112_v42 = vmul.f32 %v468_v3, %v92_v34  ;;  %v113_v51 = vmul.f32 %v468_v3, %v93_v38  ;;  %v114_v52 = vmul.f32 %v468_v3, %v94_v35 }
  0x2e   :  { %204 = vst.msk [vmem:[%s631_s6 + $0x20] sm:$0xff] %vm199_vm3, %v187_v11  ;;  %v127_v53 = vadd.f32 %v481_v15, %v107_v40  ;;  %v128_v56 = vadd.f32 %v481_v15, %v108_v44  ;;  %v129_v57 = vadd.f32 %v481_v15, %v109_v46  ;;  %v130_v58 = vadd.f32 %v481_v15, %v110_v41 }
  0x2f   :  { %205 = vst.msk [vmem:[%s631_s6 + $0x28] sm:$0xff] %vm199_vm3, %v188_v19  ;;  %v131_v60 = vadd.f32 %v481_v15, %v111_v9  ;;  %v132_v1 = vadd.f32 %v481_v15, %v112_v42  ;;  %v133_v2 = vadd.f32 %v481_v15, %v113_v51  ;;  %v134_v3 = vadd.f32 %v481_v15, %v114_v52 }
  0x30   :  { %206 = vst.msk [vmem:[%s631_s6 + $0x30] sm:$0xff] %vm199_vm3, %v189_v49  ;;  %v175_v6 = vadd.f32 %v238_v63, %v127_v53  ;;  %v176_v29 = vadd.f32 %v239_v0, %v128_v56  ;;  %v177_v30 = vadd.f32 %v242_v4, %v129_v57  ;;  %v178_v31 = vadd.f32 %v243_v5, %v130_v58 }
  0x31   :  { %207 = vst.msk [vmem:[%s631_s6 + $0x38] sm:$0xff] %vm199_vm3, %v190_v50  ;;  %v179_v15 = vadd.f32 %v246_v7, %v131_v60  ;;  %v180_v63 = vadd.f32 %v247_v8, %v132_v1  ;;  %v181_v4 = vadd.f32 %v250_v10, %v133_v2  ;;  %v182_v54 = vadd.f32 %v251_v13, %v134_v3 }
  0x32   :  { %v191_v37 = vmax.f32 %v175_v6, 0.0  ;;  %v192_v48 = vmax.f32 %v176_v29, 0.0  ;;  %v193_v0 = vmax.f32 %v177_v30, 0.0  ;;  %v194_v39 = vmax.f32 %v178_v31, 0.0 }
  0x33   :  { %v195_v5 = vmax.f32 %v179_v15, 0.0  ;;  %v196_v59 = vmax.f32 %v180_v63, 0.0  ;;  %v197_v7 = vmax.f32 %v181_v4, 0.0  ;;  %v198_v61 = vmax.f32 %v182_v54, 0.0 }
  0x34   :  { %208 = vst.msk [vmem:[%s631_s6 + $0x40] sm:$0xff] %vm199_vm3, %v191_v37 }
  0x35   :  { %209 = vst.msk [vmem:[%s631_s6 + $0x48] sm:$0xff] %vm199_vm3, %v192_v48 }
  0x36   :  { %210 = vst.msk [vmem:[%s631_s6 + $0x50] sm:$0xff] %vm199_vm3, %v193_v0 }
  0x37   :  { %211 = vst.msk [vmem:[%s631_s6 + $0x58] sm:$0xff] %vm199_vm3, %v194_v39 }
  0x38   :  { %212 = vst.msk [vmem:[%s631_s6 + $0x60] sm:$0xff] %vm199_vm3, %v195_v5 }
  0x39   :  { %213 = vst.msk [vmem:[%s631_s6 + $0x68] sm:$0xff] %vm199_vm3, %v196_v59 }
  0x3a   :  { %214 = vst.msk [vmem:[%s631_s6 + $0x70] sm:$0xff] %vm199_vm3, %v197_v7 }
  0x3b   :  { %215 = vst.msk [vmem:[%s631_s6 + $0x78] sm:$0xff] %vm199_vm3, %v198_v61 }

</bundles_post_ra>
